<compile_context>
chip_gen: v5e
topology: v5e:2x2
jax: 0.10.0
libtpu: 0.0.40
codegen_flags: <defaults>
</compile_context>

<pallas_src>
import functools

import jax
import jax.numpy as jnp
from jax.experimental import pallas as pl
from jax.experimental.pallas import tpu as pltpu


# ----------------------------- config (small, synthetic) -----------------------------
VOCAB = 64
D_MODEL = 32
D_KV = 8
N_HEADS = 4          # inner dim = N_HEADS * D_KV = 32
D_FF = 64
REL_BUCKETS = 8
REL_MAX_DIST = 16
PAD_ID = 0           # also decoder_start_token_id (T5 convention)
NEG_INF = -1e9
INNER = N_HEADS * D_KV


# ----------------------------- in-kernel helpers -----------------------------
def _rms(x, w):
    """T5 LayerNorm (no mean subtraction, no bias). f32 VPU math."""
    var = jnp.mean(x * x, axis=-1, keepdims=True)
    return x * jax.lax.rsqrt(var + 1e-6) * w


def _dot(a, b):
    """A @ B with bf16 MXU inputs, f32 accumulation."""
    return jnp.dot(a.astype(jnp.bfloat16), b.astype(jnp.bfloat16),
                   preferred_element_type=jnp.float32)


def _dot_nt(a, b):
    """A @ B.T with bf16 MXU inputs, f32 accumulation."""
    return jnp.dot(a.astype(jnp.bfloat16), jnp.transpose(b).astype(jnp.bfloat16),
                   preferred_element_type=jnp.float32)


def _softmax_rows(s):
    m = jnp.max(s, axis=-1, keepdims=True)
    p = jnp.exp(s - m)
    return p * pl.reciprocal(jnp.sum(p, axis=-1, keepdims=True), approx=True)


def _multihead(q, k, v, wo, bias_fn):
    """q:(Sq, H*Dk) k,v:(Sk, H*Dk) wo:(H*Dk, D).  Static head loop; per-head output
    is projected and accumulated (avoids a lane concat).  T5 does NOT scale by 1/sqrt(d)."""
    out = jnp.zeros((q.shape[0], D_MODEL), jnp.float32)
    for h in range(N_HEADS):
        sl = slice(h * D_KV, (h + 1) * D_KV)
        s = _dot_nt(q[:, sl], k[:, sl]) + bias_fn(h)          # (Sq, Sk)
        p = _softmax_rows(s)
        oh = _dot(p, v[:, sl])                                 # (Sq, Dk)
        out = out + _dot(oh, wo[sl, :])                        # (Sq, D)
    return out


# ----------------------------- fused encoder kernel -----------------------------
def _encoder_block_kernel(x_ref, mask_ref, bias_ref,
                          ln_sa_ref, wqkv_ref, wo_ref,
                          ln_ff_ref, wi_ref, wo_ff_ref, ln_f_ref,
                          out_ref):
    x = x_ref[0]                                               # (Se, D) f32
    mask_bias = (1.0 - mask_ref[0]) * NEG_INF                  # (1, Se)

    # self-attention sublayer
    h = _rms(x, ln_sa_ref[...])
    qkv = _dot(h, wqkv_ref[...])                               # (Se, 3*INNER)
    q, k, v = qkv[:, :INNER], qkv[:, INNER:2 * INNER], qkv[:, 2 * INNER:]
    x = x + _multihead(q, k, v, wo_ref[...], lambda hd: bias_ref[hd] + mask_bias)

    # feed-forward sublayer (DenseReluDense)
    h = _rms(x, ln_ff_ref[...])
    ff = jnp.maximum(_dot(h, wi_ref[...]), 0.0)
    x = x + _dot(ff, wo_ff_ref[...])

    # encoder final layer norm
    out_ref[0] = _rms(x, ln_f_ref[...])


def fused_encoder(x_emb, mask_f, rel_bias, blk, final_ln):
    B, Se, D = x_emb.shape
    w2 = lambda arr: pl.BlockSpec(arr.shape, lambda b: (0, 0))
    return pl.pallas_call(
        _encoder_block_kernel,
        out_shape=jax.ShapeDtypeStruct((B, Se, D), jnp.float32),
        grid=(B,),
        in_specs=[
            pl.BlockSpec((1, Se, D), lambda b: (b, 0, 0)),          # embeddings
            pl.BlockSpec((1, 1, Se), lambda b: (b, 0, 0)),          # attention mask
            pl.BlockSpec((N_HEADS, Se, Se), lambda b: (0, 0, 0)),   # shared rel bias
            w2(blk["ln_sa"]), w2(blk["wqkv"]), w2(blk["wo"]),
            w2(blk["ln_ff"]), w2(blk["wi"]), w2(blk["wo_ff"]),
            w2(final_ln),
        ],
        out_specs=pl.BlockSpec((1, Se, D), lambda b: (b, 0, 0)),
        compiler_params=pltpu.CompilerParams(dimension_semantics=("parallel",)),
    )(x_emb, mask_f, rel_bias,
      blk["ln_sa"], blk["wqkv"], blk["wo"],
      blk["ln_ff"], blk["wi"], blk["wo_ff"], final_ln)


# ----------------------------- fused decoder + LM head + NLL kernel -----------------------------
def _decoder_block_kernel(x_ref, enc_ref, mask_ref, bias_ref, lab_ref,
                          ln_sa_ref, wqkv_ref, wo_sa_ref,
                          ln_ca_ref, wq_ca_ref, wkv_ca_ref, wo_ca_ref,
                          ln_ff_ref, wi_ref, wo_ff_ref, ln_f_ref, emb_ref,
                          logits_ref, nll_ref):
    x = x_ref[0]                                               # (Sd, D)
    enc = enc_ref[0]                                           # (Se, D)
    mask_bias = (1.0 - mask_ref[0]) * NEG_INF                  # (1, Se)
    lab = lab_ref[0]                                           # (Sd, 1) int32

    # causal self-attention (bias_ref already contains rel-pos + causal mask)
    h = _rms(x, ln_sa_ref[...])
    qkv = _dot(h, wqkv_ref[...])                               # (Sd, 3*INNER)
    q, k, v = qkv[:, :INNER], qkv[:, INNER:2 * INNER], qkv[:, 2 * INNER:]
    x = x + _multihead(q, k, v, wo_sa_ref[...], lambda hd: bias_ref[hd])

    # cross-attention over encoder output (padding mask only, no positional bias)
    h = _rms(x, ln_ca_ref[...])
    q = _dot(h, wq_ca_ref[...])                                # (Sd, INNER)
    kv = _dot(enc, wkv_ca_ref[...])                            # (Se, 2*INNER)
    k, v = kv[:, :INNER], kv[:, INNER:]
    x = x + _multihead(q, k, v, wo_ca_ref[...], lambda hd: mask_bias)

    # feed-forward sublayer
    h = _rms(x, ln_ff_ref[...])
    ff = jnp.maximum(_dot(h, wi_ref[...]), 0.0)
    x = x + _dot(ff, wo_ff_ref[...])

    # final LN + tied LM head (T5 rescales by d_model**-0.5) + per-token NLL
    dec = _rms(x, ln_f_ref[...]) * (D_MODEL ** -0.5)
    logits = _dot_nt(dec, emb_ref[...])                        # (Sd, V)
    m = jnp.max(logits, axis=-1, keepdims=True)
    lse = m + jnp.log(jnp.sum(jnp.exp(logits - m), axis=-1, keepdims=True))
    iota = jax.lax.broadcasted_iota(jnp.int32, logits.shape, 1)
    safe = jnp.where(lab == -100, 0, lab)
    onehot = (iota == safe).astype(jnp.float32)                # (Sd, V)
    picked = jnp.sum(logits * onehot, axis=-1, keepdims=True)  # (Sd, 1)
    valid = (lab != -100).astype(jnp.float32)

    logits_ref[0] = logits
    nll_ref[0] = (lse - picked) * valid


def fused_decoder(dec_x, enc_out, mask_f, dec_bias, labels_col, blk, final_ln, emb):
    B, Sd, D = dec_x.shape
    Se = enc_out.shape[1]
    w2 = lambda arr: pl.BlockSpec(arr.shape, lambda b: (0, 0))
    return pl.pallas_call(
        _decoder_block_kernel,
        out_shape=(jax.ShapeDtypeStruct((B, Sd, VOCAB), jnp.float32),
                   jax.ShapeDtypeStruct((B, Sd, 1), jnp.float32)),
        grid=(B,),
        in_specs=[
            pl.BlockSpec((1, Sd, D), lambda b: (b, 0, 0)),          # decoder embeddings
            pl.BlockSpec((1, Se, D), lambda b: (b, 0, 0)),          # encoder output
            pl.BlockSpec((1, 1, Se), lambda b: (b, 0, 0)),          # encoder padding mask
            pl.BlockSpec((N_HEADS, Sd, Sd), lambda b: (0, 0, 0)),   # shared rel+causal bias
            pl.BlockSpec((1, Sd, 1), lambda b: (b, 0, 0)),          # labels
            w2(blk["ln_sa"]), w2(blk["wqkv"]), w2(blk["wo"]),
            w2(blk["ln_ca"]), w2(blk["wq_ca"]), w2(blk["wkv_ca"]), w2(blk["wo_ca"]),
            w2(blk["ln_ff"]), w2(blk["wi"]), w2(blk["wo_ff"]),
            w2(final_ln), w2(emb),
        ],
        out_specs=[pl.BlockSpec((1, Sd, VOCAB), lambda b: (b, 0, 0)),
                   pl.BlockSpec((1, Sd, 1), lambda b: (b, 0, 0))],
        compiler_params=pltpu.CompilerParams(dimension_semantics=("parallel",)),
    )(dec_x, enc_out, mask_f, dec_bias, labels_col,
      blk["ln_sa"], blk["wqkv"], blk["wo"],
      blk["ln_ca"], blk["wq_ca"], blk["wkv_ca"], blk["wo_ca"],
      blk["ln_ff"], blk["wi"], blk["wo_ff"], final_ln, emb)


# ----------------------------- T5 glue (plain JAX) -----------------------------
def relative_position_bucket(relative_position, bidirectional, num_buckets, max_distance):
    ret = jnp.zeros_like(relative_position)
    n = relative_position
    if bidirectional:
        num_buckets //= 2
        ret = ret + (n > 0).astype(jnp.int32) * num_buckets
        n = jnp.abs(n)
    else:
        n = -jnp.minimum(n, 0)
    max_exact = num_buckets // 2
    is_small = n < max_exact
    val_if_large = max_exact + (
        jnp.log(n.astype(jnp.float32) / max_exact + 1e-6)
        / jnp.log(max_distance / max_exact)
        * (num_buckets - max_exact)
    ).astype(jnp.int32)
    val_if_large = jnp.minimum(val_if_large, num_buckets - 1)
    return ret + jnp.where(is_small, n, val_if_large)


def compute_rel_bias(q_len, k_len, table, bidirectional):
    ctx = jnp.arange(q_len)[:, None]
    mem = jnp.arange(k_len)[None, :]
    rel = mem - ctx
    buckets = relative_position_bucket(rel, bidirectional, REL_BUCKETS, REL_MAX_DIST)
    bias = table[buckets]                       # (q, k, H)
    return jnp.transpose(bias, (2, 0, 1))       # (H, q, k)


def shift_right(labels):
    lab = jnp.where(labels == -100, PAD_ID, labels)
    start = jnp.full((labels.shape[0], 1), PAD_ID, dtype=labels.dtype)
    return jnp.concatenate([start, lab[:, :-1]], axis=1)


def generation_model_forward(params, input_ids, attention_mask, labels):
    """Mirrors GenerationModel.forward -> dict(loss, logits, encoder_last_hidden_state)."""
    B, Se = input_ids.shape
    Sd = labels.shape[1]
    emb = params["embedding"]                                   # (V, D)

    # ---------------- encoder (one fused Pallas kernel) ----------------
    enc_x = emb[input_ids]                                      # (B, Se, D)
    mask_f = attention_mask.astype(jnp.float32).reshape(B, 1, Se)
    enc_rel = compute_rel_bias(Se, Se, params["enc_rel_table"], bidirectional=True)  # (H,Se,Se)
    enc_out = fused_encoder(enc_x, mask_f, enc_rel,
                            params["encoder_block"], params["enc_final_ln"])

    # ---------------- decoder + LM head + NLL (one fused Pallas kernel) ----------------
    dec_ids = shift_right(labels)
    dec_x = emb[dec_ids]                                        # (B, Sd, D)
    causal = jnp.where(jnp.arange(Sd)[None, :] > jnp.arange(Sd)[:, None], NEG_INF, 0.0)
    dec_rel = compute_rel_bias(Sd, Sd, params["dec_rel_table"], bidirectional=False)
    dec_bias = dec_rel + causal[None]                           # (H, Sd, Sd), shared over batch
    labels_col = labels.reshape(B, Sd, 1)
    logits, nll = fused_decoder(dec_x, enc_out, mask_f, dec_bias, labels_col,
                                params["decoder_block"], params["dec_final_ln"], emb)

    # ---------------- cross-entropy reduction (ignore_index = -100) ----------------
    valid = (labels != -100).astype(jnp.float32)
    loss = jnp.sum(nll[..., 0]) / jnp.maximum(jnp.sum(valid), 1.0)

    return {"loss": loss, "logits": logits, "encoder_last_hidden_state": enc_out}


# ----------------------------- deterministic parameter init -----------------------------
def init_params(key):
    keys = iter(jax.random.split(key, 32))

    def dense(shape, scale=0.02):
        return jax.random.normal(next(keys), shape, dtype=jnp.float32) * scale

    def ln():
        return jnp.ones((1, D_MODEL), jnp.float32)

    enc_blk = {"ln_sa": ln(), "ln_ff": ln(),
               "wqkv": dense((D_MODEL, 3 * INNER)), "wo": dense((INNER, D_MODEL)),
               "wi": dense((D_MODEL, D_FF)), "wo_ff": dense((D_FF, D_MODEL))}
    dec_blk = {"ln_sa": ln(), "ln_ca": ln(), "ln_ff": ln(),
               "wqkv": dense((D_MODEL, 3 * INNER)), "wo": dense((INNER, D_MODEL)),
               "wq_ca": dense((D_MODEL, INNER)), "wkv_ca": dense((D_MODEL, 2 * INNER)),
               "wo_ca": dense((INNER, D_MODEL)),
               "wi": dense((D_MODEL, D_FF)), "wo_ff": dense((D_FF, D_MODEL))}
    return {
        "embedding": dense((VOCAB, D_MODEL), scale=1.0),
        "enc_rel_table": dense((REL_BUCKETS, N_HEADS)),
        "dec_rel_table": dense((REL_BUCKETS, N_HEADS)),
        "encoder_block": enc_blk,
        "decoder_block": dec_blk,
        "enc_final_ln": ln(),
        "dec_final_ln": ln(),
    }


# ----------------------------- main -----------------------------
if __name__ == "__main__":
    key = jax.random.PRNGKey(0)
    pkey, ikey, lkey = jax.random.split(key, 3)
    params = init_params(pkey)

    B, Se, Sd = 2, 8, 8
    input_ids = jax.random.randint(ikey, (B, Se), 1, VOCAB, dtype=jnp.int32)
    attention_mask = jnp.array([[1, 1, 1, 1, 1, 1, 1, 1],
                                [1, 1, 1, 1, 1, 0, 0, 0]], dtype=jnp.int32)
    labels = jax.random.randint(lkey, (B, Sd), 1, VOCAB, dtype=jnp.int32)
    labels = labels.at[1, 6:].set(-100)  # ignored positions

    # TODO(synk): dropout (dropout_rate) and generate()/beam-search are not modeled; this is
    # the deterministic training forward (loss) path only, like the reference forward().
    fwd = jax.jit(functools.partial(generation_model_forward, params))
    out = fwd(input_ids, attention_mask, labels)
    jax.block_until_ready(out)

    assert out["logits"].shape == (B, Sd, VOCAB)
    assert out["encoder_last_hidden_state"].shape == (B, Se, D_MODEL)
    assert out["loss"].shape == ()
    assert jnp.isfinite(out["loss"])
    print("KERNEL_OK")
</pallas_src>

<mosaic_0001>
module attributes {stable_mosaic.version = 11 : i64} {
  func.func @_encoder_block_kernel(%arg0: i32, %arg1: memref<1x8x32xf32, #tpu.memory_space<vmem>>, %arg2: memref<1x1x8xf32, #tpu.memory_space<vmem>>, %arg3: memref<4x8x8xf32, #tpu.memory_space<vmem>>, %arg4: memref<1x32xf32, #tpu.memory_space<vmem>>, %arg5: memref<32x96xf32, #tpu.memory_space<vmem>>, %arg6: memref<32x32xf32, #tpu.memory_space<vmem>>, %arg7: memref<1x32xf32, #tpu.memory_space<vmem>>, %arg8: memref<32x64xf32, #tpu.memory_space<vmem>>, %arg9: memref<64x32xf32, #tpu.memory_space<vmem>>, %arg10: memref<1x32xf32, #tpu.memory_space<vmem>>, %arg11: memref<1x8x32xf32, #tpu.memory_space<vmem>>) attributes {dimension_semantics = [#tpu.dimension_semantics<parallel>], iteration_bounds = array<i64: 2>, scalar_prefetch = 0 : i64, scratch_operands = 0 : i64, tpu.core_type = #tpu.core_type<tc>, window_params = [{transform_indices = @transform_0, window_bounds = array<i64: 1, 8, 32>}, {transform_indices = @transform_1, window_bounds = array<i64: 1, 1, 8>}, {pipeline_mode = #tpu.pipeline_mode<synchronous>, transform_indices = @transform_2, window_bounds = array<i64: 4, 8, 8>}, {pipeline_mode = #tpu.pipeline_mode<synchronous>, transform_indices = @transform_3, window_bounds = array<i64: 1, 32>}, {pipeline_mode = #tpu.pipeline_mode<synchronous>, transform_indices = @transform_4, window_bounds = array<i64: 32, 96>}, {pipeline_mode = #tpu.pipeline_mode<synchronous>, transform_indices = @transform_5, window_bounds = array<i64: 32, 32>}, {pipeline_mode = #tpu.pipeline_mode<synchronous>, transform_indices = @transform_6, window_bounds = array<i64: 1, 32>}, {pipeline_mode = #tpu.pipeline_mode<synchronous>, transform_indices = @transform_7, window_bounds = array<i64: 32, 64>}, {pipeline_mode = #tpu.pipeline_mode<synchronous>, transform_indices = @transform_8, window_bounds = array<i64: 64, 32>}, {pipeline_mode = #tpu.pipeline_mode<synchronous>, transform_indices = @transform_9, window_bounds = array<i64: 1, 32>}, {transform_indices = @transform_10, window_bounds = array<i64: 1, 8, 32>}]} {
    %c0 = arith.constant 0 : index
    %c0_0 = arith.constant 0 : index
    %c0_1 = arith.constant 0 : index
    %0 = vector.load %arg1[%c0, %c0_0, %c0_1] : memref<1x8x32xf32, #tpu.memory_space<vmem>>, vector<1x8x32xf32>
    %1 = vector.shape_cast %0 : vector<1x8x32xf32> to vector<8x32xf32>
    %c0_2 = arith.constant 0 : index
    %c0_3 = arith.constant 0 : index
    %c0_4 = arith.constant 0 : index
    %2 = vector.load %arg2[%c0_2, %c0_3, %c0_4] : memref<1x1x8xf32, #tpu.memory_space<vmem>>, vector<1x1x8xf32>
    %3 = vector.shape_cast %2 : vector<1x1x8xf32> to vector<1x8xf32>
    %cst = arith.constant 1.000000e+00 : f32
    %4 = vector.broadcast %cst : f32 to vector<1x8xf32>
    %5 = arith.subf %4, %3 : vector<1x8xf32>
    %cst_5 = arith.constant -1.000000e+09 : f32
    %6 = vector.broadcast %cst_5 : f32 to vector<1x8xf32>
    %7 = arith.mulf %5, %6 : vector<1x8xf32>
    %c0_6 = arith.constant 0 : index
    %c0_7 = arith.constant 0 : index
    %8 = vector.load %arg4[%c0_6, %c0_7] : memref<1x32xf32, #tpu.memory_space<vmem>>, vector<1x32xf32>
    %9 = arith.mulf %1, %1 : vector<8x32xf32>
    %cst_8 = arith.constant dense<0.000000e+00> : vector<8xf32>
    %10 = vector.multi_reduction <add>, %9, %cst_8 [1] : vector<8x32xf32> to vector<8xf32>
    %11 = vector.shape_cast %10 : vector<8xf32> to vector<8x1xf32>
    %cst_9 = arith.constant 3.200000e+01 : f32
    %12 = vector.broadcast %cst_9 : f32 to vector<8x1xf32>
    %13 = arith.divf %11, %12 : vector<8x1xf32>
    %cst_10 = arith.constant 9.99999997E-7 : f32
    %14 = vector.broadcast %cst_10 : f32 to vector<8x1xf32>
    %15 = arith.addf %13, %14 : vector<8x1xf32>
    %16 = math.rsqrt %15 : vector<8x1xf32>
    %17 = vector.broadcast %16 : vector<8x1xf32> to vector<8x32xf32>
    %18 = arith.mulf %1, %17 : vector<8x32xf32>
    %19 = vector.broadcast %8 : vector<1x32xf32> to vector<8x32xf32>
    %20 = arith.mulf %18, %19 : vector<8x32xf32>
    %c0_11 = arith.constant 0 : index
    %c0_12 = arith.constant 0 : index
    %21 = vector.load %arg5[%c0_11, %c0_12] : memref<32x96xf32, #tpu.memory_space<vmem>>, vector<32x96xf32>
    %22 = arith.truncf %20 : vector<8x32xf32> to vector<8x32xbf16>
    %23 = arith.truncf %21 : vector<32x96xf32> to vector<32x96xbf16>
    %cst_13 = arith.constant dense<0.000000e+00> : vector<8x96xf32>
    %24 = tpu.matmul %22, %23, %cst_13 {dimension_numbers = #tpu.dot_dimension_numbers<[1], [0], [0], [1], [0, 0, 1, 1], [], []>} : vector<8x32xbf16>, vector<32x96xbf16>, vector<8x96xf32> -> vector<8x96xf32>
    %25 = vector.extract_strided_slice %24 {offsets = [0, 0], sizes = [8, 32], strides = [1, 1]} : vector<8x96xf32> to vector<8x32xf32>
    %26 = vector.extract_strided_slice %24 {offsets = [0, 32], sizes = [8, 32], strides = [1, 1]} : vector<8x96xf32> to vector<8x32xf32>
    %27 = vector.extract_strided_slice %24 {offsets = [0, 64], sizes = [8, 32], strides = [1, 1]} : vector<8x96xf32> to vector<8x32xf32>
    %c0_14 = arith.constant 0 : index
    %c0_15 = arith.constant 0 : index
    %28 = vector.load %arg6[%c0_14, %c0_15] : memref<32x32xf32, #tpu.memory_space<vmem>>, vector<32x32xf32>
    %cst_16 = arith.constant 0.000000e+00 : f32
    %29 = vector.broadcast %cst_16 : f32 to vector<8x32xf32>
    %30 = vector.extract_strided_slice %25 {offsets = [0, 0], sizes = [8, 8], strides = [1, 1]} : vector<8x32xf32> to vector<8x8xf32>
    %31 = vector.extract_strided_slice %26 {offsets = [0, 0], sizes = [8, 8], strides = [1, 1]} : vector<8x32xf32> to vector<8x8xf32>
    %32 = arith.truncf %30 : vector<8x8xf32> to vector<8x8xbf16>
    %33 = tpu.transpose %31, [1, 0] : vector<8x8xf32> -> vector<8x8xf32>
    %34 = arith.truncf %33 : vector<8x8xf32> to vector<8x8xbf16>
    %cst_17 = arith.constant dense<0.000000e+00> : vector<8x8xf32>
    %35 = tpu.matmul %32, %34, %cst_17 {dimension_numbers = #tpu.dot_dimension_numbers<[1], [0], [0], [1], [0, 0, 1, 1], [], []>} : vector<8x8xbf16>, vector<8x8xbf16>, vector<8x8xf32> -> vector<8x8xf32>
    %c0_18 = arith.constant 0 : index
    %c0_19 = arith.constant 0 : index
    %c0_20 = arith.constant 0 : index
    %36 = vector.load %arg3[%c0_18, %c0_19, %c0_20] : memref<4x8x8xf32, #tpu.memory_space<vmem>>, vector<1x8x8xf32>
    %37 = vector.shape_cast %36 : vector<1x8x8xf32> to vector<8x8xf32>
    %38 = vector.broadcast %7 : vector<1x8xf32> to vector<8x8xf32>
    %39 = arith.addf %37, %38 : vector<8x8xf32>
    %40 = arith.addf %35, %39 : vector<8x8xf32>
    %cst_21 = arith.constant dense<0xFF800000> : vector<8xf32>
    %41 = vector.multi_reduction <maximumf>, %40, %cst_21 [1] : vector<8x8xf32> to vector<8xf32>
    %42 = vector.shape_cast %41 : vector<8xf32> to vector<8x1xf32>
    %43 = vector.broadcast %42 : vector<8x1xf32> to vector<8x8xf32>
    %44 = arith.subf %40, %43 : vector<8x8xf32>
    %45 = math.exp %44 : vector<8x8xf32>
    %cst_22 = arith.constant dense<0.000000e+00> : vector<8xf32>
    %46 = vector.multi_reduction <add>, %45, %cst_22 [1] : vector<8x8xf32> to vector<8xf32>
    %47 = vector.shape_cast %46 : vector<8xf32> to vector<8x1xf32>
    %48 = tpu.reciprocal %47 {approx = true} : vector<8x1xf32> -> vector<8x1xf32>
    %49 = vector.broadcast %48 : vector<8x1xf32> to vector<8x8xf32>
    %50 = arith.mulf %45, %49 : vector<8x8xf32>
    %51 = vector.extract_strided_slice %27 {offsets = [0, 0], sizes = [8, 8], strides = [1, 1]} : vector<8x32xf32> to vector<8x8xf32>
    %52 = arith.truncf %50 : vector<8x8xf32> to vector<8x8xbf16>
    %53 = arith.truncf %51 : vector<8x8xf32> to vector<8x8xbf16>
    %cst_23 = arith.constant dense<0.000000e+00> : vector<8x8xf32>
    %54 = tpu.matmul %52, %53, %cst_23 {dimension_numbers = #tpu.dot_dimension_numbers<[1], [0], [0], [1], [0, 0, 1, 1], [], []>} : vector<8x8xbf16>, vector<8x8xbf16>, vector<8x8xf32> -> vector<8x8xf32>
    %55 = vector.extract_strided_slice %28 {offsets = [0, 0], sizes = [8, 32], strides = [1, 1]} : vector<32x32xf32> to vector<8x32xf32>
    %56 = arith.truncf %54 : vector<8x8xf32> to vector<8x8xbf16>
    %57 = arith.truncf %55 : vector<8x32xf32> to vector<8x32xbf16>
    %cst_24 = arith.constant dense<0.000000e+00> : vector<8x32xf32>
    %58 = tpu.matmul %56, %57, %cst_24 {dimension_numbers = #tpu.dot_dimension_numbers<[1], [0], [0], [1], [0, 0, 1, 1], [], []>} : vector<8x8xbf16>, vector<8x32xbf16>, vector<8x32xf32> -> vector<8x32xf32>
    %59 = arith.addf %29, %58 : vector<8x32xf32>
    %60 = vector.extract_strided_slice %25 {offsets = [0, 8], sizes = [8, 8], strides = [1, 1]} : vector<8x32xf32> to vector<8x8xf32>
    %61 = vector.extract_strided_slice %26 {offsets = [0, 8], sizes = [8, 8], strides = [1, 1]} : vector<8x32xf32> to vector<8x8xf32>
    %62 = arith.truncf %60 : vector<8x8xf32> to vector<8x8xbf16>
    %63 = tpu.transpose %61, [1, 0] : vector<8x8xf32> -> vector<8x8xf32>
    %64 = arith.truncf %63 : vector<8x8xf32> to vector<8x8xbf16>
    %cst_25 = arith.constant dense<0.000000e+00> : vector<8x8xf32>
    %65 = tpu.matmul %62, %64, %cst_25 {dimension_numbers = #tpu.dot_dimension_numbers<[1], [0], [0], [1], [0, 0, 1, 1], [], []>} : vector<8x8xbf16>, vector<8x8xbf16>, vector<8x8xf32> -> vector<8x8xf32>
    %c1 = arith.constant 1 : index
    %c0_26 = arith.constant 0 : index
    %c0_27 = arith.constant 0 : index
    %66 = vector.load %arg3[%c1, %c0_26, %c0_27] : memref<4x8x8xf32, #tpu.memory_space<vmem>>, vector<1x8x8xf32>
    %67 = vector.shape_cast %66 : vector<1x8x8xf32> to vector<8x8xf32>
    %68 = vector.broadcast %7 : vector<1x8xf32> to vector<8x8xf32>
    %69 = arith.addf %67, %68 : vector<8x8xf32>
    %70 = arith.addf %65, %69 : vector<8x8xf32>
    %cst_28 = arith.constant dense<0xFF800000> : vector<8xf32>
    %71 = vector.multi_reduction <maximumf>, %70, %cst_28 [1] : vector<8x8xf32> to vector<8xf32>
    %72 = vector.shape_cast %71 : vector<8xf32> to vector<8x1xf32>
    %73 = vector.broadcast %72 : vector<8x1xf32> to vector<8x8xf32>
    %74 = arith.subf %70, %73 : vector<8x8xf32>
    %75 = math.exp %74 : vector<8x8xf32>
    %cst_29 = arith.constant dense<0.000000e+00> : vector<8xf32>
    %76 = vector.multi_reduction <add>, %75, %cst_29 [1] : vector<8x8xf32> to vector<8xf32>
    %77 = vector.shape_cast %76 : vector<8xf32> to vector<8x1xf32>
    %78 = tpu.reciprocal %77 {approx = true} : vector<8x1xf32> -> vector<8x1xf32>
    %79 = vector.broadcast %78 : vector<8x1xf32> to vector<8x8xf32>
    %80 = arith.mulf %75, %79 : vector<8x8xf32>
    %81 = vector.extract_strided_slice %27 {offsets = [0, 8], sizes = [8, 8], strides = [1, 1]} : vector<8x32xf32> to vector<8x8xf32>
    %82 = arith.truncf %80 : vector<8x8xf32> to vector<8x8xbf16>
    %83 = arith.truncf %81 : vector<8x8xf32> to vector<8x8xbf16>
    %cst_30 = arith.constant dense<0.000000e+00> : vector<8x8xf32>
    %84 = tpu.matmul %82, %83, %cst_30 {dimension_numbers = #tpu.dot_dimension_numbers<[1], [0], [0], [1], [0, 0, 1, 1], [], []>} : vector<8x8xbf16>, vector<8x8xbf16>, vector<8x8xf32> -> vector<8x8xf32>
    %85 = vector.extract_strided_slice %28 {offsets = [8, 0], sizes = [8, 32], strides = [1, 1]} : vector<32x32xf32> to vector<8x32xf32>
    %86 = arith.truncf %84 : vector<8x8xf32> to vector<8x8xbf16>
    %87 = arith.truncf %85 : vector<8x32xf32> to vector<8x32xbf16>
    %cst_31 = arith.constant dense<0.000000e+00> : vector<8x32xf32>
    %88 = tpu.matmul %86, %87, %cst_31 {dimension_numbers = #tpu.dot_dimension_numbers<[1], [0], [0], [1], [0, 0, 1, 1], [], []>} : vector<8x8xbf16>, vector<8x32xbf16>, vector<8x32xf32> -> vector<8x32xf32>
    %89 = arith.addf %59, %88 : vector<8x32xf32>
    %90 = vector.extract_strided_slice %25 {offsets = [0, 16], sizes = [8, 8], strides = [1, 1]} : vector<8x32xf32> to vector<8x8xf32>
    %91 = vector.extract_strided_slice %26 {offsets = [0, 16], sizes = [8, 8], strides = [1, 1]} : vector<8x32xf32> to vector<8x8xf32>
    %92 = arith.truncf %90 : vector<8x8xf32> to vector<8x8xbf16>
    %93 = tpu.transpose %91, [1, 0] : vector<8x8xf32> -> vector<8x8xf32>
    %94 = arith.truncf %93 : vector<8x8xf32> to vector<8x8xbf16>
    %cst_32 = arith.constant dense<0.000000e+00> : vector<8x8xf32>
    %95 = tpu.matmul %92, %94, %cst_32 {dimension_numbers = #tpu.dot_dimension_numbers<[1], [0], [0], [1], [0, 0, 1, 1], [], []>} : vector<8x8xbf16>, vector<8x8xbf16>, vector<8x8xf32> -> vector<8x8xf32>
    %c2 = arith.constant 2 : index
    %c0_33 = arith.constant 0 : index
    %c0_34 = arith.constant 0 : index
    %96 = vector.load %arg3[%c2, %c0_33, %c0_34] : memref<4x8x8xf32, #tpu.memory_space<vmem>>, vector<1x8x8xf32>
    %97 = vector.shape_cast %96 : vector<1x8x8xf32> to vector<8x8xf32>
    %98 = vector.broadcast %7 : vector<1x8xf32> to vector<8x8xf32>
    %99 = arith.addf %97, %98 : vector<8x8xf32>
    %100 = arith.addf %95, %99 : vector<8x8xf32>
    %cst_35 = arith.constant dense<0xFF800000> : vector<8xf32>
    %101 = vector.multi_reduction <maximumf>, %100, %cst_35 [1] : vector<8x8xf32> to vector<8xf32>
    %102 = vector.shape_cast %101 : vector<8xf32> to vector<8x1xf32>
    %103 = vector.broadcast %102 : vector<8x1xf32> to vector<8x8xf32>
    %104 = arith.subf %100, %103 : vector<8x8xf32>
    %105 = math.exp %104 : vector<8x8xf32>
    %cst_36 = arith.constant dense<0.000000e+00> : vector<8xf32>
    %106 = vector.multi_reduction <add>, %105, %cst_36 [1] : vector<8x8xf32> to vector<8xf32>
    %107 = vector.shape_cast %106 : vector<8xf32> to vector<8x1xf32>
    %108 = tpu.reciprocal %107 {approx = true} : vector<8x1xf32> -> vector<8x1xf32>
    %109 = vector.broadcast %108 : vector<8x1xf32> to vector<8x8xf32>
    %110 = arith.mulf %105, %109 : vector<8x8xf32>
    %111 = vector.extract_strided_slice %27 {offsets = [0, 16], sizes = [8, 8], strides = [1, 1]} : vector<8x32xf32> to vector<8x8xf32>
    %112 = arith.truncf %110 : vector<8x8xf32> to vector<8x8xbf16>
    %113 = arith.truncf %111 : vector<8x8xf32> to vector<8x8xbf16>
    %cst_37 = arith.constant dense<0.000000e+00> : vector<8x8xf32>
    %114 = tpu.matmul %112, %113, %cst_37 {dimension_numbers = #tpu.dot_dimension_numbers<[1], [0], [0], [1], [0, 0, 1, 1], [], []>} : vector<8x8xbf16>, vector<8x8xbf16>, vector<8x8xf32> -> vector<8x8xf32>
    %115 = vector.extract_strided_slice %28 {offsets = [16, 0], sizes = [8, 32], strides = [1, 1]} : vector<32x32xf32> to vector<8x32xf32>
    %116 = arith.truncf %114 : vector<8x8xf32> to vector<8x8xbf16>
    %117 = arith.truncf %115 : vector<8x32xf32> to vector<8x32xbf16>
    %cst_38 = arith.constant dense<0.000000e+00> : vector<8x32xf32>
    %118 = tpu.matmul %116, %117, %cst_38 {dimension_numbers = #tpu.dot_dimension_numbers<[1], [0], [0], [1], [0, 0, 1, 1], [], []>} : vector<8x8xbf16>, vector<8x32xbf16>, vector<8x32xf32> -> vector<8x32xf32>
    %119 = arith.addf %89, %118 : vector<8x32xf32>
    %120 = vector.extract_strided_slice %25 {offsets = [0, 24], sizes = [8, 8], strides = [1, 1]} : vector<8x32xf32> to vector<8x8xf32>
    %121 = vector.extract_strided_slice %26 {offsets = [0, 24], sizes = [8, 8], strides = [1, 1]} : vector<8x32xf32> to vector<8x8xf32>
    %122 = arith.truncf %120 : vector<8x8xf32> to vector<8x8xbf16>
    %123 = tpu.transpose %121, [1, 0] : vector<8x8xf32> -> vector<8x8xf32>
    %124 = arith.truncf %123 : vector<8x8xf32> to vector<8x8xbf16>
    %cst_39 = arith.constant dense<0.000000e+00> : vector<8x8xf32>
    %125 = tpu.matmul %122, %124, %cst_39 {dimension_numbers = #tpu.dot_dimension_numbers<[1], [0], [0], [1], [0, 0, 1, 1], [], []>} : vector<8x8xbf16>, vector<8x8xbf16>, vector<8x8xf32> -> vector<8x8xf32>
    %c3 = arith.constant 3 : index
    %c0_40 = arith.constant 0 : index
    %c0_41 = arith.constant 0 : index
    %126 = vector.load %arg3[%c3, %c0_40, %c0_41] : memref<4x8x8xf32, #tpu.memory_space<vmem>>, vector<1x8x8xf32>
    %127 = vector.shape_cast %126 : vector<1x8x8xf32> to vector<8x8xf32>
    %128 = vector.broadcast %7 : vector<1x8xf32> to vector<8x8xf32>
    %129 = arith.addf %127, %128 : vector<8x8xf32>
    %130 = arith.addf %125, %129 : vector<8x8xf32>
    %cst_42 = arith.constant dense<0xFF800000> : vector<8xf32>
    %131 = vector.multi_reduction <maximumf>, %130, %cst_42 [1] : vector<8x8xf32> to vector<8xf32>
    %132 = vector.shape_cast %131 : vector<8xf32> to vector<8x1xf32>
    %133 = vector.broadcast %132 : vector<8x1xf32> to vector<8x8xf32>
    %134 = arith.subf %130, %133 : vector<8x8xf32>
    %135 = math.exp %134 : vector<8x8xf32>
    %cst_43 = arith.constant dense<0.000000e+00> : vector<8xf32>
    %136 = vector.multi_reduction <add>, %135, %cst_43 [1] : vector<8x8xf32> to vector<8xf32>
    %137 = vector.shape_cast %136 : vector<8xf32> to vector<8x1xf32>
    %138 = tpu.reciprocal %137 {approx = true} : vector<8x1xf32> -> vector<8x1xf32>
    %139 = vector.broadcast %138 : vector<8x1xf32> to vector<8x8xf32>
    %140 = arith.mulf %135, %139 : vector<8x8xf32>
    %141 = vector.extract_strided_slice %27 {offsets = [0, 24], sizes = [8, 8], strides = [1, 1]} : vector<8x32xf32> to vector<8x8xf32>
    %142 = arith.truncf %140 : vector<8x8xf32> to vector<8x8xbf16>
    %143 = arith.truncf %141 : vector<8x8xf32> to vector<8x8xbf16>
    %cst_44 = arith.constant dense<0.000000e+00> : vector<8x8xf32>
    %144 = tpu.matmul %142, %143, %cst_44 {dimension_numbers = #tpu.dot_dimension_numbers<[1], [0], [0], [1], [0, 0, 1, 1], [], []>} : vector<8x8xbf16>, vector<8x8xbf16>, vector<8x8xf32> -> vector<8x8xf32>
    %145 = vector.extract_strided_slice %28 {offsets = [24, 0], sizes = [8, 32], strides = [1, 1]} : vector<32x32xf32> to vector<8x32xf32>
    %146 = arith.truncf %144 : vector<8x8xf32> to vector<8x8xbf16>
    %147 = arith.truncf %145 : vector<8x32xf32> to vector<8x32xbf16>
    %cst_45 = arith.constant dense<0.000000e+00> : vector<8x32xf32>
    %148 = tpu.matmul %146, %147, %cst_45 {dimension_numbers = #tpu.dot_dimension_numbers<[1], [0], [0], [1], [0, 0, 1, 1], [], []>} : vector<8x8xbf16>, vector<8x32xbf16>, vector<8x32xf32> -> vector<8x32xf32>
    %149 = arith.addf %119, %148 : vector<8x32xf32>
    %150 = arith.addf %1, %149 : vector<8x32xf32>
    %c0_46 = arith.constant 0 : index
    %c0_47 = arith.constant 0 : index
    %151 = vector.load %arg7[%c0_46, %c0_47] : memref<1x32xf32, #tpu.memory_space<vmem>>, vector<1x32xf32>
    %152 = arith.mulf %150, %150 : vector<8x32xf32>
    %cst_48 = arith.constant dense<0.000000e+00> : vector<8xf32>
    %153 = vector.multi_reduction <add>, %152, %cst_48 [1] : vector<8x32xf32> to vector<8xf32>
    %154 = vector.shape_cast %153 : vector<8xf32> to vector<8x1xf32>
    %cst_49 = arith.constant 3.200000e+01 : f32
    %155 = vector.broadcast %cst_49 : f32 to vector<8x1xf32>
    %156 = arith.divf %154, %155 : vector<8x1xf32>
    %cst_50 = arith.constant 9.99999997E-7 : f32
    %157 = vector.broadcast %cst_50 : f32 to vector<8x1xf32>
    %158 = arith.addf %156, %157 : vector<8x1xf32>
    %159 = math.rsqrt %158 : vector<8x1xf32>
    %160 = vector.broadcast %159 : vector<8x1xf32> to vector<8x32xf32>
    %161 = arith.mulf %150, %160 : vector<8x32xf32>
    %162 = vector.broadcast %151 : vector<1x32xf32> to vector<8x32xf32>
    %163 = arith.mulf %161, %162 : vector<8x32xf32>
    %c0_51 = arith.constant 0 : index
    %c0_52 = arith.constant 0 : index
    %164 = vector.load %arg8[%c0_51, %c0_52] : memref<32x64xf32, #tpu.memory_space<vmem>>, vector<32x64xf32>
    %165 = arith.truncf %163 : vector<8x32xf32> to vector<8x32xbf16>
    %166 = arith.truncf %164 : vector<32x64xf32> to vector<32x64xbf16>
    %cst_53 = arith.constant dense<0.000000e+00> : vector<8x64xf32>
    %167 = tpu.matmul %165, %166, %cst_53 {dimension_numbers = #tpu.dot_dimension_numbers<[1], [0], [0], [1], [0, 0, 1, 1], [], []>} : vector<8x32xbf16>, vector<32x64xbf16>, vector<8x64xf32> -> vector<8x64xf32>
    %cst_54 = arith.constant 0.000000e+00 : f32
    %168 = vector.broadcast %cst_54 : f32 to vector<8x64xf32>
    %169 = arith.maximumf %167, %168 : vector<8x64xf32>
    %c0_55 = arith.constant 0 : index
    %c0_56 = arith.constant 0 : index
    %170 = vector.load %arg9[%c0_55, %c0_56] : memref<64x32xf32, #tpu.memory_space<vmem>>, vector<64x32xf32>
    %171 = arith.truncf %169 : vector<8x64xf32> to vector<8x64xbf16>
    %172 = arith.truncf %170 : vector<64x32xf32> to vector<64x32xbf16>
    %cst_57 = arith.constant dense<0.000000e+00> : vector<8x32xf32>
    %173 = tpu.matmul %171, %172, %cst_57 {dimension_numbers = #tpu.dot_dimension_numbers<[1], [0], [0], [1], [0, 0, 1, 1], [], []>} : vector<8x64xbf16>, vector<64x32xbf16>, vector<8x32xf32> -> vector<8x32xf32>
    %174 = arith.addf %150, %173 : vector<8x32xf32>
    %c0_58 = arith.constant 0 : index
    %c0_59 = arith.constant 0 : index
    %175 = vector.load %arg10[%c0_58, %c0_59] : memref<1x32xf32, #tpu.memory_space<vmem>>, vector<1x32xf32>
    %176 = arith.mulf %174, %174 : vector<8x32xf32>
    %cst_60 = arith.constant dense<0.000000e+00> : vector<8xf32>
    %177 = vector.multi_reduction <add>, %176, %cst_60 [1] : vector<8x32xf32> to vector<8xf32>
    %178 = vector.shape_cast %177 : vector<8xf32> to vector<8x1xf32>
    %cst_61 = arith.constant 3.200000e+01 : f32
    %179 = vector.broadcast %cst_61 : f32 to vector<8x1xf32>
    %180 = arith.divf %178, %179 : vector<8x1xf32>
    %cst_62 = arith.constant 9.99999997E-7 : f32
    %181 = vector.broadcast %cst_62 : f32 to vector<8x1xf32>
    %182 = arith.addf %180, %181 : vector<8x1xf32>
    %183 = math.rsqrt %182 : vector<8x1xf32>
    %184 = vector.broadcast %183 : vector<8x1xf32> to vector<8x32xf32>
    %185 = arith.mulf %174, %184 : vector<8x32xf32>
    %186 = vector.broadcast %175 : vector<1x32xf32> to vector<8x32xf32>
    %187 = arith.mulf %185, %186 : vector<8x32xf32>
    %c0_63 = arith.constant 0 : index
    %c0_64 = arith.constant 0 : index
    %c0_65 = arith.constant 0 : index
    %188 = vector.load %arg11[%c0_63, %c0_64, %c0_65] : memref<1x8x32xf32, #tpu.memory_space<vmem>>, vector<1x8x32xf32>
    %189 = vector.shape_cast %188 : vector<1x8x32xf32> to vector<8x32xf32>
    %190 = vector.shape_cast %187 : vector<8x32xf32> to vector<1x8x32xf32>
    tpu.vector_store %arg11[%c0_63, %c0_64, %c0_65], %190 {strides = array<i32>} : memref<1x8x32xf32, #tpu.memory_space<vmem>>, vector<1x8x32xf32>,
    return
  }
  func.func @transform_0(%arg0: i32) -> (i32, i32, i32) {
    %c0_i32 = arith.constant 0 : i32
    %c0_i32_0 = arith.constant 0 : i32
    %c0_i32_1 = arith.constant 0 : i32
    return %arg0, %c0_i32, %c0_i32_0 : i32, i32, i32
  }
  func.func @transform_1(%arg0: i32) -> (i32, i32, i32) {
    %c0_i32 = arith.constant 0 : i32
    %c0_i32_0 = arith.constant 0 : i32
    %c0_i32_1 = arith.constant 0 : i32
    return %arg0, %c0_i32, %c0_i32_0 : i32, i32, i32
  }
  func.func @transform_2(%arg0: i32) -> (i32, i32, i32) {
    %c0_i32 = arith.constant 0 : i32
    %c0_i32_0 = arith.constant 0 : i32
    %c0_i32_1 = arith.constant 0 : i32
    %c0_i32_2 = arith.constant 0 : i32
    return %c0_i32, %c0_i32_0, %c0_i32_1 : i32, i32, i32
  }
  func.func @transform_3(%arg0: i32) -> (i32, i32) {
    %c0_i32 = arith.constant 0 : i32
    %c0_i32_0 = arith.constant 0 : i32
    %c0_i32_1 = arith.constant 0 : i32
    return %c0_i32, %c0_i32_0 : i32, i32
  }
  func.func @transform_4(%arg0: i32) -> (i32, i32) {
    %c0_i32 = arith.constant 0 : i32
    %c0_i32_0 = arith.constant 0 : i32
    %c0_i32_1 = arith.constant 0 : i32
    return %c0_i32, %c0_i32_0 : i32, i32
  }
  func.func @transform_5(%arg0: i32) -> (i32, i32) {
    %c0_i32 = arith.constant 0 : i32
    %c0_i32_0 = arith.constant 0 : i32
    %c0_i32_1 = arith.constant 0 : i32
    return %c0_i32, %c0_i32_0 : i32, i32
  }
  func.func @transform_6(%arg0: i32) -> (i32, i32) {
    %c0_i32 = arith.constant 0 : i32
    %c0_i32_0 = arith.constant 0 : i32
    %c0_i32_1 = arith.constant 0 : i32
    return %c0_i32, %c0_i32_0 : i32, i32
  }
  func.func @transform_7(%arg0: i32) -> (i32, i32) {
    %c0_i32 = arith.constant 0 : i32
    %c0_i32_0 = arith.constant 0 : i32
    %c0_i32_1 = arith.constant 0 : i32
    return %c0_i32, %c0_i32_0 : i32, i32
  }
  func.func @transform_8(%arg0: i32) -> (i32, i32) {
    %c0_i32 = arith.constant 0 : i32
    %c0_i32_0 = arith.constant 0 : i32
    %c0_i32_1 = arith.constant 0 : i32
    return %c0_i32, %c0_i32_0 : i32, i32
  }
  func.func @transform_9(%arg0: i32) -> (i32, i32) {
    %c0_i32 = arith.constant 0 : i32
    %c0_i32_0 = arith.constant 0 : i32
    %c0_i32_1 = arith.constant 0 : i32
    return %c0_i32, %c0_i32_0 : i32, i32
  }
  func.func @transform_10(%arg0: i32) -> (i32, i32, i32) {
    %c0_i32 = arith.constant 0 : i32
    %c0_i32_0 = arith.constant 0 : i32
    %c0_i32_1 = arith.constant 0 : i32
    return %arg0, %c0_i32, %c0_i32_0 : i32, i32, i32
  }
}

module attributes {stable_mosaic.version = 11 : i64} {
  func.func @_decoder_block_kernel(%arg0: i32, %arg1: memref<1x8x32xf32, #tpu.memory_space<vmem>>, %arg2: memref<1x8x32xf32, #tpu.memory_space<vmem>>, %arg3: memref<1x1x8xf32, #tpu.memory_space<vmem>>, %arg4: memref<4x8x8xf32, #tpu.memory_space<vmem>>, %arg5: memref<1x8x1xi32, #tpu.memory_space<vmem>>, %arg6: memref<1x32xf32, #tpu.memory_space<vmem>>, %arg7: memref<32x96xf32, #tpu.memory_space<vmem>>, %arg8: memref<32x32xf32, #tpu.memory_space<vmem>>, %arg9: memref<1x32xf32, #tpu.memory_space<vmem>>, %arg10: memref<32x32xf32, #tpu.memory_space<vmem>>, %arg11: memref<32x64xf32, #tpu.memory_space<vmem>>, %arg12: memref<32x32xf32, #tpu.memory_space<vmem>>, %arg13: memref<1x32xf32, #tpu.memory_space<vmem>>, %arg14: memref<32x64xf32, #tpu.memory_space<vmem>>, %arg15: memref<64x32xf32, #tpu.memory_space<vmem>>, %arg16: memref<1x32xf32, #tpu.memory_space<vmem>>, %arg17: memref<64x32xf32, #tpu.memory_space<vmem>>, %arg18: memref<1x8x64xf32, #tpu.memory_space<vmem>>, %arg19: memref<1x8x1xf32, #tpu.memory_space<vmem>>) attributes {dimension_semantics = [#tpu.dimension_semantics<parallel>], iteration_bounds = array<i64: 2>, scalar_prefetch = 0 : i64, scratch_operands = 0 : i64, tpu.core_type = #tpu.core_type<tc>, window_params = [{transform_indices = @transform_0, window_bounds = array<i64: 1, 8, 32>}, {transform_indices = @transform_1, window_bounds = array<i64: 1, 8, 32>}, {transform_indices = @transform_2, window_bounds = array<i64: 1, 1, 8>}, {pipeline_mode = #tpu.pipeline_mode<synchronous>, transform_indices = @transform_3, window_bounds = array<i64: 4, 8, 8>}, {transform_indices = @transform_4, window_bounds = array<i64: 1, 8, 1>}, {pipeline_mode = #tpu.pipeline_mode<synchronous>, transform_indices = @transform_5, window_bounds = array<i64: 1, 32>}, {pipeline_mode = #tpu.pipeline_mode<synchronous>, transform_indices = @transform_6, window_bounds = array<i64: 32, 96>}, {pipeline_mode = #tpu.pipeline_mode<synchronous>, transform_indices = @transform_7, window_bounds = array<i64: 32, 32>}, {pipeline_mode = #tpu.pipeline_mode<synchronous>, transform_indices = @transform_8, window_bounds = array<i64: 1, 32>}, {pipeline_mode = #tpu.pipeline_mode<synchronous>, transform_indices = @transform_9, window_bounds = array<i64: 32, 32>}, {pipeline_mode = #tpu.pipeline_mode<synchronous>, transform_indices = @transform_10, window_bounds = array<i64: 32, 64>}, {pipeline_mode = #tpu.pipeline_mode<synchronous>, transform_indices = @transform_11, window_bounds = array<i64: 32, 32>}, {pipeline_mode = #tpu.pipeline_mode<synchronous>, transform_indices = @transform_12, window_bounds = array<i64: 1, 32>}, {pipeline_mode = #tpu.pipeline_mode<synchronous>, transform_indices = @transform_13, window_bounds = array<i64: 32, 64>}, {pipeline_mode = #tpu.pipeline_mode<synchronous>, transform_indices = @transform_14, window_bounds = array<i64: 64, 32>}, {pipeline_mode = #tpu.pipeline_mode<synchronous>, transform_indices = @transform_15, window_bounds = array<i64: 1, 32>}, {pipeline_mode = #tpu.pipeline_mode<synchronous>, transform_indices = @transform_16, window_bounds = array<i64: 64, 32>}, {transform_indices = @transform_17, window_bounds = array<i64: 1, 8, 64>}, {transform_indices = @transform_18, window_bounds = array<i64: 1, 8, 1>}]} {
    %c0 = arith.constant 0 : index
    %c0_0 = arith.constant 0 : index
    %c0_1 = arith.constant 0 : index
    %0 = vector.load %arg1[%c0, %c0_0, %c0_1] : memref<1x8x32xf32, #tpu.memory_space<vmem>>, vector<1x8x32xf32>
    %1 = vector.shape_cast %0 : vector<1x8x32xf32> to vector<8x32xf32>
    %c0_2 = arith.constant 0 : index
    %c0_3 = arith.constant 0 : index
    %c0_4 = arith.constant 0 : index
    %2 = vector.load %arg2[%c0_2, %c0_3, %c0_4] : memref<1x8x32xf32, #tpu.memory_space<vmem>>, vector<1x8x32xf32>
    %3 = vector.shape_cast %2 : vector<1x8x32xf32> to vector<8x32xf32>
    %c0_5 = arith.constant 0 : index
    %c0_6 = arith.constant 0 : index
    %c0_7 = arith.constant 0 : index
    %4 = vector.load %arg3[%c0_5, %c0_6, %c0_7] : memref<1x1x8xf32, #tpu.memory_space<vmem>>, vector<1x1x8xf32>
    %5 = vector.shape_cast %4 : vector<1x1x8xf32> to vector<1x8xf32>
    %cst = arith.constant 1.000000e+00 : f32
    %6 = vector.broadcast %cst : f32 to vector<1x8xf32>
    %7 = arith.subf %6, %5 : vector<1x8xf32>
    %cst_8 = arith.constant -1.000000e+09 : f32
    %8 = vector.broadcast %cst_8 : f32 to vector<1x8xf32>
    %9 = arith.mulf %7, %8 : vector<1x8xf32>
    %c0_9 = arith.constant 0 : index
    %c0_10 = arith.constant 0 : index
    %c0_11 = arith.constant 0 : index
    %10 = vector.load %arg5[%c0_9, %c0_10, %c0_11] : memref<1x8x1xi32, #tpu.memory_space<vmem>>, vector<1x8x1xi32>
    %11 = vector.shape_cast %10 : vector<1x8x1xi32> to vector<8x1xi32>
    %c0_12 = arith.constant 0 : index
    %c0_13 = arith.constant 0 : index
    %12 = vector.load %arg6[%c0_12, %c0_13] : memref<1x32xf32, #tpu.memory_space<vmem>>, vector<1x32xf32>
    %13 = arith.mulf %1, %1 : vector<8x32xf32>
    %cst_14 = arith.constant dense<0.000000e+00> : vector<8xf32>
    %14 = vector.multi_reduction <add>, %13, %cst_14 [1] : vector<8x32xf32> to vector<8xf32>
    %15 = vector.shape_cast %14 : vector<8xf32> to vector<8x1xf32>
    %cst_15 = arith.constant 3.200000e+01 : f32
    %16 = vector.broadcast %cst_15 : f32 to vector<8x1xf32>
    %17 = arith.divf %15, %16 : vector<8x1xf32>
    %cst_16 = arith.constant 9.99999997E-7 : f32
    %18 = vector.broadcast %cst_16 : f32 to vector<8x1xf32>
    %19 = arith.addf %17, %18 : vector<8x1xf32>
    %20 = math.rsqrt %19 : vector<8x1xf32>
    %21 = vector.broadcast %20 : vector<8x1xf32> to vector<8x32xf32>
    %22 = arith.mulf %1, %21 : vector<8x32xf32>
    %23 = vector.broadcast %12 : vector<1x32xf32> to vector<8x32xf32>
    %24 = arith.mulf %22, %23 : vector<8x32xf32>
    %c0_17 = arith.constant 0 : index
    %c0_18 = arith.constant 0 : index
    %25 = vector.load %arg7[%c0_17, %c0_18] : memref<32x96xf32, #tpu.memory_space<vmem>>, vector<32x96xf32>
    %26 = arith.truncf %24 : vector<8x32xf32> to vector<8x32xbf16>
    %27 = arith.truncf %25 : vector<32x96xf32> to vector<32x96xbf16>
    %cst_19 = arith.constant dense<0.000000e+00> : vector<8x96xf32>
    %28 = tpu.matmul %26, %27, %cst_19 {dimension_numbers = #tpu.dot_dimension_numbers<[1], [0], [0], [1], [0, 0, 1, 1], [], []>} : vector<8x32xbf16>, vector<32x96xbf16>, vector<8x96xf32> -> vector<8x96xf32>
    %29 = vector.extract_strided_slice %28 {offsets = [0, 0], sizes = [8, 32], strides = [1, 1]} : vector<8x96xf32> to vector<8x32xf32>
    %30 = vector.extract_strided_slice %28 {offsets = [0, 32], sizes = [8, 32], strides = [1, 1]} : vector<8x96xf32> to vector<8x32xf32>
    %31 = vector.extract_strided_slice %28 {offsets = [0, 64], sizes = [8, 32], strides = [1, 1]} : vector<8x96xf32> to vector<8x32xf32>
    %c0_20 = arith.constant 0 : index
    %c0_21 = arith.constant 0 : index
    %32 = vector.load %arg8[%c0_20, %c0_21] : memref<32x32xf32, #tpu.memory_space<vmem>>, vector<32x32xf32>
    %cst_22 = arith.constant 0.000000e+00 : f32
    %33 = vector.broadcast %cst_22 : f32 to vector<8x32xf32>
    %34 = vector.extract_strided_slice %29 {offsets = [0, 0], sizes = [8, 8], strides = [1, 1]} : vector<8x32xf32> to vector<8x8xf32>
    %35 = vector.extract_strided_slice %30 {offsets = [0, 0], sizes = [8, 8], strides = [1, 1]} : vector<8x32xf32> to vector<8x8xf32>
    %36 = arith.truncf %34 : vector<8x8xf32> to vector<8x8xbf16>
    %37 = tpu.transpose %35, [1, 0] : vector<8x8xf32> -> vector<8x8xf32>
    %38 = arith.truncf %37 : vector<8x8xf32> to vector<8x8xbf16>
    %cst_23 = arith.constant dense<0.000000e+00> : vector<8x8xf32>
    %39 = tpu.matmul %36, %38, %cst_23 {dimension_numbers = #tpu.dot_dimension_numbers<[1], [0], [0], [1], [0, 0, 1, 1], [], []>} : vector<8x8xbf16>, vector<8x8xbf16>, vector<8x8xf32> -> vector<8x8xf32>
    %c0_24 = arith.constant 0 : index
    %c0_25 = arith.constant 0 : index
    %c0_26 = arith.constant 0 : index
    %40 = vector.load %arg4[%c0_24, %c0_25, %c0_26] : memref<4x8x8xf32, #tpu.memory_space<vmem>>, vector<1x8x8xf32>
    %41 = vector.shape_cast %40 : vector<1x8x8xf32> to vector<8x8xf32>
    %42 = arith.addf %39, %41 : vector<8x8xf32>
    %cst_27 = arith.constant dense<0xFF800000> : vector<8xf32>
    %43 = vector.multi_reduction <maximumf>, %42, %cst_27 [1] : vector<8x8xf32> to vector<8xf32>
    %44 = vector.shape_cast %43 : vector<8xf32> to vector<8x1xf32>
    %45 = vector.broadcast %44 : vector<8x1xf32> to vector<8x8xf32>
    %46 = arith.subf %42, %45 : vector<8x8xf32>
    %47 = math.exp %46 : vector<8x8xf32>
    %cst_28 = arith.constant dense<0.000000e+00> : vector<8xf32>
    %48 = vector.multi_reduction <add>, %47, %cst_28 [1] : vector<8x8xf32> to vector<8xf32>
    %49 = vector.shape_cast %48 : vector<8xf32> to vector<8x1xf32>
    %50 = tpu.reciprocal %49 {approx = true} : vector<8x1xf32> -> vector<8x1xf32>
    %51 = vector.broadcast %50 : vector<8x1xf32> to vector<8x8xf32>
    %52 = arith.mulf %47, %51 : vector<8x8xf32>
    %53 = vector.extract_strided_slice %31 {offsets = [0, 0], sizes = [8, 8], strides = [1, 1]} : vector<8x32xf32> to vector<8x8xf32>
    %54 = arith.truncf %52 : vector<8x8xf32> to vector<8x8xbf16>
    %55 = arith.truncf %53 : vector<8x8xf32> to vector<8x8xbf16>
    %cst_29 = arith.constant dense<0.000000e+00> : vector<8x8xf32>
    %56 = tpu.matmul %54, %55, %cst_29 {dimension_numbers = #tpu.dot_dimension_numbers<[1], [0], [0], [1], [0, 0, 1, 1], [], []>} : vector<8x8xbf16>, vector<8x8xbf16>, vector<8x8xf32> -> vector<8x8xf32>
    %57 = vector.extract_strided_slice %32 {offsets = [0, 0], sizes = [8, 32], strides = [1, 1]} : vector<32x32xf32> to vector<8x32xf32>
    %58 = arith.truncf %56 : vector<8x8xf32> to vector<8x8xbf16>
    %59 = arith.truncf %57 : vector<8x32xf32> to vector<8x32xbf16>
    %cst_30 = arith.constant dense<0.000000e+00> : vector<8x32xf32>
    %60 = tpu.matmul %58, %59, %cst_30 {dimension_numbers = #tpu.dot_dimension_numbers<[1], [0], [0], [1], [0, 0, 1, 1], [], []>} : vector<8x8xbf16>, vector<8x32xbf16>, vector<8x32xf32> -> vector<8x32xf32>
    %61 = arith.addf %33, %60 : vector<8x32xf32>
    %62 = vector.extract_strided_slice %29 {offsets = [0, 8], sizes = [8, 8], strides = [1, 1]} : vector<8x32xf32> to vector<8x8xf32>
    %63 = vector.extract_strided_slice %30 {offsets = [0, 8], sizes = [8, 8], strides = [1, 1]} : vector<8x32xf32> to vector<8x8xf32>
    %64 = arith.truncf %62 : vector<8x8xf32> to vector<8x8xbf16>
    %65 = tpu.transpose %63, [1, 0] : vector<8x8xf32> -> vector<8x8xf32>
    %66 = arith.truncf %65 : vector<8x8xf32> to vector<8x8xbf16>
    %cst_31 = arith.constant dense<0.000000e+00> : vector<8x8xf32>
    %67 = tpu.matmul %64, %66, %cst_31 {dimension_numbers = #tpu.dot_dimension_numbers<[1], [0], [0], [1], [0, 0, 1, 1], [], []>} : vector<8x8xbf16>, vector<8x8xbf16>, vector<8x8xf32> -> vector<8x8xf32>
    %c1 = arith.constant 1 : index
    %c0_32 = arith.constant 0 : index
    %c0_33 = arith.constant 0 : index
    %68 = vector.load %arg4[%c1, %c0_32, %c0_33] : memref<4x8x8xf32, #tpu.memory_space<vmem>>, vector<1x8x8xf32>
    %69 = vector.shape_cast %68 : vector<1x8x8xf32> to vector<8x8xf32>
    %70 = arith.addf %67, %69 : vector<8x8xf32>
    %cst_34 = arith.constant dense<0xFF800000> : vector<8xf32>
    %71 = vector.multi_reduction <maximumf>, %70, %cst_34 [1] : vector<8x8xf32> to vector<8xf32>
    %72 = vector.shape_cast %71 : vector<8xf32> to vector<8x1xf32>
    %73 = vector.broadcast %72 : vector<8x1xf32> to vector<8x8xf32>
    %74 = arith.subf %70, %73 : vector<8x8xf32>
    %75 = math.exp %74 : vector<8x8xf32>
    %cst_35 = arith.constant dense<0.000000e+00> : vector<8xf32>
    %76 = vector.multi_reduction <add>, %75, %cst_35 [1] : vector<8x8xf32> to vector<8xf32>
    %77 = vector.shape_cast %76 : vector<8xf32> to vector<8x1xf32>
    %78 = tpu.reciprocal %77 {approx = true} : vector<8x1xf32> -> vector<8x1xf32>
    %79 = vector.broadcast %78 : vector<8x1xf32> to vector<8x8xf32>
    %80 = arith.mulf %75, %79 : vector<8x8xf32>
    %81 = vector.extract_strided_slice %31 {offsets = [0, 8], sizes = [8, 8], strides = [1, 1]} : vector<8x32xf32> to vector<8x8xf32>
    %82 = arith.truncf %80 : vector<8x8xf32> to vector<8x8xbf16>
    %83 = arith.truncf %81 : vector<8x8xf32> to vector<8x8xbf16>
    %cst_36 = arith.constant dense<0.000000e+00> : vector<8x8xf32>
    %84 = tpu.matmul %82, %83, %cst_36 {dimension_numbers = #tpu.dot_dimension_numbers<[1], [0], [0], [1], [0, 0, 1, 1], [], []>} : vector<8x8xbf16>, vector<8x8xbf16>, vector<8x8xf32> -> vector<8x8xf32>
    %85 = vector.extract_strided_slice %32 {offsets = [8, 0], sizes = [8, 32], strides = [1, 1]} : vector<32x32xf32> to vector<8x32xf32>
    %86 = arith.truncf %84 : vector<8x8xf32> to vector<8x8xbf16>
    %87 = arith.truncf %85 : vector<8x32xf32> to vector<8x32xbf16>
    %cst_37 = arith.constant dense<0.000000e+00> : vector<8x32xf32>
    %88 = tpu.matmul %86, %87, %cst_37 {dimension_numbers = #tpu.dot_dimension_numbers<[1], [0], [0], [1], [0, 0, 1, 1], [], []>} : vector<8x8xbf16>, vector<8x32xbf16>, vector<8x32xf32> -> vector<8x32xf32>
    %89 = arith.addf %61, %88 : vector<8x32xf32>
    %90 = vector.extract_strided_slice %29 {offsets = [0, 16], sizes = [8, 8], strides = [1, 1]} : vector<8x32xf32> to vector<8x8xf32>
    %91 = vector.extract_strided_slice %30 {offsets = [0, 16], sizes = [8, 8], strides = [1, 1]} : vector<8x32xf32> to vector<8x8xf32>
    %92 = arith.truncf %90 : vector<8x8xf32> to vector<8x8xbf16>
    %93 = tpu.transpose %91, [1, 0] : vector<8x8xf32> -> vector<8x8xf32>
    %94 = arith.truncf %93 : vector<8x8xf32> to vector<8x8xbf16>
    %cst_38 = arith.constant dense<0.000000e+00> : vector<8x8xf32>
    %95 = tpu.matmul %92, %94, %cst_38 {dimension_numbers = #tpu.dot_dimension_numbers<[1], [0], [0], [1], [0, 0, 1, 1], [], []>} : vector<8x8xbf16>, vector<8x8xbf16>, vector<8x8xf32> -> vector<8x8xf32>
    %c2 = arith.constant 2 : index
    %c0_39 = arith.constant 0 : index
    %c0_40 = arith.constant 0 : index
    %96 = vector.load %arg4[%c2, %c0_39, %c0_40] : memref<4x8x8xf32, #tpu.memory_space<vmem>>, vector<1x8x8xf32>
    %97 = vector.shape_cast %96 : vector<1x8x8xf32> to vector<8x8xf32>
    %98 = arith.addf %95, %97 : vector<8x8xf32>
    %cst_41 = arith.constant dense<0xFF800000> : vector<8xf32>
    %99 = vector.multi_reduction <maximumf>, %98, %cst_41 [1] : vector<8x8xf32> to vector<8xf32>
    %100 = vector.shape_cast %99 : vector<8xf32> to vector<8x1xf32>
    %101 = vector.broadcast %100 : vector<8x1xf32> to vector<8x8xf32>
    %102 = arith.subf %98, %101 : vector<8x8xf32>
    %103 = math.exp %102 : vector<8x8xf32>
    %cst_42 = arith.constant dense<0.000000e+00> : vector<8xf32>
    %104 = vector.multi_reduction <add>, %103, %cst_42 [1] : vector<8x8xf32> to vector<8xf32>
    %105 = vector.shape_cast %104 : vector<8xf32> to vector<8x1xf32>
    %106 = tpu.reciprocal %105 {approx = true} : vector<8x1xf32> -> vector<8x1xf32>
    %107 = vector.broadcast %106 : vector<8x1xf32> to vector<8x8xf32>
    %108 = arith.mulf %103, %107 : vector<8x8xf32>
    %109 = vector.extract_strided_slice %31 {offsets = [0, 16], sizes = [8, 8], strides = [1, 1]} : vector<8x32xf32> to vector<8x8xf32>
    %110 = arith.truncf %108 : vector<8x8xf32> to vector<8x8xbf16>
    %111 = arith.truncf %109 : vector<8x8xf32> to vector<8x8xbf16>
    %cst_43 = arith.constant dense<0.000000e+00> : vector<8x8xf32>
    %112 = tpu.matmul %110, %111, %cst_43 {dimension_numbers = #tpu.dot_dimension_numbers<[1], [0], [0], [1], [0, 0, 1, 1], [], []>} : vector<8x8xbf16>, vector<8x8xbf16>, vector<8x8xf32> -> vector<8x8xf32>
    %113 = vector.extract_strided_slice %32 {offsets = [16, 0], sizes = [8, 32], strides = [1, 1]} : vector<32x32xf32> to vector<8x32xf32>
    %114 = arith.truncf %112 : vector<8x8xf32> to vector<8x8xbf16>
    %115 = arith.truncf %113 : vector<8x32xf32> to vector<8x32xbf16>
    %cst_44 = arith.constant dense<0.000000e+00> : vector<8x32xf32>
    %116 = tpu.matmul %114, %115, %cst_44 {dimension_numbers = #tpu.dot_dimension_numbers<[1], [0], [0], [1], [0, 0, 1, 1], [], []>} : vector<8x8xbf16>, vector<8x32xbf16>, vector<8x32xf32> -> vector<8x32xf32>
    %117 = arith.addf %89, %116 : vector<8x32xf32>
    %118 = vector.extract_strided_slice %29 {offsets = [0, 24], sizes = [8, 8], strides = [1, 1]} : vector<8x32xf32> to vector<8x8xf32>
    %119 = vector.extract_strided_slice %30 {offsets = [0, 24], sizes = [8, 8], strides = [1, 1]} : vector<8x32xf32> to vector<8x8xf32>
    %120 = arith.truncf %118 : vector<8x8xf32> to vector<8x8xbf16>
    %121 = tpu.transpose %119, [1, 0] : vector<8x8xf32> -> vector<8x8xf32>
    %122 = arith.truncf %121 : vector<8x8xf32> to vector<8x8xbf16>
    %cst_45 = arith.constant dense<0.000000e+00> : vector<8x8xf32>
    %123 = tpu.matmul %120, %122, %cst_45 {dimension_numbers = #tpu.dot_dimension_numbers<[1], [0], [0], [1], [0, 0, 1, 1], [], []>} : vector<8x8xbf16>, vector<8x8xbf16>, vector<8x8xf32> -> vector<8x8xf32>
    %c3 = arith.constant 3 : index
    %c0_46 = arith.constant 0 : index
    %c0_47 = arith.constant 0 : index
    %124 = vector.load %arg4[%c3, %c0_46, %c0_47] : memref<4x8x8xf32, #tpu.memory_space<vmem>>, vector<1x8x8xf32>
    %125 = vector.shape_cast %124 : vector<1x8x8xf32> to vector<8x8xf32>
    %126 = arith.addf %123, %125 : vector<8x8xf32>
    %cst_48 = arith.constant dense<0xFF800000> : vector<8xf32>
    %127 = vector.multi_reduction <maximumf>, %126, %cst_48 [1] : vector<8x8xf32> to vector<8xf32>
    %128 = vector.shape_cast %127 : vector<8xf32> to vector<8x1xf32>
    %129 = vector.broadcast %128 : vector<8x1xf32> to vector<8x8xf32>
    %130 = arith.subf %126, %129 : vector<8x8xf32>
    %131 = math.exp %130 : vector<8x8xf32>
    %cst_49 = arith.constant dense<0.000000e+00> : vector<8xf32>
    %132 = vector.multi_reduction <add>, %131, %cst_49 [1] : vector<8x8xf32> to vector<8xf32>
    %133 = vector.shape_cast %132 : vector<8xf32> to vector<8x1xf32>
    %134 = tpu.reciprocal %133 {approx = true} : vector<8x1xf32> -> vector<8x1xf32>
    %135 = vector.broadcast %134 : vector<8x1xf32> to vector<8x8xf32>
    %136 = arith.mulf %131, %135 : vector<8x8xf32>
    %137 = vector.extract_strided_slice %31 {offsets = [0, 24], sizes = [8, 8], strides = [1, 1]} : vector<8x32xf32> to vector<8x8xf32>
    %138 = arith.truncf %136 : vector<8x8xf32> to vector<8x8xbf16>
    %139 = arith.truncf %137 : vector<8x8xf32> to vector<8x8xbf16>
    %cst_50 = arith.constant dense<0.000000e+00> : vector<8x8xf32>
    %140 = tpu.matmul %138, %139, %cst_50 {dimension_numbers = #tpu.dot_dimension_numbers<[1], [0], [0], [1], [0, 0, 1, 1], [], []>} : vector<8x8xbf16>, vector<8x8xbf16>, vector<8x8xf32> -> vector<8x8xf32>
    %141 = vector.extract_strided_slice %32 {offsets = [24, 0], sizes = [8, 32], strides = [1, 1]} : vector<32x32xf32> to vector<8x32xf32>
    %142 = arith.truncf %140 : vector<8x8xf32> to vector<8x8xbf16>
    %143 = arith.truncf %141 : vector<8x32xf32> to vector<8x32xbf16>
    %cst_51 = arith.constant dense<0.000000e+00> : vector<8x32xf32>
    %144 = tpu.matmul %142, %143, %cst_51 {dimension_numbers = #tpu.dot_dimension_numbers<[1], [0], [0], [1], [0, 0, 1, 1], [], []>} : vector<8x8xbf16>, vector<8x32xbf16>, vector<8x32xf32> -> vector<8x32xf32>
    %145 = arith.addf %117, %144 : vector<8x32xf32>
    %146 = arith.addf %1, %145 : vector<8x32xf32>
    %c0_52 = arith.constant 0 : index
    %c0_53 = arith.constant 0 : index
    %147 = vector.load %arg9[%c0_52, %c0_53] : memref<1x32xf32, #tpu.memory_space<vmem>>, vector<1x32xf32>
    %148 = arith.mulf %146, %146 : vector<8x32xf32>
    %cst_54 = arith.constant dense<0.000000e+00> : vector<8xf32>
    %149 = vector.multi_reduction <add>, %148, %cst_54 [1] : vector<8x32xf32> to vector<8xf32>
    %150 = vector.shape_cast %149 : vector<8xf32> to vector<8x1xf32>
    %cst_55 = arith.constant 3.200000e+01 : f32
    %151 = vector.broadcast %cst_55 : f32 to vector<8x1xf32>
    %152 = arith.divf %150, %151 : vector<8x1xf32>
    %cst_56 = arith.constant 9.99999997E-7 : f32
    %153 = vector.broadcast %cst_56 : f32 to vector<8x1xf32>
    %154 = arith.addf %152, %153 : vector<8x1xf32>
    %155 = math.rsqrt %154 : vector<8x1xf32>
    %156 = vector.broadcast %155 : vector<8x1xf32> to vector<8x32xf32>
    %157 = arith.mulf %146, %156 : vector<8x32xf32>
    %158 = vector.broadcast %147 : vector<1x32xf32> to vector<8x32xf32>
    %159 = arith.mulf %157, %158 : vector<8x32xf32>
    %c0_57 = arith.constant 0 : index
    %c0_58 = arith.constant 0 : index
    %160 = vector.load %arg10[%c0_57, %c0_58] : memref<32x32xf32, #tpu.memory_space<vmem>>, vector<32x32xf32>
    %161 = arith.truncf %159 : vector<8x32xf32> to vector<8x32xbf16>
    %162 = arith.truncf %160 : vector<32x32xf32> to vector<32x32xbf16>
    %cst_59 = arith.constant dense<0.000000e+00> : vector<8x32xf32>
    %163 = tpu.matmul %161, %162, %cst_59 {dimension_numbers = #tpu.dot_dimension_numbers<[1], [0], [0], [1], [0, 0, 1, 1], [], []>} : vector<8x32xbf16>, vector<32x32xbf16>, vector<8x32xf32> -> vector<8x32xf32>
    %c0_60 = arith.constant 0 : index
    %c0_61 = arith.constant 0 : index
    %164 = vector.load %arg11[%c0_60, %c0_61] : memref<32x64xf32, #tpu.memory_space<vmem>>, vector<32x64xf32>
    %165 = arith.truncf %3 : vector<8x32xf32> to vector<8x32xbf16>
    %166 = arith.truncf %164 : vector<32x64xf32> to vector<32x64xbf16>
    %cst_62 = arith.constant dense<0.000000e+00> : vector<8x64xf32>
    %167 = tpu.matmul %165, %166, %cst_62 {dimension_numbers = #tpu.dot_dimension_numbers<[1], [0], [0], [1], [0, 0, 1, 1], [], []>} : vector<8x32xbf16>, vector<32x64xbf16>, vector<8x64xf32> -> vector<8x64xf32>
    %168 = vector.extract_strided_slice %167 {offsets = [0, 0], sizes = [8, 32], strides = [1, 1]} : vector<8x64xf32> to vector<8x32xf32>
    %169 = vector.extract_strided_slice %167 {offsets = [0, 32], sizes = [8, 32], strides = [1, 1]} : vector<8x64xf32> to vector<8x32xf32>
    %c0_63 = arith.constant 0 : index
    %c0_64 = arith.constant 0 : index
    %170 = vector.load %arg12[%c0_63, %c0_64] : memref<32x32xf32, #tpu.memory_space<vmem>>, vector<32x32xf32>
    %cst_65 = arith.constant 0.000000e+00 : f32
    %171 = vector.broadcast %cst_65 : f32 to vector<8x32xf32>
    %172 = vector.extract_strided_slice %163 {offsets = [0, 0], sizes = [8, 8], strides = [1, 1]} : vector<8x32xf32> to vector<8x8xf32>
    %173 = vector.extract_strided_slice %168 {offsets = [0, 0], sizes = [8, 8], strides = [1, 1]} : vector<8x32xf32> to vector<8x8xf32>
    %174 = arith.truncf %172 : vector<8x8xf32> to vector<8x8xbf16>
    %175 = tpu.transpose %173, [1, 0] : vector<8x8xf32> -> vector<8x8xf32>
    %176 = arith.truncf %175 : vector<8x8xf32> to vector<8x8xbf16>
    %cst_66 = arith.constant dense<0.000000e+00> : vector<8x8xf32>
    %177 = tpu.matmul %174, %176, %cst_66 {dimension_numbers = #tpu.dot_dimension_numbers<[1], [0], [0], [1], [0, 0, 1, 1], [], []>} : vector<8x8xbf16>, vector<8x8xbf16>, vector<8x8xf32> -> vector<8x8xf32>
    %178 = vector.broadcast %9 : vector<1x8xf32> to vector<8x8xf32>
    %179 = arith.addf %177, %178 : vector<8x8xf32>
    %cst_67 = arith.constant dense<0xFF800000> : vector<8xf32>
    %180 = vector.multi_reduction <maximumf>, %179, %cst_67 [1] : vector<8x8xf32> to vector<8xf32>
    %181 = vector.shape_cast %180 : vector<8xf32> to vector<8x1xf32>
    %182 = vector.broadcast %181 : vector<8x1xf32> to vector<8x8xf32>
    %183 = arith.subf %179, %182 : vector<8x8xf32>
    %184 = math.exp %183 : vector<8x8xf32>
    %cst_68 = arith.constant dense<0.000000e+00> : vector<8xf32>
    %185 = vector.multi_reduction <add>, %184, %cst_68 [1] : vector<8x8xf32> to vector<8xf32>
    %186 = vector.shape_cast %185 : vector<8xf32> to vector<8x1xf32>
    %187 = tpu.reciprocal %186 {approx = true} : vector<8x1xf32> -> vector<8x1xf32>
    %188 = vector.broadcast %187 : vector<8x1xf32> to vector<8x8xf32>
    %189 = arith.mulf %184, %188 : vector<8x8xf32>
    %190 = vector.extract_strided_slice %169 {offsets = [0, 0], sizes = [8, 8], strides = [1, 1]} : vector<8x32xf32> to vector<8x8xf32>
    %191 = arith.truncf %189 : vector<8x8xf32> to vector<8x8xbf16>
    %192 = arith.truncf %190 : vector<8x8xf32> to vector<8x8xbf16>
    %cst_69 = arith.constant dense<0.000000e+00> : vector<8x8xf32>
    %193 = tpu.matmul %191, %192, %cst_69 {dimension_numbers = #tpu.dot_dimension_numbers<[1], [0], [0], [1], [0, 0, 1, 1], [], []>} : vector<8x8xbf16>, vector<8x8xbf16>, vector<8x8xf32> -> vector<8x8xf32>
    %194 = vector.extract_strided_slice %170 {offsets = [0, 0], sizes = [8, 32], strides = [1, 1]} : vector<32x32xf32> to vector<8x32xf32>
    %195 = arith.truncf %193 : vector<8x8xf32> to vector<8x8xbf16>
    %196 = arith.truncf %194 : vector<8x32xf32> to vector<8x32xbf16>
    %cst_70 = arith.constant dense<0.000000e+00> : vector<8x32xf32>
    %197 = tpu.matmul %195, %196, %cst_70 {dimension_numbers = #tpu.dot_dimension_numbers<[1], [0], [0], [1], [0, 0, 1, 1], [], []>} : vector<8x8xbf16>, vector<8x32xbf16>, vector<8x32xf32> -> vector<8x32xf32>
    %198 = arith.addf %171, %197 : vector<8x32xf32>
    %199 = vector.extract_strided_slice %163 {offsets = [0, 8], sizes = [8, 8], strides = [1, 1]} : vector<8x32xf32> to vector<8x8xf32>
    %200 = vector.extract_strided_slice %168 {offsets = [0, 8], sizes = [8, 8], strides = [1, 1]} : vector<8x32xf32> to vector<8x8xf32>
    %201 = arith.truncf %199 : vector<8x8xf32> to vector<8x8xbf16>
    %202 = tpu.transpose %200, [1, 0] : vector<8x8xf32> -> vector<8x8xf32>
    %203 = arith.truncf %202 : vector<8x8xf32> to vector<8x8xbf16>
    %cst_71 = arith.constant dense<0.000000e+00> : vector<8x8xf32>
    %204 = tpu.matmul %201, %203, %cst_71 {dimension_numbers = #tpu.dot_dimension_numbers<[1], [0], [0], [1], [0, 0, 1, 1], [], []>} : vector<8x8xbf16>, vector<8x8xbf16>, vector<8x8xf32> -> vector<8x8xf32>
    %205 = vector.broadcast %9 : vector<1x8xf32> to vector<8x8xf32>
    %206 = arith.addf %204, %205 : vector<8x8xf32>
    %cst_72 = arith.constant dense<0xFF800000> : vector<8xf32>
    %207 = vector.multi_reduction <maximumf>, %206, %cst_72 [1] : vector<8x8xf32> to vector<8xf32>
    %208 = vector.shape_cast %207 : vector<8xf32> to vector<8x1xf32>
    %209 = vector.broadcast %208 : vector<8x1xf32> to vector<8x8xf32>
    %210 = arith.subf %206, %209 : vector<8x8xf32>
    %211 = math.exp %210 : vector<8x8xf32>
    %cst_73 = arith.constant dense<0.000000e+00> : vector<8xf32>
    %212 = vector.multi_reduction <add>, %211, %cst_73 [1] : vector<8x8xf32> to vector<8xf32>
    %213 = vector.shape_cast %212 : vector<8xf32> to vector<8x1xf32>
    %214 = tpu.reciprocal %213 {approx = true} : vector<8x1xf32> -> vector<8x1xf32>
    %215 = vector.broadcast %214 : vector<8x1xf32> to vector<8x8xf32>
    %216 = arith.mulf %211, %215 : vector<8x8xf32>
    %217 = vector.extract_strided_slice %169 {offsets = [0, 8], sizes = [8, 8], strides = [1, 1]} : vector<8x32xf32> to vector<8x8xf32>
    %218 = arith.truncf %216 : vector<8x8xf32> to vector<8x8xbf16>
    %219 = arith.truncf %217 : vector<8x8xf32> to vector<8x8xbf16>
    %cst_74 = arith.constant dense<0.000000e+00> : vector<8x8xf32>
    %220 = tpu.matmul %218, %219, %cst_74 {dimension_numbers = #tpu.dot_dimension_numbers<[1], [0], [0], [1], [0, 0, 1, 1], [], []>} : vector<8x8xbf16>, vector<8x8xbf16>, vector<8x8xf32> -> vector<8x8xf32>
    %221 = vector.extract_strided_slice %170 {offsets = [8, 0], sizes = [8, 32], strides = [1, 1]} : vector<32x32xf32> to vector<8x32xf32>
    %222 = arith.truncf %220 : vector<8x8xf32> to vector<8x8xbf16>
    %223 = arith.truncf %221 : vector<8x32xf32> to vector<8x32xbf16>
    %cst_75 = arith.constant dense<0.000000e+00> : vector<8x32xf32>
    %224 = tpu.matmul %222, %223, %cst_75 {dimension_numbers = #tpu.dot_dimension_numbers<[1], [0], [0], [1], [0, 0, 1, 1], [], []>} : vector<8x8xbf16>, vector<8x32xbf16>, vector<8x32xf32> -> vector<8x32xf32>
    %225 = arith.addf %198, %224 : vector<8x32xf32>
    %226 = vector.extract_strided_slice %163 {offsets = [0, 16], sizes = [8, 8], strides = [1, 1]} : vector<8x32xf32> to vector<8x8xf32>
    %227 = vector.extract_strided_slice %168 {offsets = [0, 16], sizes = [8, 8], strides = [1, 1]} : vector<8x32xf32> to vector<8x8xf32>
    %228 = arith.truncf %226 : vector<8x8xf32> to vector<8x8xbf16>
    %229 = tpu.transpose %227, [1, 0] : vector<8x8xf32> -> vector<8x8xf32>
    %230 = arith.truncf %229 : vector<8x8xf32> to vector<8x8xbf16>
    %cst_76 = arith.constant dense<0.000000e+00> : vector<8x8xf32>
    %231 = tpu.matmul %228, %230, %cst_76 {dimension_numbers = #tpu.dot_dimension_numbers<[1], [0], [0], [1], [0, 0, 1, 1], [], []>} : vector<8x8xbf16>, vector<8x8xbf16>, vector<8x8xf32> -> vector<8x8xf32>
    %232 = vector.broadcast %9 : vector<1x8xf32> to vector<8x8xf32>
    %233 = arith.addf %231, %232 : vector<8x8xf32>
    %cst_77 = arith.constant dense<0xFF800000> : vector<8xf32>
    %234 = vector.multi_reduction <maximumf>, %233, %cst_77 [1] : vector<8x8xf32> to vector<8xf32>
    %235 = vector.shape_cast %234 : vector<8xf32> to vector<8x1xf32>
    %236 = vector.broadcast %235 : vector<8x1xf32> to vector<8x8xf32>
    %237 = arith.subf %233, %236 : vector<8x8xf32>
    %238 = math.exp %237 : vector<8x8xf32>
    %cst_78 = arith.constant dense<0.000000e+00> : vector<8xf32>
    %239 = vector.multi_reduction <add>, %238, %cst_78 [1] : vector<8x8xf32> to vector<8xf32>
    %240 = vector.shape_cast %239 : vector<8xf32> to vector<8x1xf32>
    %241 = tpu.reciprocal %240 {approx = true} : vector<8x1xf32> -> vector<8x1xf32>
    %242 = vector.broadcast %241 : vector<8x1xf32> to vector<8x8xf32>
    %243 = arith.mulf %238, %242 : vector<8x8xf32>
    %244 = vector.extract_strided_slice %169 {offsets = [0, 16], sizes = [8, 8], strides = [1, 1]} : vector<8x32xf32> to vector<8x8xf32>
    %245 = arith.truncf %243 : vector<8x8xf32> to vector<8x8xbf16>
    %246 = arith.truncf %244 : vector<8x8xf32> to vector<8x8xbf16>
    %cst_79 = arith.constant dense<0.000000e+00> : vector<8x8xf32>
    %247 = tpu.matmul %245, %246, %cst_79 {dimension_numbers = #tpu.dot_dimension_numbers<[1], [0], [0], [1], [0, 0, 1, 1], [], []>} : vector<8x8xbf16>, vector<8x8xbf16>, vector<8x8xf32> -> vector<8x8xf32>
    %248 = vector.extract_strided_slice %170 {offsets = [16, 0], sizes = [8, 32], strides = [1, 1]} : vector<32x32xf32> to vector<8x32xf32>
    %249 = arith.truncf %247 : vector<8x8xf32> to vector<8x8xbf16>
    %250 = arith.truncf %248 : vector<8x32xf32> to vector<8x32xbf16>
    %cst_80 = arith.constant dense<0.000000e+00> : vector<8x32xf32>
    %251 = tpu.matmul %249, %250, %cst_80 {dimension_numbers = #tpu.dot_dimension_numbers<[1], [0], [0], [1], [0, 0, 1, 1], [], []>} : vector<8x8xbf16>, vector<8x32xbf16>, vector<8x32xf32> -> vector<8x32xf32>
    %252 = arith.addf %225, %251 : vector<8x32xf32>
    %253 = vector.extract_strided_slice %163 {offsets = [0, 24], sizes = [8, 8], strides = [1, 1]} : vector<8x32xf32> to vector<8x8xf32>
    %254 = vector.extract_strided_slice %168 {offsets = [0, 24], sizes = [8, 8], strides = [1, 1]} : vector<8x32xf32> to vector<8x8xf32>
    %255 = arith.truncf %253 : vector<8x8xf32> to vector<8x8xbf16>
    %256 = tpu.transpose %254, [1, 0] : vector<8x8xf32> -> vector<8x8xf32>
    %257 = arith.truncf %256 : vector<8x8xf32> to vector<8x8xbf16>
    %cst_81 = arith.constant dense<0.000000e+00> : vector<8x8xf32>
    %258 = tpu.matmul %255, %257, %cst_81 {dimension_numbers = #tpu.dot_dimension_numbers<[1], [0], [0], [1], [0, 0, 1, 1], [], []>} : vector<8x8xbf16>, vector<8x8xbf16>, vector<8x8xf32> -> vector<8x8xf32>
    %259 = vector.broadcast %9 : vector<1x8xf32> to vector<8x8xf32>
    %260 = arith.addf %258, %259 : vector<8x8xf32>
    %cst_82 = arith.constant dense<0xFF800000> : vector<8xf32>
    %261 = vector.multi_reduction <maximumf>, %260, %cst_82 [1] : vector<8x8xf32> to vector<8xf32>
    %262 = vector.shape_cast %261 : vector<8xf32> to vector<8x1xf32>
    %263 = vector.broadcast %262 : vector<8x1xf32> to vector<8x8xf32>
    %264 = arith.subf %260, %263 : vector<8x8xf32>
    %265 = math.exp %264 : vector<8x8xf32>
    %cst_83 = arith.constant dense<0.000000e+00> : vector<8xf32>
    %266 = vector.multi_reduction <add>, %265, %cst_83 [1] : vector<8x8xf32> to vector<8xf32>
    %267 = vector.shape_cast %266 : vector<8xf32> to vector<8x1xf32>
    %268 = tpu.reciprocal %267 {approx = true} : vector<8x1xf32> -> vector<8x1xf32>
    %269 = vector.broadcast %268 : vector<8x1xf32> to vector<8x8xf32>
    %270 = arith.mulf %265, %269 : vector<8x8xf32>
    %271 = vector.extract_strided_slice %169 {offsets = [0, 24], sizes = [8, 8], strides = [1, 1]} : vector<8x32xf32> to vector<8x8xf32>
    %272 = arith.truncf %270 : vector<8x8xf32> to vector<8x8xbf16>
    %273 = arith.truncf %271 : vector<8x8xf32> to vector<8x8xbf16>
    %cst_84 = arith.constant dense<0.000000e+00> : vector<8x8xf32>
    %274 = tpu.matmul %272, %273, %cst_84 {dimension_numbers = #tpu.dot_dimension_numbers<[1], [0], [0], [1], [0, 0, 1, 1], [], []>} : vector<8x8xbf16>, vector<8x8xbf16>, vector<8x8xf32> -> vector<8x8xf32>
    %275 = vector.extract_strided_slice %170 {offsets = [24, 0], sizes = [8, 32], strides = [1, 1]} : vector<32x32xf32> to vector<8x32xf32>
    %276 = arith.truncf %274 : vector<8x8xf32> to vector<8x8xbf16>
    %277 = arith.truncf %275 : vector<8x32xf32> to vector<8x32xbf16>
    %cst_85 = arith.constant dense<0.000000e+00> : vector<8x32xf32>
    %278 = tpu.matmul %276, %277, %cst_85 {dimension_numbers = #tpu.dot_dimension_numbers<[1], [0], [0], [1], [0, 0, 1, 1], [], []>} : vector<8x8xbf16>, vector<8x32xbf16>, vector<8x32xf32> -> vector<8x32xf32>
    %279 = arith.addf %252, %278 : vector<8x32xf32>
    %280 = arith.addf %146, %279 : vector<8x32xf32>
    %c0_86 = arith.constant 0 : index
    %c0_87 = arith.constant 0 : index
    %281 = vector.load %arg13[%c0_86, %c0_87] : memref<1x32xf32, #tpu.memory_space<vmem>>, vector<1x32xf32>
    %282 = arith.mulf %280, %280 : vector<8x32xf32>
    %cst_88 = arith.constant dense<0.000000e+00> : vector<8xf32>
    %283 = vector.multi_reduction <add>, %282, %cst_88 [1] : vector<8x32xf32> to vector<8xf32>
    %284 = vector.shape_cast %283 : vector<8xf32> to vector<8x1xf32>
    %cst_89 = arith.constant 3.200000e+01 : f32
    %285 = vector.broadcast %cst_89 : f32 to vector<8x1xf32>
    %286 = arith.divf %284, %285 : vector<8x1xf32>
    %cst_90 = arith.constant 9.99999997E-7 : f32
    %287 = vector.broadcast %cst_90 : f32 to vector<8x1xf32>
    %288 = arith.addf %286, %287 : vector<8x1xf32>
    %289 = math.rsqrt %288 : vector<8x1xf32>
    %290 = vector.broadcast %289 : vector<8x1xf32> to vector<8x32xf32>
    %291 = arith.mulf %280, %290 : vector<8x32xf32>
    %292 = vector.broadcast %281 : vector<1x32xf32> to vector<8x32xf32>
    %293 = arith.mulf %291, %292 : vector<8x32xf32>
    %c0_91 = arith.constant 0 : index
    %c0_92 = arith.constant 0 : index
    %294 = vector.load %arg14[%c0_91, %c0_92] : memref<32x64xf32, #tpu.memory_space<vmem>>, vector<32x64xf32>
    %295 = arith.truncf %293 : vector<8x32xf32> to vector<8x32xbf16>
    %296 = arith.truncf %294 : vector<32x64xf32> to vector<32x64xbf16>
    %cst_93 = arith.constant dense<0.000000e+00> : vector<8x64xf32>
    %297 = tpu.matmul %295, %296, %cst_93 {dimension_numbers = #tpu.dot_dimension_numbers<[1], [0], [0], [1], [0, 0, 1, 1], [], []>} : vector<8x32xbf16>, vector<32x64xbf16>, vector<8x64xf32> -> vector<8x64xf32>
    %cst_94 = arith.constant 0.000000e+00 : f32
    %298 = vector.broadcast %cst_94 : f32 to vector<8x64xf32>
    %299 = arith.maximumf %297, %298 : vector<8x64xf32>
    %c0_95 = arith.constant 0 : index
    %c0_96 = arith.constant 0 : index
    %300 = vector.load %arg15[%c0_95, %c0_96] : memref<64x32xf32, #tpu.memory_space<vmem>>, vector<64x32xf32>
    %301 = arith.truncf %299 : vector<8x64xf32> to vector<8x64xbf16>
    %302 = arith.truncf %300 : vector<64x32xf32> to vector<64x32xbf16>
    %cst_97 = arith.constant dense<0.000000e+00> : vector<8x32xf32>
    %303 = tpu.matmul %301, %302, %cst_97 {dimension_numbers = #tpu.dot_dimension_numbers<[1], [0], [0], [1], [0, 0, 1, 1], [], []>} : vector<8x64xbf16>, vector<64x32xbf16>, vector<8x32xf32> -> vector<8x32xf32>
    %304 = arith.addf %280, %303 : vector<8x32xf32>
    %c0_98 = arith.constant 0 : index
    %c0_99 = arith.constant 0 : index
    %305 = vector.load %arg16[%c0_98, %c0_99] : memref<1x32xf32, #tpu.memory_space<vmem>>, vector<1x32xf32>
    %306 = arith.mulf %304, %304 : vector<8x32xf32>
    %cst_100 = arith.constant dense<0.000000e+00> : vector<8xf32>
    %307 = vector.multi_reduction <add>, %306, %cst_100 [1] : vector<8x32xf32> to vector<8xf32>
    %308 = vector.shape_cast %307 : vector<8xf32> to vector<8x1xf32>
    %cst_101 = arith.constant 3.200000e+01 : f32
    %309 = vector.broadcast %cst_101 : f32 to vector<8x1xf32>
    %310 = arith.divf %308, %309 : vector<8x1xf32>
    %cst_102 = arith.constant 9.99999997E-7 : f32
    %311 = vector.broadcast %cst_102 : f32 to vector<8x1xf32>
    %312 = arith.addf %310, %311 : vector<8x1xf32>
    %313 = math.rsqrt %312 : vector<8x1xf32>
    %314 = vector.broadcast %313 : vector<8x1xf32> to vector<8x32xf32>
    %315 = arith.mulf %304, %314 : vector<8x32xf32>
    %316 = vector.broadcast %305 : vector<1x32xf32> to vector<8x32xf32>
    %317 = arith.mulf %315, %316 : vector<8x32xf32>
    %cst_103 = arith.constant 0.176776692 : f32
    %318 = vector.broadcast %cst_103 : f32 to vector<8x32xf32>
    %319 = arith.mulf %317, %318 : vector<8x32xf32>
    %c0_104 = arith.constant 0 : index
    %c0_105 = arith.constant 0 : index
    %320 = vector.load %arg17[%c0_104, %c0_105] : memref<64x32xf32, #tpu.memory_space<vmem>>, vector<64x32xf32>
    %321 = arith.truncf %319 : vector<8x32xf32> to vector<8x32xbf16>
    %322 = tpu.transpose %320, [1, 0] : vector<64x32xf32> -> vector<32x64xf32>
    %323 = arith.truncf %322 : vector<32x64xf32> to vector<32x64xbf16>
    %cst_106 = arith.constant dense<0.000000e+00> : vector<8x64xf32>
    %324 = tpu.matmul %321, %323, %cst_106 {dimension_numbers = #tpu.dot_dimension_numbers<[1], [0], [0], [1], [0, 0, 1, 1], [], []>} : vector<8x32xbf16>, vector<32x64xbf16>, vector<8x64xf32> -> vector<8x64xf32>
    %cst_107 = arith.constant dense<0xFF800000> : vector<8xf32>
    %325 = vector.multi_reduction <maximumf>, %324, %cst_107 [1] : vector<8x64xf32> to vector<8xf32>
    %326 = vector.shape_cast %325 : vector<8xf32> to vector<8x1xf32>
    %327 = vector.broadcast %326 : vector<8x1xf32> to vector<8x64xf32>
    %328 = arith.subf %324, %327 : vector<8x64xf32>
    %329 = math.exp %328 : vector<8x64xf32>
    %cst_108 = arith.constant dense<0.000000e+00> : vector<8xf32>
    %330 = vector.multi_reduction <add>, %329, %cst_108 [1] : vector<8x64xf32> to vector<8xf32>
    %331 = vector.shape_cast %330 : vector<8xf32> to vector<8x1xf32>
    %332 = math.log %331 : vector<8x1xf32>
    %333 = arith.addf %326, %332 : vector<8x1xf32>
    %334 = tpu.iota {dimensions = array<i32: 1>} : vector<8x64xi32>
    %c-100_i32 = arith.constant -100 : i32
    %335 = vector.broadcast %c-100_i32 : i32 to vector<8x1xi32>
    %336 = arith.cmpi eq, %11, %335 : vector<8x1xi32>
    %c0_i32 = arith.constant 0 : i32
    %337 = vector.broadcast %c0_i32 : i32 to vector<8x1xi32>
    %338 = arith.select %336, %337, %11 : vector<8x1xi1>, vector<8x1xi32>
    %339 = vector.broadcast %338 : vector<8x1xi32> to vector<8x64xi32>
    %340 = arith.cmpi eq, %334, %339 : vector<8x64xi32>
    %341 = arith.extui %340 : vector<8x64xi1> to vector<8x64xi32>
    %342 = arith.sitofp %341 : vector<8x64xi32> to vector<8x64xf32>
    %343 = arith.mulf %324, %342 : vector<8x64xf32>
    %cst_109 = arith.constant dense<0.000000e+00> : vector<8xf32>
    %344 = vector.multi_reduction <add>, %343, %cst_109 [1] : vector<8x64xf32> to vector<8xf32>
    %345 = vector.shape_cast %344 : vector<8xf32> to vector<8x1xf32>
    %c-100_i32_110 = arith.constant -100 : i32
    %346 = vector.broadcast %c-100_i32_110 : i32 to vector<8x1xi32>
    %347 = arith.cmpi ne, %11, %346 : vector<8x1xi32>
    %348 = arith.extui %347 : vector<8x1xi1> to vector<8x1xi32>
    %349 = arith.sitofp %348 : vector<8x1xi32> to vector<8x1xf32>
    %c0_111 = arith.constant 0 : index
    %c0_112 = arith.constant 0 : index
    %c0_113 = arith.constant 0 : index
    %350 = vector.load %arg18[%c0_111, %c0_112, %c0_113] : memref<1x8x64xf32, #tpu.memory_space<vmem>>, vector<1x8x64xf32>
    %351 = vector.shape_cast %350 : vector<1x8x64xf32> to vector<8x64xf32>
    %352 = vector.shape_cast %324 : vector<8x64xf32> to vector<1x8x64xf32>
    tpu.vector_store %arg18[%c0_111, %c0_112, %c0_113], %352 {strides = array<i32>} : memref<1x8x64xf32, #tpu.memory_space<vmem>>, vector<1x8x64xf32>,
    %353 = arith.subf %333, %345 : vector<8x1xf32>
    %354 = arith.mulf %353, %349 : vector<8x1xf32>
    %c0_114 = arith.constant 0 : index
    %c0_115 = arith.constant 0 : index
    %c0_116 = arith.constant 0 : index
    %355 = vector.load %arg19[%c0_114, %c0_115, %c0_116] : memref<1x8x1xf32, #tpu.memory_space<vmem>>, vector<1x8x1xf32>
    %356 = vector.shape_cast %355 : vector<1x8x1xf32> to vector<8x1xf32>
    %357 = vector.shape_cast %354 : vector<8x1xf32> to vector<1x8x1xf32>
    tpu.vector_store %arg19[%c0_114, %c0_115, %c0_116], %357 {strides = array<i32>} : memref<1x8x1xf32, #tpu.memory_space<vmem>>, vector<1x8x1xf32>,
    return
  }
  func.func @transform_0(%arg0: i32) -> (i32, i32, i32) {
    %c0_i32 = arith.constant 0 : i32
    %c0_i32_0 = arith.constant 0 : i32
    %c0_i32_1 = arith.constant 0 : i32
    return %arg0, %c0_i32, %c0_i32_0 : i32, i32, i32
  }
  func.func @transform_1(%arg0: i32) -> (i32, i32, i32) {
    %c0_i32 = arith.constant 0 : i32
    %c0_i32_0 = arith.constant 0 : i32
    %c0_i32_1 = arith.constant 0 : i32
    return %arg0, %c0_i32, %c0_i32_0 : i32, i32, i32
  }
  func.func @transform_2(%arg0: i32) -> (i32, i32, i32) {
    %c0_i32 = arith.constant 0 : i32
    %c0_i32_0 = arith.constant 0 : i32
    %c0_i32_1 = arith.constant 0 : i32
    return %arg0, %c0_i32, %c0_i32_0 : i32, i32, i32
  }
  func.func @transform_3(%arg0: i32) -> (i32, i32, i32) {
    %c0_i32 = arith.constant 0 : i32
    %c0_i32_0 = arith.constant 0 : i32
    %c0_i32_1 = arith.constant 0 : i32
    %c0_i32_2 = arith.constant 0 : i32
    return %c0_i32, %c0_i32_0, %c0_i32_1 : i32, i32, i32
  }
  func.func @transform_4(%arg0: i32) -> (i32, i32, i32) {
    %c0_i32 = arith.constant 0 : i32
    %c0_i32_0 = arith.constant 0 : i32
    %c0_i32_1 = arith.constant 0 : i32
    return %arg0, %c0_i32, %c0_i32_0 : i32, i32, i32
  }
  func.func @transform_5(%arg0: i32) -> (i32, i32) {
    %c0_i32 = arith.constant 0 : i32
    %c0_i32_0 = arith.constant 0 : i32
    %c0_i32_1 = arith.constant 0 : i32
    return %c0_i32, %c0_i32_0 : i32, i32
  }
  func.func @transform_6(%arg0: i32) -> (i32, i32) {
    %c0_i32 = arith.constant 0 : i32
    %c0_i32_0 = arith.constant 0 : i32
    %c0_i32_1 = arith.constant 0 : i32
    return %c0_i32, %c0_i32_0 : i32, i32
  }
  func.func @transform_7(%arg0: i32) -> (i32, i32) {
    %c0_i32 = arith.constant 0 : i32
    %c0_i32_0 = arith.constant 0 : i32
    %c0_i32_1 = arith.constant 0 : i32
    return %c0_i32, %c0_i32_0 : i32, i32
  }
  func.func @transform_8(%arg0: i32) -> (i32, i32) {
    %c0_i32 = arith.constant 0 : i32
    %c0_i32_0 = arith.constant 0 : i32
    %c0_i32_1 = arith.constant 0 : i32
    return %c0_i32, %c0_i32_0 : i32, i32
  }
  func.func @transform_9(%arg0: i32) -> (i32, i32) {
    %c0_i32 = arith.constant 0 : i32
    %c0_i32_0 = arith.constant 0 : i32
    %c0_i32_1 = arith.constant 0 : i32
    return %c0_i32, %c0_i32_0 : i32, i32
  }
  func.func @transform_10(%arg0: i32) -> (i32, i32) {
    %c0_i32 = arith.constant 0 : i32
    %c0_i32_0 = arith.constant 0 : i32
    %c0_i32_1 = arith.constant 0 : i32
    return %c0_i32, %c0_i32_0 : i32, i32
  }
  func.func @transform_11(%arg0: i32) -> (i32, i32) {
    %c0_i32 = arith.constant 0 : i32
    %c0_i32_0 = arith.constant 0 : i32
    %c0_i32_1 = arith.constant 0 : i32
    return %c0_i32, %c0_i32_0 : i32, i32
  }
  func.func @transform_12(%arg0: i32) -> (i32, i32) {
    %c0_i32 = arith.constant 0 : i32
    %c0_i32_0 = arith.constant 0 : i32
    %c0_i32_1 = arith.constant 0 : i32
    return %c0_i32, %c0_i32_0 : i32, i32
  }
  func.func @transform_13(%arg0: i32) -> (i32, i32) {
    %c0_i32 = arith.constant 0 : i32
    %c0_i32_0 = arith.constant 0 : i32
    %c0_i32_1 = arith.constant 0 : i32
    return %c0_i32, %c0_i32_0 : i32, i32
  }
  func.func @transform_14(%arg0: i32) -> (i32, i32) {
    %c0_i32 = arith.constant 0 : i32
    %c0_i32_0 = arith.constant 0 : i32
    %c0_i32_1 = arith.constant 0 : i32
    return %c0_i32, %c0_i32_0 : i32, i32
  }
  func.func @transform_15(%arg0: i32) -> (i32, i32) {
    %c0_i32 = arith.constant 0 : i32
    %c0_i32_0 = arith.constant 0 : i32
    %c0_i32_1 = arith.constant 0 : i32
    return %c0_i32, %c0_i32_0 : i32, i32
  }
  func.func @transform_16(%arg0: i32) -> (i32, i32) {
    %c0_i32 = arith.constant 0 : i32
    %c0_i32_0 = arith.constant 0 : i32
    %c0_i32_1 = arith.constant 0 : i32
    return %c0_i32, %c0_i32_0 : i32, i32
  }
  func.func @transform_17(%arg0: i32) -> (i32, i32, i32) {
    %c0_i32 = arith.constant 0 : i32
    %c0_i32_0 = arith.constant 0 : i32
    %c0_i32_1 = arith.constant 0 : i32
    return %arg0, %c0_i32, %c0_i32_0 : i32, i32, i32
  }
  func.func @transform_18(%arg0: i32) -> (i32, i32, i32) {
    %c0_i32 = arith.constant 0 : i32
    %c0_i32_0 = arith.constant 0 : i32
    %c0_i32_1 = arith.constant 0 : i32
    return %arg0, %c0_i32, %c0_i32_0 : i32, i32, i32
  }
}

</mosaic_0001>

<bundles_post_ra>
// kernel: generation_model_forward.2
= control target key start
LH: loop header
LB: loop body
LE: loop exit
PB: predicated region body
PF: predicated region fallthrough
CT: control target
= control target key end

     0   :  { %s1214_s13 = smov 0   ;;  %s1391_s0 = inlined_call_operand.vmem [shape: f32[2,8,32], index: 0, kind: input, shape index: {}]   ;;  %s1392_s1 = inlined_call_operand.vmem [shape: f32[2,1,8], index: 1, kind: input, shape index: {}]   ;;  %s1393_s2 = inlined_call_operand.vmem [shape: f32[4,8,8], index: 2, kind: input, shape index: {}]   ;;  %s1394_s3 = inlined_call_operand.vmem [shape: f32[1,32], index: 3, kind: input, shape index: {}, may-alias: {3,6,9}]   ;;  %s1395_s4 = inlined_call_operand.vmem [shape: f32[32,96], index: 4, kind: input, shape index: {}]   ;;  %s1396_s5 = inlined_call_operand.vmem [shape: f32[32,32], index: 5, kind: input, shape index: {}]   ;;  %s1397_s6 = inlined_call_operand.vmem [shape: f32[1,32], index: 6, kind: input, shape index: {}, may-alias: {3,6,9}]   ;;  %s1398_s7 = inlined_call_operand.vmem [shape: f32[32,64], index: 7, kind: input, shape index: {}]   ;;  %s1399_s8 = inlined_call_operand.vmem [shape: f32[64,32], index: 8, kind: input, shape index: {}]   ;;  %s1400_s9 = inlined_call_operand.vmem [shape: f32[1,32], index: 9, kind: input, shape index: {}, may-alias: {3,6,9}]   ;;  %s1401_s10 = inlined_call_operand.vmem [shape: f32[2,8,32], index: 10, kind: output, shape index: {}]  }
   0x1 LB: > { %s1057_s14 = sadd.s32 4294967295, %s1145_s13   ;;  %p1061_p0 = scmp.ge.s32.totalorder %s1145_s13, 1  ;;  %s1145_s13 = sphi %s1214_s13, %s20_s13  }
   0x2   : > { %p319_p1 = scmp.lt.s32.totalorder %s1145_s13, 3 }
   0x4   : > { %p320_p2 = pnand %p1061_p0, %p319_p1 }
   0x5   : > { %p358_p3 = scmp.lt.s32.totalorder (!%p320_p2), %s1057_s14, 1  ;;  %s1148_s29 = smov (!%p320_p2), 96  }
   0x6   : > { %323 = sbr.rel (%p320_p2) target bundleno = 2365 (0x93d), region = 60  ;;  %s1149_s30 = smov (!%p320_p2), 88  }
   0x7   : > { %s1150_s11 = smov (!%p320_p2), 80   ;;  %s1151_s20 = smov (!%p320_p2), 64  }
   0x8   : > { %s1152_s21 = smov (!%p320_p2), 120   ;;  %s1153_s22 = smov (!%p320_p2), 72  }
   0x9   : > { %s1154_s23 = smov (!%p320_p2), 112   ;;  %s1155_s24 = smov (!%p320_p2), 104  }
   0xa   : > { %s1156_s16 = smov (!%p320_p2), 56  }
   0xb   : > { %s1403_s14 = smov (!%p358_p3, %s1057_s14), 1  ;;  %vm376_vm0 = vcmask 261120   ;;  %v1147_v3 = vmov 32.0   ;;  %v406_v7 = vld [vmem:[%s1395_s4 + $0x10] sm:$0xff]  ;;  %v407_v8 = vld [vmem:[%s1395_s4 + $0x18] sm:$0xff]  ;;  %v404_v10 = vld [vmem:[%s1395_s4] sm:$0xff] }
   0xc   : > { %s1062_s15 = sshll.u32 %s1403_s14, 3  ;;  %1115 = vrcp.f32 %v1147_v3  ;;  %v410_v9 = vpack.c.bf16 %v407_v8, %v406_v7  ;;  %v405_v11 = vld [vmem:[%s1395_s4 + $0x8] sm:$0xff]  ;;  %v1112_v25 = vld [vmem:[%s1394_s3] ss:$0 sm:$0xff]  ;;  %vm478_vm5 = vcmask 1043456   ;;  %vm474_vm6 = vcmask 64512   ;;  %s364_s17 = scalar_lea.vmem %s1392_s1, %s1403_s14 }
   0xd   : > { %s361_s18 = scalar_lea.vmem %s1391_s0, %s1062_s15  ;;  %v409_v13 = vpack.c.bf16 %v405_v11, %v404_v10  ;;  %v371_v38 = vld [vmem:[%s364_s17] sm:$0x1]  ;;  %s1157_s17 = smov 48   ;;  %vm954_vm10 = vcmask 523264  }
   0xe   : > { %v1230_v0 = vld [vmem:[%s361_s18] sm:$0xff]  ;;  %420 = vmatpush.bf16.msra.mxu0 %v410_v9  ;;  %v372_v39 = vsub.f32 1.0, %v371_v38  ;;  %s1158_s18 = smov 40  }
   0xf   : > { %v375_v1 = vmul.f32 %v1230_v0, %v1230_v0  ;;  %v469_v42 = vld [vmem:[%s1393_s2] sm:$0xff] }
  0x10   : > { %v373_v40 = vmul.f32 -1e+09, %v372_v39  ;;  %v427_v3 = vld [vmem:[%s1396_s5] sm:$0xff] }
  0x11   : > { %v377_v2 = vsel %vm376_vm0, %v375_v1, 0.0 }
  0x12   : > { %378 = vadd.xlane.f32.xlu0 %v377_v2  ;;  %v1116_v4 = vpop.eup %1115  ;;  %421 = vmatpush.bf16.msra.mxu0 %v409_v13  ;;  %v1264_v41 = vperm.slane %v373_v40, 0 }
  0x13   : > { %v381_v5 = vmul.f32 32.0, %v1116_v4  ;;  %vm385_vm1 = vweird.f32 %v1116_v4 }
  0x14   : > { %v473_v43 = vadd.f32 %v1264_v41, %v469_v42 }
  0x15   : > { %v382_v6 = vsub.f32 1.0, %v381_v5 }
  0x17   : > { %v383_v12 = vmul.f32 %v1116_v4, %v382_v6  ;;  %v1067_v6 = vld [vmem:[%s1393_s2 + $0x8] sm:$0xff] }
  0x18   : > { %v569_v9 = vadd.f32 %v1067_v6, %v1264_v41 }
  0x19   : > { %v384_v14 = vadd.f32 %v1116_v4, %v383_v12 }
  0x1b   : > { %v1247_v15 = vsel %vm385_vm1, %v1116_v4, %v384_v14  ;;  %v530_v4 = vpack.c.bf16 %v427_v3, %v427_v3 }
  0x1d   : > { %v649_v5 = vsel %vm478_vm5, %v530_v4, 0 }
  0x85   : > { %v379_v16 = vpop.xlane.xlu0 %378 }
  0x86   : > { %v387_v17 = vmul.f32 %v1247_v15, %v379_v16 }
  0x88   : > { %v388_v18 = vadd.f32 1e-06, %v387_v17 }
  0x8a   : > { %1117 = vrsqrt.f32 %v388_v18  ;;  %vm395_vm3 = vweird.f32 %v388_v18 }
  0x90   : > { %v1118_v19 = vpop.eup %1117 }
  0x91   : > { %v390_v20 = vmul.f32 %v1118_v19, %v388_v18  ;;  %vm396_vm2 = vweird.f32 %v1118_v19 }
  0x92   : > { %vm397_vm4 = vmor %vm395_vm3, %vm396_vm2 }
  0x93   : > { %v391_v21 = vmul.f32 %v1118_v19, %v390_v20 }
  0x95   : > { %v392_v22 = vmul.f32 0.5, %v391_v21 }
  0x97   : > { %v393_v23 = vsub.f32 1.5, %v392_v22 }
  0x99   : > { %v394_v24 = vmul.f32 %v1118_v19, %v393_v23 }
  0x9b   : > { %v398_v26 = vsel %vm397_vm4, %v1118_v19, %v394_v24 }
  0x9c   : > { %v399_v27 = vmul.f32 %v398_v26, %v1230_v0 }
  0x9e   : > { %v403_v28 = vmul.f32 %v1112_v25, %v399_v27 }
  0xa0   : > { %v408_v29 = vpack.c.bf16 %v403_v28, %v403_v28 }
  0xa2   : > { %1064 = vmatmul.msk.bf16.vlgmr.msra.gmra.mxu0 %vm376_vm0, %v408_v29 }
 0x11f   : > { %v423_v30 = vpop.f32.mrf.mxu0 }
 0x120   : > { %433 = vrot.lane.b32.xlu0 %v423_v30, %s1148_s29  ;;  %v1256_v37 = vpack.c.bf16 %v423_v30, %v423_v30 }
 0x127   : > { %v425_v31 = vpop.f32.mrf.mxu0 }
 0x128   : > { %531 = vrot.lane.b32.xlu0 %v423_v30, %s1149_s30 }
 0x130   : > { %664 = vrot.lane.b32.xlu0 %v423_v30, %s1150_s11 }
 0x192   : > { %v434_v32 = vpop.permute.xlu0 %433 }
 0x193   : > { %436 = vxpose.xlu1.b32.start.end [1/1] (short) (narrow) %v434_v32, 8  ;;  %v1072_v32 = vld [vmem:[%s1393_s2 + $0x10] sm:$0xff] }
 0x19a   : > { %v532_v33 = vpop.permute.xlu0 %531 }
 0x19b   : > { %534 = vxpose.xlu0.b32.start.end [1/1] (short) (narrow) %v532_v33, 8  ;;  %v702_v33 = vadd.f32 %v1072_v32, %v1264_v41 }
 0x1a2   : > { %v665_v53 = vpop.permute.xlu0 %664 }
 0x237   : > { %v452_v34 = vpop.trf.xlu1 }
 0x238   : > { %v468_v35 = vpack.c.bf16 %v452_v34, %v452_v34 }
 0x23a   : > { %v480_v36 = vsel %vm478_vm5, %v468_v35, 0  ;;  %v1076_v35 = vld [vmem:[%s1393_s2 + $0x18] sm:$0xff] }
 0x23b   : > { %489 = vmatpush.bf16.msra.mxu1 %v480_v36  ;;  %v817_v39 = vadd.f32 %v1076_v35, %v1264_v41 }
 0x23e   : > { %1065 = vmatmul.msk.bf16.vlgmr.msra.gmra.mxu1 %vm474_vm6, %v1256_v37 }
 0x23f   : > { %v550_v54 = vpop.trf.xlu0 }
 0x240   : > { %v566_v55 = vpack.c.bf16 %v550_v54, %v550_v54 }
 0x242   : > { %v576_v56 = vsel %vm478_vm5, %v566_v55, 0 }
 0x243   : > { %585 = vmatpush.bf16.msra.mxu3 %v576_v56 }
 0x247   : > { %658 = vmatpush.bf16.msrb.mxu3 %v649_v5 }
 0x2bb   : > { %v491_v44 = vpop.f32.mrf.mxu1 }
 0x2bc   : > { %v492_v45 = vadd.f32 %v491_v44, %v473_v43 }
 0x2be   : > { %v495_v46 = vsel %vm474_vm6, %v492_v45, -inf }
 0x2bf   : > { %496 = vmax.xlane.f32.xlu1 %v495_v46 }
 0x2c3   : > { %v493_v47 = vpop.f32.mrf.mxu1 }
 0x332   : > { %v497_v48 = vpop.xlane.xlu1 %496 }
 0x333   : > { %v498_v49 = vsub.f32 %v492_v45, %v497_v48 }
 0x335   : > { %v499_v50 = vmul.f32 1.442695, %v498_v49 }
 0x337   : > { %1119 = vpow2.f32 %v499_v50 }
 0x33d   : > { %v1120_v51 = vpop.eup %1119 }
 0x33e   : > { %v501_v52 = vsel %vm474_vm6, %v1120_v51, 0.0 }
 0x33f   : > { %502 = vadd.xlane.f32.xlu2 %v501_v52 }
 0x357   : > { %508 = vrot.lane.b32.xlu2 %v1256_v37, %s1151_s20 }
 0x35f   : > { %570 = vrot.lane.b32.xlu2 %v1256_v37, %s1152_s21  ;;  %s368_s21 = scalar_lea.vmem %s1401_s10, %s1062_s15 }
 0x367   : > { %779 = vrot.lane.b32.xlu2 %v423_v30, %s1153_s22 }
 0x36f   : > { %703 = vrot.lane.b32.xlu2 %v1256_v37, %s1154_s23 }
 0x377   : > { %818 = vrot.lane.b32.xlu2 %v1256_v37, %s1155_s24 }
 0x3b2   : > { %v503_v57 = vpop.xlane.xlu2 %502 }
 0x3b3   : > { %1121 = vrcp.f32 %v503_v57 }
 0x3b9   : > { %v1122_v58 = vpop.eup %1121 }
 0x3ba   : > { %v509_v59 = vpop.permute.xlu2 %508  ;;  %v505_v60 = vmul.f32 %v1122_v58, %v1120_v51 }
 0x3bb   : > { %v514_v61 = vsel %vm478_vm5, %v509_v59, 0 }
 0x3bc   : > { %523 = vmatpush.bf16.msra.mxu2 %v514_v61  ;;  %v506_v62 = vpack.c.bf16 %v505_v60, %v505_v60  ;;  %v428_v61 = vld [vmem:[%s1396_s5 + $0x8] sm:$0xff] }
 0x3bf   : > { %1066 = vmatmul.msk.bf16.vlgmr.msra.gmra.mxu2 %vm474_vm6, %v506_v62  ;;  %v625_v62 = vpack.c.bf16 %v428_v61, %v428_v61 }
 0x3c2   : > { %v571_v63 = vpop.permute.xlu2 %570 }
 0x3c3   : > { %1068 = vmatmul.msk.bf16.vlgmr.msra.gmra.mxu3 %vm474_vm6, %v571_v63  ;;  %v630_v63 = vsel %vm478_vm5, %v625_v62, 0 }
 0x3c4   : > { %639 = vmatpush.bf16.msrb.mxu2 %v630_v63 }
 0x3ca   : > { %v780_v1 = vpop.permute.xlu2 %779 }
 0x3cb   : > { %v1105_v2 = vpack.i.bf16 %v780_v1, %v665_v53 }
 0x3cd   : > { %1106 = vxpose.xlu2.b32.start.end [1/1] (short) (narrow) %v1105_v2, 8 }
 0x3d2   : > { %v704_v16 = vpop.permute.xlu2 %703 }
 0x3da   : > { %v819_v17 = vpop.permute.xlu2 %818 }
 0x442   : > { %v525_v7 = vpop.f32.mrf.mxu2 }
 0x443   : > { %v529_v8 = vpack.c.bf16 %v525_v7, %v525_v7 }
 0x445   : > { %1071 = vmatmul.msk.bf16.vlgmr.msrb.gmra.mxu3 %vm474_vm6, %v529_v8 }
 0x446   : > { %v587_v10 = vpop.f32.mrf.mxu3 }
 0x447   : > { %v588_v11 = vadd.f32 %v587_v10, %v569_v9 }
 0x449   : > { %v591_v12 = vsel %vm474_vm6, %v588_v11, -inf }
 0x44a   : > { %v527_v13 = vpop.f32.mrf.mxu2  ;;  %592 = vmax.xlane.f32.xlu0 %v591_v12 }
 0x44e   : > { %v589_v14 = vpop.f32.mrf.mxu3 }
 0x466   : > { %v1107_v18 = vpop.trf.xlu2 }
 0x467   : > { %v1111_v19 = vunpack.i.h.bf16 %v1107_v18  ;;  %v1108_v20 = vunpack.i.l.bf16 %v1107_v18  ;;  %v430_v18 = vld [vmem:[%s1396_s5 + $0x18] sm:$0xff] }
 0x469   : > { %v699_v21 = vpack.c.bf16 %v1108_v20, %v1108_v20  ;;  %v814_v22 = vpack.c.bf16 %v1111_v19, %v1111_v19  ;;  %v873_v19 = vpack.c.bf16 %v430_v18, %v430_v18 }
 0x46b   : > { %v709_v23 = vsel %vm478_vm5, %v699_v21, 0  ;;  %v824_v24 = vsel %vm478_vm5, %v814_v22, 0  ;;  %v878_v21 = vsel %vm478_vm5, %v873_v19, 0 }
 0x46c   : > { %718 = vmatpush.bf16.msrb.mxu0 %v709_v23  ;;  %833 = vmatpush.bf16.msra.mxu3 %v824_v24 }
 0x46f   : > { %1073 = vmatmul.msk.bf16.vlgmr.msrb.gmra.mxu0 %vm474_vm6, %v704_v16  ;;  %1077 = vmatmul.msk.bf16.vlgmr.msra.gmra.mxu3 %vm474_vm6, %v819_v17  ;;  %v429_v16 = vld [vmem:[%s1396_s5 + $0x10] sm:$0xff] }
 0x470   : > { %v758_v17 = vpack.c.bf16 %v429_v16, %v429_v16 }
 0x472   : > { %v763_v20 = vsel %vm478_vm5, %v758_v17, 0 }
 0x473   : > { %772 = vmatpush.bf16.msra.mxu2 %v763_v20 }
 0x4bd   : > { %v593_v25 = vpop.xlane.xlu0 %592 }
 0x4be   : > { %v594_v26 = vsub.f32 %v588_v11, %v593_v25 }
 0x4c0   : > { %v595_v27 = vmul.f32 1.442695, %v594_v26 }
 0x4c2   : > { %1123 = vpow2.f32 %v595_v27 }
 0x4c8   : > { %v1124_v28 = vpop.eup %1123  ;;  %v1294_v29 = vpop.f32.mrf.mxu3 }
 0x4c9   : > { %v597_v30 = vsel %vm474_vm6, %v1124_v28, 0.0 }
 0x4ca   : > { %598 = vadd.xlane.f32.xlu1 %v597_v30 }
 0x4d0   : > { %v662_v31 = vpop.f32.mrf.mxu3 }
 0x4ec   : > { %v720_v34 = vpop.f32.mrf.mxu0 }
 0x4ed   : > { %v721_v36 = vadd.f32 %v720_v34, %v702_v33 }
 0x4ef   : > { %v724_v38 = vsel %vm474_vm6, %v721_v36, -inf }
 0x4f0   : > { %725 = vmax.xlane.f32.xlu2 %v724_v38 }
 0x4f2   : > { %v835_v40 = vpop.f32.mrf.mxu3 }
 0x4f3   : > { %v836_v42 = vadd.f32 %v835_v40, %v817_v39 }
 0x4f4   : > { %v722_v43 = vpop.f32.mrf.mxu0 }
 0x4f5   : > { %v839_v44 = vsel %vm474_vm6, %v836_v42, -inf  ;;  %v919_v43 = vld [vmem:[%s1398_s7 + $0x10] sm:$0xff] }
 0x4f6   : > { %840 = vmax.xlane.f32.xlu1 %v839_v44  ;;  %v920_v44 = vld [vmem:[%s1398_s7 + $0x18] sm:$0xff] }
 0x4fa   : > { %v837_v45 = vpop.f32.mrf.mxu3 }
 0x4fb   : > { %v917_v45 = vld [vmem:[%s1398_s7] sm:$0xff] }
 0x50f   : > { %603 = vrot.lane.b32.xlu1 %v1256_v37, %s1156_s16 }
 0x53d   : > { %v599_v46 = vpop.xlane.xlu1 %598 }
 0x563   : > { %v726_v47 = vpop.xlane.xlu2 %725 }
 0x564   : > { %v727_v48 = vsub.f32 %v721_v36, %v726_v47  ;;  %v947_v47 = vld [vmem:[%s1399_s8 + $0x30] sm:$0xff] }
 0x566   : > { %v728_v49 = vmul.f32 1.442695, %v727_v48  ;;  %v948_v48 = vld [vmem:[%s1399_s8 + $0x38] sm:$0xff] }
 0x568   : > { %1125 = vpow2.f32 %v728_v49  ;;  %v945_v49 = vld [vmem:[%s1399_s8 + $0x20] sm:$0xff] }
 0x569   : > { %v841_v50 = vpop.xlane.xlu1 %840 }
 0x56a   : > { %v842_v51 = vsub.f32 %v836_v42, %v841_v50  ;;  %v953_v50 = vpack.c.bf16 %v948_v48, %v947_v47 }
 0x56c   : > { %v843_v52 = vmul.f32 1.442695, %v842_v51  ;;  %v946_v51 = vld [vmem:[%s1399_s8 + $0x28] sm:$0xff]  ;;  %962 = vmatpush.bf16.msrb.mxu3 %v953_v50 }
 0x56e   : > { %v1126_v41 = vpop.eup %1125  ;;  %1127 = vpow2.f32 %v843_v52 }
 0x56f   : > { %v730_v53 = vsel %vm474_vm6, %v1126_v41, 0.0  ;;  %1129 = vrcp.f32 %v599_v46 }
 0x570   : > { %731 = vadd.xlane.f32.xlu1 %v730_v53 }
 0x574   : > { %v1128_v54 = vpop.eup %1127 }
 0x575   : > { %v845_v55 = vsel %vm474_vm6, %v1128_v54, 0.0  ;;  %v1130_v56 = vpop.eup %1129 }
 0x576   : > { %846 = vadd.xlane.f32.xlu0 %v845_v55  ;;  %v601_v57 = vmul.f32 %v1130_v56, %v1124_v28  ;;  %v944_v55 = vld [vmem:[%s1399_s8 + $0x18] sm:$0xff] }
 0x578   : > { %v602_v60 = vpack.c.bf16 %v601_v57, %v601_v57 }
 0x581   : > { %v604_v58 = vpop.permute.xlu1 %603 }
 0x582   : > { %v609_v59 = vsel %vm478_vm5, %v604_v58, 0 }
 0x583   : > { %618 = vmatpush.bf16.msrb.mxu1 %v609_v59 }
 0x586   : > { %1069 = vmatmul.msk.bf16.vlgmr.msrb.gmra.mxu1 %vm474_vm6, %v602_v60 }
 0x589   : > { %736 = vrot.lane.b32.xlu1 %v1256_v37, %s1157_s17 }
 0x58a   : > { %851 = vrot.lane.b32.xlu0 %v1256_v37, %s1158_s18 }
 0x5e3   : > { %v732_v1 = vpop.xlane.xlu1 %731 }
 0x5e4   : > { %1131 = vrcp.f32 %v732_v1  ;;  %v1113_v1 = vld [vmem:[%s1397_s6] ss:$0 sm:$0xff] }
 0x5e9   : > { %v847_v2 = vpop.xlane.xlu0 %846 }
 0x5ea   : > { %1133 = vrcp.f32 %v847_v2  ;;  %v1132_v3 = vpop.eup %1131 }
 0x5eb   : > { %v734_v5 = vmul.f32 %v1132_v3, %v1126_v41  ;;  %v952_v41 = vpack.c.bf16 %v946_v51, %v945_v49 }
 0x5ed   : > { %v735_v10 = vpack.c.bf16 %v734_v5, %v734_v5  ;;  %963 = vmatpush.bf16.msrb.mxu3 %v952_v41 }
 0x5f0   : > { %v1134_v4 = vpop.eup %1133 }
 0x5f1   : > { %v849_v6 = vmul.f32 %v1134_v4, %v1128_v54  ;;  %v943_v54 = vld [vmem:[%s1399_s8 + $0x10] sm:$0xff] }
 0x5f2   : > { %v951_v57 = vpack.c.bf16 %v944_v55, %v943_v54 }
 0x5f3   : > { %v850_v11 = vpack.c.bf16 %v849_v6, %v849_v6  ;;  %v941_v6 = vld [vmem:[%s1399_s8] sm:$0xff] }
 0x5f4   : > { %964 = vmatpush.bf16.msrb.mxu3 %v951_v57 }
 0x5fb   : > { %v737_v7 = vpop.permute.xlu1 %736 }
 0x5fc   : > { %v742_v8 = vsel %vm478_vm5, %v737_v7, 0  ;;  %v852_v37 = vpop.permute.xlu0 %851  ;;  %v942_v7 = vld [vmem:[%s1399_s8 + $0x8] sm:$0xff] }
 0x5fd   : > { %v857_v9 = vsel %vm478_vm5, %v852_v37, 0  ;;  %751 = vmatpush.bf16.msra.mxu1 %v742_v8  ;;  %v950_v8 = vpack.c.bf16 %v942_v7, %v941_v6 }
 0x5fe   : > { %866 = vmatpush.bf16.msra.mxu0 %v857_v9 }
 0x5ff   : > { %965 = vmatpush.bf16.msrb.mxu3 %v950_v8 }
 0x600   : > { %1074 = vmatmul.msk.bf16.vlgmr.msra.gmra.mxu1 %vm474_vm6, %v735_v10 }
 0x601   : > { %1078 = vmatmul.msk.bf16.vlgmr.msra.gmra.mxu0 %vm474_vm6, %v850_v11  ;;  %887 = vmatpush.bf16.msrb.mxu1 %v878_v21 }
 0x603   : > { %v620_v12 = vpop.f32.mrf.mxu1 }
 0x604   : > { %v624_v13 = vpack.c.bf16 %v620_v12, %v620_v12 }
 0x606   : > { %1070 = vmatmul.msk.bf16.vlgmr.msrb.gmra.mxu2 %vm474_vm6, %v624_v13 }
 0x60b   : > { %v622_v14 = vpop.f32.mrf.mxu1 }
 0x67d   : > { %v753_v22 = vpop.f32.mrf.mxu1 }
 0x67e   : > { %v757_v23 = vpack.c.bf16 %v753_v22, %v753_v22  ;;  %v868_v24 = vpop.f32.mrf.mxu0 }
 0x67f   : > { %v872_v25 = vpack.c.bf16 %v868_v24, %v868_v24 }
 0x680   : > { %1075 = vmatmul.msk.bf16.vlgmr.msra.gmra.mxu2 %vm474_vm6, %v757_v23 }
 0x681   : > { %1079 = vmatmul.msk.bf16.vlgmr.msrb.gmra.mxu1 %vm474_vm6, %v872_v25 }
 0x685   : > { %v755_v26 = vpop.f32.mrf.mxu1 }
 0x686   : > { %v870_v27 = vpop.f32.mrf.mxu0 }
 0x687   : > { %v1114_v27 = vld [vmem:[%s1400_s9] ss:$0 sm:$0xff] }
 0x689   : > { %v641_v28 = vpop.f32.mrf.mxu2 }
 0x68a   : > { %v661_v32 = vadd.f32 %v1294_v29, %v641_v28  ;;  %v923_v29 = vpack.c.bf16 %v920_v44, %v919_v43 }
 0x68c   : > { %933 = vmatpush.bf16.msrb.mxu2 %v923_v29 }
 0x691   : > { %v643_v30 = vpop.f32.mrf.mxu2 }
 0x6fe   : > { %v889_v31 = vpop.f32.mrf.mxu1 }
 0x703   : > { %v774_v33 = vpop.f32.mrf.mxu2 }
 0x704   : > { %v778_v34 = vadd.f32 %v774_v33, %v661_v32 }
 0x706   : > { %v893_v35 = vadd.f32 %v889_v31, %v778_v34  ;;  %v891_v36 = vpop.f32.mrf.mxu1 }
 0x708   : > { %v894_v38 = vadd.f32 %v893_v35, %v1230_v0  ;;  %v918_v0 = vld [vmem:[%s1398_s7 + $0x8] sm:$0xff] }
 0x709   : > { %v922_v46 = vpack.c.bf16 %v918_v0, %v917_v45 }
 0x70a   : > { %v896_v39 = vmul.f32 %v894_v38, %v894_v38 }
 0x70b   : > { %v776_v40 = vpop.f32.mrf.mxu2  ;;  %934 = vmatpush.bf16.msrb.mxu2 %v922_v46 }
 0x70c   : > { %v897_v42 = vsel %vm376_vm0, %v896_v39, 0.0 }
 0x70d   : > { %898 = vadd.xlane.f32.xlu1 %v897_v42 }
 0x780   : > { %v899_v52 = vpop.xlane.xlu1 %898 }
 0x781   : > { %v900_v53 = vmul.f32 %v899_v52, %v1247_v15 }
 0x783   : > { %v901_v56 = vadd.f32 1e-06, %v900_v53 }
 0x785   : > { %1135 = vrsqrt.f32 %v901_v56  ;;  %vm908_vm8 = vweird.f32 %v901_v56 }
 0x78b   : > { %v1136_v58 = vpop.eup %1135 }
 0x78c   : > { %v903_v59 = vmul.f32 %v1136_v58, %v901_v56  ;;  %vm909_vm7 = vweird.f32 %v1136_v58 }
 0x78d   : > { %vm910_vm9 = vmor %vm908_vm8, %vm909_vm7 }
 0x78e   : > { %v904_v60 = vmul.f32 %v1136_v58, %v903_v59 }
 0x790   : > { %v905_v61 = vmul.f32 0.5, %v904_v60 }
 0x792   : > { %v906_v62 = vsub.f32 1.5, %v905_v61 }
 0x794   : > { %v907_v63 = vmul.f32 %v1136_v58, %v906_v62 }
 0x796   : > { %v911_v2 = vsel %vm910_vm9, %v1136_v58, %v907_v63 }
 0x797   : > { %v912_v3 = vmul.f32 %v911_v2, %v894_v38 }
 0x799   : > { %v916_v4 = vmul.f32 %v1113_v1, %v912_v3 }
 0x79b   : > { %v921_v5 = vpack.c.bf16 %v916_v4, %v916_v4 }
 0x79d   : > { %1080 = vmatmul.msk.bf16.vlgmr.msrb.gmra.mxu2 %vm376_vm0, %v921_v5 }
 0x820   : > { %v936_v37 = vpop.f32.mrf.mxu2 }
 0x821   : > { %v940_v9 = vmax.f32 %v936_v37, 0.0 }
 0x823   : > { %v949_v10 = vpack.c.bf16 %v940_v9, %v940_v9 }
 0x825   : > { %1081 = vmatmul.msk.bf16.vlgmr.msrb.gmra.mxu3 %vm954_vm10, %v949_v10 }
 0x828   : > { %v938_v11 = vpop.f32.mrf.mxu2 }
 0x8a8   : > { %v967_v12 = vpop.f32.mrf.mxu3 }
 0x8a9   : > { %v971_v13 = vadd.f32 %v967_v12, %v894_v38 }
 0x8ab   : > { %v973_v14 = vmul.f32 %v971_v13, %v971_v13 }
 0x8ad   : > { %v974_v16 = vsel %vm376_vm0, %v973_v14, 0.0 }
 0x8ae   : > { %975 = vadd.xlane.f32.xlu2 %v974_v16 }
 0x8b0   : > { %v969_v17 = vpop.f32.mrf.mxu3 }
 0x921   : > { %v976_v18 = vpop.xlane.xlu2 %975 }
 0x922   : > { %v977_v19 = vmul.f32 %v976_v18, %v1247_v15 }
 0x924   : > { %v978_v20 = vadd.f32 1e-06, %v977_v19 }
 0x926   : > { %1137 = vrsqrt.f32 %v978_v20  ;;  %vm985_vm12 = vweird.f32 %v978_v20 }
 0x92c   : > { %v1138_v21 = vpop.eup %1137 }
 0x92d   : > { %v980_v22 = vmul.f32 %v1138_v21, %v978_v20  ;;  %vm986_vm11 = vweird.f32 %v1138_v21 }
 0x92e   : > { %vm987_vm13 = vmor %vm985_vm12, %vm986_vm11 }
 0x92f   : > { %v981_v23 = vmul.f32 %v1138_v21, %v980_v22 }
 0x931   : > { %v982_v24 = vmul.f32 0.5, %v981_v23 }
 0x933   : > { %v983_v25 = vsub.f32 1.5, %v982_v24 }
 0x935   : > { %v984_v26 = vmul.f32 %v1138_v21, %v983_v25 }
 0x937   : > { %v988_v28 = vsel %vm987_vm13, %v1138_v21, %v984_v26 }
 0x938   : > { %v989_v30 = vmul.f32 %v988_v28, %v971_v13 }
 0x93a   : > { %v993_v15 = vmul.f32 %v1114_v27, %v989_v30 }
 0x93c   : > { %994 = vst.msk [vmem:[%s368_s21] sm:$0xff] %vm376_vm0, %v993_v15 }
 0x93d PF: > { %s20_s13 = sadd.s32 1, %s1145_s13  }
 0x93e   : > { %p17_p4 = scmp.ge.s32.totalorder %s20_s13, 4  }
 0x940   :  { %19 = sbr.rel (!%p17_p4) target bundleno = 1 (0x1), region = 96 }

// kernel: generation_model_forward.3
= control target key start
LH: loop header
LB: loop body
LE: loop exit
PB: predicated region body
PF: predicated region fallthrough
CT: control target
= control target key end

     0   :  { %s2755_s0 = inlined_call_operand.vmem [shape: f32[2,8,32], index: 0, kind: input, shape index: {}]   ;;  %s2756_s1 = inlined_call_operand.vmem [shape: f32[2,8,32], index: 1, kind: input, shape index: {}]   ;;  %s2757_s2 = inlined_call_operand.vmem [shape: f32[2,1,8], index: 2, kind: input, shape index: {}]   ;;  %s2758_s3 = inlined_call_operand.vmem [shape: f32[4,8,8], index: 3, kind: input, shape index: {}]   ;;  %s2759_s4 = inlined_call_operand.vmem [shape: s32[2,8,1], index: 4, kind: input, shape index: {}]   ;;  %s2760_s5 = inlined_call_operand.vmem [shape: f32[1,32], index: 5, kind: input, shape index: {}, may-alias: {5,8,12,15}]   ;;  %s2761_s6 = inlined_call_operand.vmem [shape: f32[32,96], index: 6, kind: input, shape index: {}]   ;;  %s2762_s7 = inlined_call_operand.vmem [shape: f32[32,32], index: 7, kind: input, shape index: {}]   ;;  %s2763_s8 = inlined_call_operand.vmem [shape: f32[1,32], index: 8, kind: input, shape index: {}, may-alias: {5,8,12,15}]   ;;  %s2764_s9 = inlined_call_operand.vmem [shape: f32[32,32], index: 9, kind: input, shape index: {}]   ;;  %s2765_s10 = inlined_call_operand.vmem [shape: f32[32,64], index: 10, kind: input, shape index: {}]   ;;  %s2766_s11 = inlined_call_operand.vmem [shape: f32[32,32], index: 11, kind: input, shape index: {}]   ;;  %s2767_s12 = inlined_call_operand.vmem [shape: f32[1,32], index: 12, kind: input, shape index: {}, may-alias: {5,8,12,15}]   ;;  %s2768_s13 = inlined_call_operand.vmem [shape: f32[32,64], index: 13, kind: input, shape index: {}]   ;;  %s2769_s14 = inlined_call_operand.vmem [shape: f32[64,32], index: 14, kind: input, shape index: {}]   ;;  %s2770_s15 = inlined_call_operand.vmem [shape: f32[1,32], index: 15, kind: input, shape index: {}, may-alias: {5,8,12,15}]   ;;  %s2771_s16 = inlined_call_operand.vmem [shape: f32[64,32], index: 16, kind: input, shape index: {}]   ;;  %s2772_s17 = inlined_call_operand.hbm [shape: f32[2,8,64], index: 17, kind: output, shape index: {0}]   ;;  %s2773_s18 = inlined_call_operand.vmem [shape: f32[2,8,1], index: 18, kind: output, shape index: {1}]  }
   0x1   :  { %2788 = sst [smem:[#allocation9_spill]] %s2755_s0 }
   0x2   :  { %2789 = sst [smem:[#allocation10_spill]] %s2756_s1 }
   0x3   :  { %2790 = sst [smem:[#allocation11_spill]] %s2757_s2 }
   0x4   :  { %2791 = sst [smem:[#allocation12_spill]] %s2758_s3 }
   0x5   :  { %2792 = sst [smem:[#allocation13_spill]] %s2760_s5 }
   0x6   :  { %2793 = sst [smem:[#allocation14_spill]] %s2761_s6 }
   0x7   :  { %2794 = sst [smem:[#allocation15_spill]] %s2762_s7 }
   0x8   :  { %24 = vsyncpa [#allocation3], 0 }
   0x9   :  { %26 = vsyncpa [#allocation3 + $0x1], 0  ;;  %s2345_s27 = smov 0   ;;  %s2347_s28 = smov 0  }
   0xa   :  { %s2349_s29 = smov 0   ;;  %s2351_s30 = smov 0  }
   0xb LB: > { %2795 = sst [smem:[#allocation5_spill]] %s2230_s29  ;;  %s2366_s0 = sadd.s32 4294967295, %s2234_s30   ;;  %s2234_s30 = sphi %s2351_s30, %s2816_s30   ;;  %s2230_s29 = sphi %s2349_s29, %s2818_s29   ;;  %s2226_s28 = sphi %s2347_s28, %s2820_s28   ;;  %s2222_s27 = sphi %s2345_s27, %s2819_s27  }
   0xc   : > { %s2005_s19 = sadd.s32 4294967294, %s2234_s30   ;;  %s2370_s1 = sadd.s32 1, %s2234_s30  }
   0xd   : > { %2796 = sst [smem:[#allocation6_spill]] %s2370_s1  ;;  %s416_s20 = sadd.s32 1, %s2230_s29 }
   0xe   : > { %s413_s21 = ssub.s32 %s2234_s30, %s2370_s1  ;;  %p426_p0 = scmp.ne.s32.totalorder %s2230_s29, %s2226_s28 }
   0xf   : > { %p414_p1 = scmp.eq.s32.totalorder %s413_s21, 0  ;;  %p427_p2 = scmp.eq.s32.totalorder %s2366_s0, 1 }
  0x10   : > { %p432_p3 = scmp.ne.s32.totalorder %s2226_s28, %s2222_s27  ;;  %p433_p4 = scmp.eq.s32.totalorder %s2005_s19, 1 }
  0x11   : > { %s2381_s22 = scalar_select %p414_p1, %s2230_s29, %s416_s20  }
  0x12   : > { %p2383_p5 = por %p427_p2, %p426_p0  ;;  %p2387_p6 = por %p433_p4, %p432_p3 }
  0x13   : > { %2797 = sst [smem:[#allocation7_spill]] %s2381_s22  ;;  %p2008_p7 = scmp.ge.s32.totalorder %s2234_s30, 1 }
  0x14   : > { %s2799_s23 = scalar_select %p2387_p6, 1, 0 }
  0x15   : > { %p543_p8 = scmp.lt.s32.totalorder %s2234_s30, 3 }
  0x16   : > { %2800 = sst [smem:[#allocation8_spill]] %s2799_s23 }
  0x17   : > { %p544_p9 = pnand %p2008_p7, %p543_p8 }
  0x18   : > { %p611_p10 = scmp.lt.s32.totalorder (!%p544_p9), %s2366_s0, 1  ;;  %s2801_s20 = sld [smem:[#allocation9_spill]] (!%p544_p9) }
  0x19   : > { %547 = sbr.rel (%p544_p9) target bundleno = 4413 (0x113d), region = 88  ;;  %s2802_s6 = sld [smem:[#allocation14_spill]] (!%p544_p9) }
  0x1a   : > { %s2803_s5 = sld [smem:[#allocation13_spill]] (!%p544_p9)  ;;  %s2787_s22 = smov (!%p544_p9), 96  }
  0x1b   : > { %s2779_s23 = smov (!%p544_p9), 88   ;;  %s2778_s26 = smov (!%p544_p9), 80  }
  0x1c   : > { %s2804_s3 = sld [smem:[#allocation12_spill]] (!%p544_p9)  ;;  %s2785_s29 = smov (!%p544_p9), 120  }
  0x1d   : > { %s2780_s1 = smov (!%p544_p9), 72   ;;  %s2781_s19 = smov (!%p544_p9), 112  }
  0x1e   : > { %s2395_s24 = scalar_select %p611_p10, %s2366_s0, 1  ;;  %vm639_vm0 = vcmask 261120   ;;  %v2236_v3 = vmov 32.0   ;;  %vm737_vm5 = vcmask 1043456   ;;  %vm733_vm6 = vcmask 64512  }
  0x1f   : > { %2126 = vrcp.f32 %v2236_v3  ;;  %v669_v7 = vld [vmem:[%s2802_s6 + $0x10] sm:$0xff]  ;;  %v670_v8 = vld [vmem:[%s2802_s6 + $0x18] sm:$0xff]  ;;  %v667_v10 = vld [vmem:[%s2802_s6] sm:$0xff]  ;;  %s2805_s7 = sld [smem:[#allocation15_spill]]  ;;  %vm1732_vm13 = vcmask 523264  }
  0x20   : > { %s2398_s25 = sshll.u32 %s2395_s24, 3  ;;  %v673_v9 = vpack.c.bf16 %v670_v8, %v669_v7  ;;  %v668_v11 = vld [vmem:[%s2802_s6 + $0x8] sm:$0xff]  ;;  %v2122_v25 = vld [vmem:[%s2803_s5] ss:$0 sm:$0xff]  ;;  %s2808_s5 = sld [smem:[#allocation11_spill]] }
  0x21   : > { %s614_s21 = scalar_lea.vmem %s2801_s20, %s2398_s25  ;;  %v672_v13 = vpack.c.bf16 %v668_v11, %v667_v10  ;;  %s2783_s20 = smov 104  }
  0x22   : > { %v2404_v0 = vld [vmem:[%s614_s21] sm:$0xff]  ;;  %683 = vmatpush.bf16.msra.mxu0 %v673_v9  ;;  %s2240_s21 = smov 64   ;;  %v2017_v3 = vld [vmem:[%s2804_s3 + $0x8] sm:$0xff] }
  0x23   : > { %v638_v1 = vmul.f32 %v2404_v0, %v2404_v0  ;;  %v732_v38 = vld [vmem:[%s2804_s3] sm:$0xff] }
  0x25   : > { %v640_v2 = vsel %vm639_vm0, %v638_v1, 0.0  ;;  %v2127_v4 = vpop.eup %2126  ;;  %v690_v61 = vld [vmem:[%s2805_s7] sm:$0xff] }
  0x26   : > { %641 = vadd.xlane.f32.xlu0 %v640_v2  ;;  %v644_v5 = vmul.f32 32.0, %v2127_v4  ;;  %684 = vmatpush.bf16.msra.mxu0 %v672_v13  ;;  %vm648_vm1 = vweird.f32 %v2127_v4  ;;  %v789_v62 = vpack.c.bf16 %v690_v61, %v690_v61  ;;  %s621_s6 = scalar_lea.vmem %s2808_s5, %s2395_s24  ;;  %s625_s5 = scalar_lea.vmem %s2759_s4, %s2398_s25 }
  0x28   : > { %v645_v6 = vsub.f32 1.0, %v644_v5  ;;  %v907_v63 = vsel %vm737_vm5, %v789_v62, 0 }
  0x2a   : > { %v646_v12 = vmul.f32 %v2127_v4, %v645_v6 }
  0x2c   : > { %v647_v14 = vadd.f32 %v2127_v4, %v646_v12 }
  0x2e   : > { %v2421_v15 = vsel %vm648_vm1, %v2127_v4, %v647_v14 }
  0x99   : > { %v642_v16 = vpop.xlane.xlu0 %641 }
  0x9a   : > { %v650_v17 = vmul.f32 %v2421_v15, %v642_v16 }
  0x9c   : > { %v651_v18 = vadd.f32 1e-06, %v650_v17 }
  0x9e   : > { %2128 = vrsqrt.f32 %v651_v18  ;;  %vm658_vm3 = vweird.f32 %v651_v18 }
  0xa4   : > { %v2129_v19 = vpop.eup %2128 }
  0xa5   : > { %v653_v20 = vmul.f32 %v2129_v19, %v651_v18  ;;  %vm659_vm2 = vweird.f32 %v2129_v19 }
  0xa6   : > { %vm660_vm4 = vmor %vm658_vm3, %vm659_vm2 }
  0xa7   : > { %v654_v21 = vmul.f32 %v2129_v19, %v653_v20 }
  0xa9   : > { %v655_v22 = vmul.f32 0.5, %v654_v21 }
  0xab   : > { %v656_v23 = vsub.f32 1.5, %v655_v22 }
  0xad   : > { %v657_v24 = vmul.f32 %v2129_v19, %v656_v23 }
  0xaf   : > { %v661_v26 = vsel %vm660_vm4, %v2129_v19, %v657_v24 }
  0xb0   : > { %v662_v27 = vmul.f32 %v661_v26, %v2404_v0  ;;  %v2022_v26 = vld [vmem:[%s2804_s3 + $0x10] sm:$0xff] }
  0xb2   : > { %v666_v28 = vmul.f32 %v2122_v25, %v662_v27 }
  0xb4   : > { %v671_v29 = vpack.c.bf16 %v666_v28, %v666_v28 }
  0xb6   : > { %2014 = vmatmul.msk.bf16.vlgmr.msra.gmra.mxu0 %vm639_vm0, %v671_v29 }
 0x133   : > { %v686_v30 = vpop.f32.mrf.mxu0 }
 0x134   : > { %696 = vrot.lane.b32.xlu0 %v686_v30, %s2787_s22  ;;  %v2433_v37 = vpack.c.bf16 %v686_v30, %v686_v30 }
 0x13b   : > { %v688_v31 = vpop.f32.mrf.mxu0 }
 0x13c   : > { %790 = vrot.lane.b32.xlu0 %v686_v30, %s2779_s23  ;;  %s2247_s23 = smov 40  }
 0x144   : > { %922 = vrot.lane.b32.xlu0 %v686_v30, %s2778_s26 }
 0x1a6   : > { %v697_v32 = vpop.permute.xlu0 %696 }
 0x1a7   : > { %699 = vxpose.xlu1.b32.start.end [1/1] (short) (narrow) %v697_v32, 8 }
 0x1ae   : > { %v791_v33 = vpop.permute.xlu0 %790 }
 0x1af   : > { %793 = vxpose.xlu0.b32.start.end [1/1] (short) (narrow) %v791_v33, 8 }
 0x1b6   : > { %v923_v48 = vpop.permute.xlu0 %922 }
 0x24b   : > { %v715_v34 = vpop.trf.xlu1 }
 0x24c   : > { %v731_v35 = vpack.c.bf16 %v715_v34, %v715_v34 }
 0x24e   : > { %v739_v36 = vsel %vm737_vm5, %v731_v35, 0 }
 0x24f   : > { %748 = vmatpush.bf16.msra.mxu1 %v739_v36 }
 0x252   : > { %2015 = vmatmul.msk.bf16.vlgmr.msra.gmra.mxu1 %vm733_vm6, %v2433_v37 }
 0x253   : > { %v809_v49 = vpop.trf.xlu0 }
 0x254   : > { %v825_v50 = vpack.c.bf16 %v809_v49, %v809_v49 }
 0x256   : > { %v834_v51 = vsel %vm737_vm5, %v825_v50, 0 }
 0x257   : > { %843 = vmatpush.bf16.msra.mxu3 %v834_v51 }
 0x25b   : > { %916 = vmatpush.bf16.msrb.mxu3 %v907_v63 }
 0x2cf   : > { %v750_v39 = vpop.f32.mrf.mxu1 }
 0x2d0   : > { %v751_v40 = vadd.f32 %v750_v39, %v732_v38 }
 0x2d2   : > { %v754_v41 = vsel %vm733_vm6, %v751_v40, -inf }
 0x2d3   : > { %755 = vmax.xlane.f32.xlu1 %v754_v41 }
 0x2d7   : > { %v752_v42 = vpop.f32.mrf.mxu1 }
 0x346   : > { %v756_v43 = vpop.xlane.xlu1 %755 }
 0x347   : > { %v757_v44 = vsub.f32 %v751_v40, %v756_v43 }
 0x349   : > { %v758_v45 = vmul.f32 1.442695, %v757_v44 }
 0x34b   : > { %2130 = vpow2.f32 %v758_v45 }
 0x351   : > { %v2131_v46 = vpop.eup %2130 }
 0x352   : > { %v760_v47 = vsel %vm733_vm6, %v2131_v46, 0.0 }
 0x353   : > { %761 = vadd.xlane.f32.xlu2 %v760_v47 }
 0x36b   : > { %767 = vrot.lane.b32.xlu2 %v2433_v37, %s2240_s21  ;;  %s2813_s21 = smov 88  }
 0x373   : > { %828 = vrot.lane.b32.xlu2 %v2433_v37, %s2785_s29  ;;  %s2806_s29 = sld [smem:[#allocation10_spill]] }
 0x379   : > { %s618_s22 = scalar_lea.vmem %s2806_s29, %s2398_s25  ;;  %s2811_s29 = smov 112  }
 0x37b   : > { %1036 = vrot.lane.b32.xlu2 %v686_v30, %s2780_s1  ;;  %v2026_v30 = vld [vmem:[%s2804_s3 + $0x18] sm:$0xff]  ;;  %s2807_s3 = smov 96   ;;  %s2812_s1 = smov 72  }
 0x383   : > { %960 = vrot.lane.b32.xlu2 %v2433_v37, %s2781_s19  ;;  %s2245_s19 = smov 56  }
 0x38b   : > { %1074 = vrot.lane.b32.xlu2 %v2433_v37, %s2783_s20 }
 0x3c6   : > { %v762_v52 = vpop.xlane.xlu2 %761 }
 0x3c7   : > { %2132 = vrcp.f32 %v762_v52 }
 0x3cd   : > { %v2133_v53 = vpop.eup %2132 }
 0x3ce   : > { %v768_v54 = vpop.permute.xlu2 %767  ;;  %v764_v55 = vmul.f32 %v2133_v53, %v2131_v46  ;;  %v691_v53 = vld [vmem:[%s2805_s7 + $0x8] sm:$0xff] }
 0x3cf   : > { %v773_v56 = vsel %vm737_vm5, %v768_v54, 0  ;;  %v883_v54 = vpack.c.bf16 %v691_v53, %v691_v53 }
 0x3d0   : > { %782 = vmatpush.bf16.msra.mxu2 %v773_v56  ;;  %v765_v57 = vpack.c.bf16 %v764_v55, %v764_v55 }
 0x3d1   : > { %v888_v55 = vsel %vm737_vm5, %v883_v54, 0 }
 0x3d3   : > { %2016 = vmatmul.msk.bf16.vlgmr.msra.gmra.mxu2 %vm733_vm6, %v765_v57 }
 0x3d4   : > { %897 = vmatpush.bf16.msrb.mxu2 %v888_v55 }
 0x3d6   : > { %v829_v58 = vpop.permute.xlu2 %828 }
 0x3d7   : > { %2018 = vmatmul.msk.bf16.vlgmr.msra.gmra.mxu3 %vm733_vm6, %v829_v58 }
 0x3de   : > { %v1037_v59 = vpop.permute.xlu2 %1036 }
 0x3df   : > { %v2106_v60 = vpack.i.bf16 %v1037_v59, %v923_v48 }
 0x3e1   : > { %2107 = vxpose.xlu2.b32.start.end [1/1] (short) (narrow) %v2106_v60, 8 }
 0x3e6   : > { %v961_v9 = vpop.permute.xlu2 %960 }
 0x3ee   : > { %v1075_v10 = vpop.permute.xlu2 %1074 }
 0x456   : > { %v784_v1 = vpop.f32.mrf.mxu2 }
 0x457   : > { %v788_v2 = vpack.c.bf16 %v784_v1, %v784_v1 }
 0x459   : > { %2021 = vmatmul.msk.bf16.vlgmr.msrb.gmra.mxu3 %vm733_vm6, %v788_v2 }
 0x45a   : > { %v845_v4 = vpop.f32.mrf.mxu3 }
 0x45b   : > { %v846_v5 = vadd.f32 %v2017_v3, %v845_v4 }
 0x45d   : > { %v849_v6 = vsel %vm733_vm6, %v846_v5, -inf }
 0x45e   : > { %v786_v7 = vpop.f32.mrf.mxu2  ;;  %850 = vmax.xlane.f32.xlu0 %v849_v6 }
 0x45f   : > { %v692_v7 = vld [vmem:[%s2805_s7 + $0x10] sm:$0xff] }
 0x462   : > { %v847_v8 = vpop.f32.mrf.mxu3 }
 0x463   : > { %v1015_v8 = vpack.c.bf16 %v692_v7, %v692_v7  ;;  %v633_v7 = vld [vmem:[%s621_s6] sm:$0x1]  ;;  %s2050_s6 = sshll.u32 %s2366_s0, 3 }
 0x47a   : > { %v2108_v11 = vpop.trf.xlu2 }
 0x47b   : > { %v2112_v12 = vunpack.i.h.bf16 %v2108_v11  ;;  %v2109_v13 = vunpack.i.l.bf16 %v2108_v11  ;;  %v1020_v11 = vsel %vm737_vm5, %v1015_v8, 0  ;;  %v634_v8 = vsub.f32 1.0, %v633_v7 }
 0x47c   : > { %1029 = vmatpush.bf16.msra.mxu2 %v1020_v11 }
 0x47d   : > { %v957_v14 = vpack.c.bf16 %v2109_v13, %v2109_v13  ;;  %v1071_v16 = vpack.c.bf16 %v2112_v12, %v2112_v12  ;;  %v1198_v13 = vld [vmem:[%s2765_s10 + $0x10] sm:$0xff] }
 0x47f   : > { %v966_v17 = vsel %vm737_vm5, %v957_v14, 0  ;;  %v1080_v18 = vsel %vm737_vm5, %v1071_v16, 0  ;;  %v1199_v14 = vld [vmem:[%s2765_s10 + $0x18] sm:$0xff] }
 0x480   : > { %975 = vmatpush.bf16.msrb.mxu0 %v966_v17  ;;  %1089 = vmatpush.bf16.msra.mxu3 %v1080_v18  ;;  %v1202_v16 = vpack.c.bf16 %v1199_v14, %v1198_v13  ;;  %v1196_v17 = vld [vmem:[%s2765_s10] sm:$0xff]  ;;  %v1197_v18 = vld [vmem:[%s2765_s10 + $0x8] sm:$0xff] }
 0x483   : > { %2023 = vmatmul.msk.bf16.vlgmr.msrb.gmra.mxu0 %vm733_vm6, %v961_v9  ;;  %2027 = vmatmul.msk.bf16.vlgmr.msra.gmra.mxu3 %vm733_vm6, %v1075_v10  ;;  %v693_v9 = vld [vmem:[%s2805_s7 + $0x18] sm:$0xff]  ;;  %s2809_s7 = smov 120  }
 0x484   : > { %v1129_v10 = vpack.c.bf16 %v693_v9, %v693_v9  ;;  %1212 = vmatpush.bf16.msrb.mxu3 %v1202_v16  ;;  %v635_v9 = vmul.f32 -1e+09, %v634_v8 }
 0x486   : > { %v1134_v12 = vsel %vm737_vm5, %v1129_v10, 0  ;;  %v2562_v10 = vperm.slane %v635_v9, 0 }
 0x4d1   : > { %v851_v19 = vpop.xlane.xlu0 %850 }
 0x4d2   : > { %v852_v20 = vsub.f32 %v846_v5, %v851_v19  ;;  %v632_v19 = vld [vmem:[%s618_s22] sm:$0xff]  ;;  %s2810_s22 = smov 104  }
 0x4d4   : > { %v853_v21 = vmul.f32 1.442695, %v852_v20  ;;  %v1201_v20 = vpack.c.bf16 %v1197_v18, %v1196_v17 }
 0x4d6   : > { %2134 = vpow2.f32 %v853_v21  ;;  %v1200_v21 = vpack.c.bf16 %v632_v19, %v632_v19  ;;  %1213 = vmatpush.bf16.msrb.mxu3 %v1201_v20 }
 0x4d9   : > { %2031 = vmatmul.msk.bf16.vlgmr.msrb.gmra.mxu3 %vm639_vm0, %v1200_v21 }
 0x4dc   : > { %v2135_v22 = vpop.eup %2134  ;;  %v2467_v23 = vpop.f32.mrf.mxu3 }
 0x4dd   : > { %v855_v24 = vsel %vm733_vm6, %v2135_v22, 0.0 }
 0x4de   : > { %856 = vadd.xlane.f32.xlu1 %v855_v24 }
 0x4e4   : > { %v920_v25 = vpop.f32.mrf.mxu3 }
 0x500   : > { %v977_v27 = vpop.f32.mrf.mxu0 }
 0x501   : > { %v978_v28 = vadd.f32 %v2022_v26, %v977_v27 }
 0x503   : > { %v981_v29 = vsel %vm733_vm6, %v978_v28, -inf }
 0x504   : > { %982 = vmax.xlane.f32.xlu2 %v981_v29 }
 0x506   : > { %v1091_v31 = vpop.f32.mrf.mxu3 }
 0x507   : > { %v1092_v32 = vadd.f32 %v2026_v30, %v1091_v31 }
 0x508   : > { %v979_v33 = vpop.f32.mrf.mxu0 }
 0x509   : > { %v1095_v34 = vsel %vm733_vm6, %v1092_v32, -inf }
 0x50a   : > { %1096 = vmax.xlane.f32.xlu1 %v1095_v34 }
 0x50e   : > { %v1093_v35 = vpop.f32.mrf.mxu3 }
 0x523   : > { %861 = vrot.lane.b32.xlu1 %v2433_v37, %s2245_s19  ;;  %s2246_s19 = smov 48  }
 0x551   : > { %v857_v36 = vpop.xlane.xlu1 %856 }
 0x55c   : > { %v2521_v31 = vpop.f32.mrf.mxu3 }
 0x55d   : > { %1224 = vxpose.xlu2.b32.start.end [1/1] (short) (narrow) %v2521_v31, 8 }
 0x564   : > { %v1217_v35 = vpop.f32.mrf.mxu3 }
 0x577   : > { %v983_v38 = vpop.xlane.xlu2 %982 }
 0x578   : > { %v984_v39 = vsub.f32 %v978_v28, %v983_v38 }
 0x57a   : > { %v985_v40 = vmul.f32 1.442695, %v984_v39 }
 0x57c   : > { %2136 = vpow2.f32 %v985_v40 }
 0x57d   : > { %v1097_v41 = vpop.xlane.xlu1 %1096 }
 0x57e   : > { %v1098_v42 = vsub.f32 %v1092_v32, %v1097_v41 }
 0x580   : > { %v1099_v43 = vmul.f32 1.442695, %v1098_v42 }
 0x582   : > { %v2137_v44 = vpop.eup %2136  ;;  %2138 = vpow2.f32 %v1099_v43 }
 0x583   : > { %v987_v45 = vsel %vm733_vm6, %v2137_v44, 0.0  ;;  %2140 = vrcp.f32 %v857_v36 }
 0x584   : > { %988 = vadd.xlane.f32.xlu1 %v987_v45 }
 0x588   : > { %v2139_v46 = vpop.eup %2138 }
 0x589   : > { %v1101_v47 = vsel %vm733_vm6, %v2139_v46, 0.0  ;;  %v2141_v48 = vpop.eup %2140 }
 0x58a   : > { %1102 = vadd.xlane.f32.xlu0 %v1101_v47  ;;  %v859_v49 = vmul.f32 %v2141_v48, %v2135_v22  ;;  %v1174_v47 = vld [vmem:[%s2764_s9 + $0x8] sm:$0xff] }
 0x58c   : > { %v860_v52 = vpack.c.bf16 %v859_v49, %v859_v49 }
 0x595   : > { %v862_v50 = vpop.permute.xlu1 %861 }
 0x596   : > { %v867_v51 = vsel %vm737_vm5, %v862_v50, 0 }
 0x597   : > { %876 = vmatpush.bf16.msrb.mxu1 %v867_v51 }
 0x59a   : > { %2019 = vmatmul.msk.bf16.vlgmr.msrb.gmra.mxu1 %vm733_vm6, %v860_v52 }
 0x59d   : > { %993 = vrot.lane.b32.xlu1 %v2433_v37, %s2246_s19  ;;  %s2814_s19 = smov 80  }
 0x59e   : > { %1107 = vrot.lane.b32.xlu0 %v2433_v37, %s2247_s23 }
 0x5f7   : > { %v989_v56 = vpop.xlane.xlu1 %988 }
 0x5f8   : > { %2142 = vrcp.f32 %v989_v56 }
 0x5fd   : > { %v1103_v57 = vpop.xlane.xlu0 %1102 }
 0x5fe   : > { %2144 = vrcp.f32 %v1103_v57  ;;  %v2143_v58 = vpop.eup %2142 }
 0x5ff   : > { %v991_v60 = vmul.f32 %v2143_v58, %v2137_v44  ;;  %v2533_v44 = vpack.c.bf16 %v2521_v31, %v2521_v31  ;;  %v2123_v58 = vld [vmem:[%s2763_s8] ss:$0 sm:$0xff] }
 0x601   : > { %v992_v2 = vpack.c.bf16 %v991_v60, %v991_v60  ;;  %1293 = vrot.lane.b32.xlu2 %v2533_v44, %s2807_s3 }
 0x604   : > { %v2145_v59 = vpop.eup %2144 }
 0x605   : > { %v1105_v61 = vmul.f32 %v2145_v59, %v2139_v46  ;;  %v1173_v46 = vld [vmem:[%s2764_s9] sm:$0xff]  ;;  %v1240_v59 = vpop.trf.xlu2 }
 0x606   : > { %v1178_v48 = vpack.c.bf16 %v1174_v47, %v1173_v46 }
 0x607   : > { %v1106_v3 = vpack.c.bf16 %v1105_v61, %v1105_v61  ;;  %v1256_v61 = vpack.c.bf16 %v1240_v59, %v1240_v59 }
 0x60f   : > { %v994_v62 = vpop.permute.xlu1 %993 }
 0x610   : > { %v999_v63 = vsel %vm737_vm5, %v994_v62, 0  ;;  %v1108_v37 = vpop.permute.xlu0 %1107 }
 0x611   : > { %v1113_v1 = vsel %vm737_vm5, %v1108_v37, 0  ;;  %1008 = vmatpush.bf16.msra.mxu1 %v999_v63  ;;  %v1264_v63 = vsel %vm737_vm5, %v1256_v61, 0 }
 0x612   : > { %1122 = vmatpush.bf16.msra.mxu0 %v1113_v1 }
 0x614   : > { %2024 = vmatmul.msk.bf16.vlgmr.msra.gmra.mxu1 %vm733_vm6, %v992_v2 }
 0x615   : > { %2028 = vmatmul.msk.bf16.vlgmr.msra.gmra.mxu0 %vm733_vm6, %v1106_v3  ;;  %1143 = vmatpush.bf16.msrb.mxu1 %v1134_v12 }
 0x616   : > { %1273 = vmatpush.bf16.msrb.mxu0 %v1264_v63 }
 0x617   : > { %v878_v4 = vpop.f32.mrf.mxu1 }
 0x618   : > { %v882_v5 = vpack.c.bf16 %v878_v4, %v878_v4 }
 0x61a   : > { %2020 = vmatmul.msk.bf16.vlgmr.msrb.gmra.mxu2 %vm733_vm6, %v882_v5 }
 0x61f   : > { %v880_v6 = vpop.f32.mrf.mxu1 }
 0x65b   : > { %v1294_v2 = vpop.permute.xlu2 %1293 }
 0x65c   : > { %v1299_v3 = vsel %vm737_vm5, %v1294_v2, 0 }
 0x65d   : > { %1308 = vmatpush.bf16.msra.mxu1 %v1299_v3 }
 0x691   : > { %v1010_v22 = vpop.f32.mrf.mxu1 }
 0x692   : > { %v1014_v24 = vpack.c.bf16 %v1010_v22, %v1010_v22  ;;  %v1124_v25 = vpop.f32.mrf.mxu0 }
 0x693   : > { %v1128_v26 = vpack.c.bf16 %v1124_v25, %v1124_v25 }
 0x694   : > { %2025 = vmatmul.msk.bf16.vlgmr.msra.gmra.mxu2 %vm733_vm6, %v1014_v24 }
 0x695   : > { %2029 = vmatmul.msk.bf16.vlgmr.msrb.gmra.mxu1 %vm733_vm6, %v1128_v26 }
 0x699   : > { %v1012_v27 = vpop.f32.mrf.mxu1 }
 0x69a   : > { %v1126_v28 = vpop.f32.mrf.mxu0 }
 0x69d   : > { %v899_v29 = vpop.f32.mrf.mxu2 }
 0x69e   : > { %v919_v33 = vadd.f32 %v2467_v23, %v899_v29  ;;  %v1175_v23 = vld [vmem:[%s2764_s9 + $0x10] sm:$0xff] }
 0x6a5   : > { %v901_v30 = vpop.f32.mrf.mxu2 }
 0x6a6   : > { %v1219_v30 = vld [vmem:[%s2766_s11] sm:$0xff] }
 0x712   : > { %v1145_v32 = vpop.f32.mrf.mxu1 }
 0x717   : > { %v1031_v34 = vpop.f32.mrf.mxu2 }
 0x718   : > { %v1035_v36 = vadd.f32 %v1031_v34, %v919_v33 }
 0x71a   : > { %v1149_v38 = vadd.f32 %v1145_v32, %v1035_v36  ;;  %v1147_v39 = vpop.f32.mrf.mxu1 }
 0x71c   : > { %v2526_v40 = vadd.f32 %v1149_v38, %v2404_v0  ;;  %v1176_v0 = vld [vmem:[%s2764_s9 + $0x18] sm:$0xff] }
 0x71d   : > { %v1179_v45 = vpack.c.bf16 %v1176_v0, %v1175_v23 }
 0x71e   : > { %v1152_v41 = vmul.f32 %v2526_v40, %v2526_v40 }
 0x71f   : > { %v1033_v42 = vpop.f32.mrf.mxu2  ;;  %1189 = vmatpush.bf16.msrb.mxu2 %v1179_v45 }
 0x720   : > { %v1153_v43 = vsel %vm639_vm0, %v1152_v41, 0.0 }
 0x721   : > { %1154 = vadd.xlane.f32.xlu1 %v1153_v43 }
 0x723   : > { %1190 = vmatpush.bf16.msrb.mxu2 %v1178_v48 }
 0x794   : > { %v1155_v49 = vpop.xlane.xlu1 %1154 }
 0x795   : > { %v1156_v50 = vmul.f32 %v1155_v49, %v2421_v15 }
 0x797   : > { %v1157_v51 = vadd.f32 1e-06, %v1156_v50 }
 0x799   : > { %2146 = vrsqrt.f32 %v1157_v51  ;;  %vm1164_vm8 = vweird.f32 %v1157_v51 }
 0x79f   : > { %v2147_v52 = vpop.eup %2146 }
 0x7a0   : > { %v1159_v53 = vmul.f32 %v2147_v52, %v1157_v51  ;;  %vm1165_vm7 = vweird.f32 %v2147_v52 }
 0x7a1   : > { %vm1166_vm9 = vmor %vm1164_vm8, %vm1165_vm7 }
 0x7a2   : > { %v1160_v54 = vmul.f32 %v2147_v52, %v1159_v53 }
 0x7a4   : > { %v1161_v55 = vmul.f32 0.5, %v1160_v54 }
 0x7a6   : > { %v1162_v56 = vsub.f32 1.5, %v1161_v55 }
 0x7a8   : > { %v1163_v57 = vmul.f32 %v2147_v52, %v1162_v56 }
 0x7aa   : > { %v1167_v60 = vsel %vm1166_vm9, %v2147_v52, %v1163_v57 }
 0x7ab   : > { %v1168_v62 = vmul.f32 %v1167_v60, %v2526_v40 }
 0x7ad   : > { %v1172_v37 = vmul.f32 %v2123_v58, %v1168_v62 }
 0x7af   : > { %v1177_v1 = vpack.c.bf16 %v1172_v37, %v1172_v37 }
 0x7b1   : > { %2030 = vmatmul.msk.bf16.vlgmr.msrb.gmra.mxu2 %vm639_vm0, %v1177_v1 }
 0x834   : > { %v1192_v4 = vpop.f32.mrf.mxu2 }
 0x835   : > { %v1223_v5 = vpack.c.bf16 %v1192_v4, %v1192_v4 }
 0x837   : > { %2032 = vmatmul.msk.bf16.vlgmr.msrb.gmra.mxu0 %vm733_vm6, %v1223_v5 }
 0x83c   : > { %v1194_v6 = vpop.f32.mrf.mxu2 }
 0x8b4   : > { %v1275_v11 = vpop.f32.mrf.mxu0 }
 0x8b5   : > { %v1276_v12 = vadd.f32 %v1275_v11, %v2562_v10 }
 0x8b7   : > { %v1279_v13 = vsel %vm733_vm6, %v1276_v12, -inf }
 0x8b8   : > { %1280 = vmax.xlane.f32.xlu0 %v1279_v13 }
 0x8bc   : > { %v1277_v14 = vpop.f32.mrf.mxu0 }
 0x8cc   : > { %1317 = vrot.lane.b32.xlu0 %v2521_v31, %s2809_s7 }
 0x8d4   : > { %1560 = vrot.lane.b32.xlu0 %v2521_v31, %s2810_s22 }
 0x8dc   : > { %1484 = vrot.lane.b32.xlu0 %v1223_v5, %s2811_s29 }
 0x8e4   : > { %1596 = vrot.lane.b32.xlu0 %v1223_v5, %s2810_s22 }
 0x92b   : > { %v1281_v16 = vpop.xlane.xlu0 %1280 }
 0x92c   : > { %v1282_v17 = vsub.f32 %v1276_v12, %v1281_v16 }
 0x92e   : > { %v1283_v18 = vmul.f32 1.442695, %v1282_v17 }
 0x930   : > { %2148 = vpow2.f32 %v1283_v18 }
 0x936   : > { %v2149_v19 = vpop.eup %2148 }
 0x937   : > { %v1285_v20 = vsel %vm733_vm6, %v2149_v19, 0.0 }
 0x938   : > { %1286 = vadd.xlane.f32.xlu1 %v1285_v20 }
 0x93e   : > { %v1318_v21 = vpop.permute.xlu0 %1317 }
 0x946   : > { %v1561_v27 = vpop.permute.xlu0 %1560 }
 0x94e   : > { %v1485_v42 = vpop.permute.xlu0 %1484 }
 0x951   : > { %1448 = vrot.lane.b32.xlu1 %v2521_v31, %s2811_s29  ;;  %v1315_v31 = vpack.c.bf16 %v1219_v30, %v1219_v30  ;;  %s1881_s29 = scalar_lea.hbm %s2772_s17, %s2050_s6 }
 0x952   : > { %s1885_s20 = sshll.u32 %s1881_s29, 4  ;;  %s1886_s20 = int_to_ptr.hbm [resolvable:$true] %s1885_s20 }
 0x953   : > { %v1433_v32 = vsel %vm737_vm5, %v1315_v31, 0 }
 0x954   : > { %1442 = vmatpush.bf16.msrb.mxu1 %v1433_v32 }
 0x956   : > { %v1597_v43 = vpop.permute.xlu0 %1596 }
 0x959   : > { %1354 = vrot.lane.b32.xlu1 %v1223_v5, %s2809_s7 }
 0x98e   : > { %1320 = vxpose.xlu1.b32.start.end [1/1] (short) (narrow) %v1318_v21, 8 }
 0x9ab   : > { %v1287_v22 = vpop.xlane.xlu1 %1286 }
 0x9ac   : > { %2150 = vrcp.f32 %v1287_v22 }
 0x9b2   : > { %v2151_v24 = vpop.eup %2150 }
 0x9b3   : > { %v1289_v25 = vmul.f32 %v2151_v24, %v2149_v19 }
 0x9b5   : > { %v1290_v26 = vpack.c.bf16 %v1289_v25, %v1289_v25 }
 0x9b7   : > { %2033 = vmatmul.msk.bf16.vlgmr.msra.gmra.mxu1 %vm733_vm6, %v1290_v26 }
 0x9c3   : > { %v1449_v28 = vpop.permute.xlu1 %1448 }
 0x9c4   : > { %v2113_v29 = vpack.i.bf16 %v1561_v27, %v1449_v28 }
 0x9c6   : > { %2114 = vxpose.xlu0.b32.start.end [1/1] (short) (narrow) %v2113_v29, 8 }
 0x9cb   : > { %v1355_v33 = vpop.permute.xlu1 %1354 }
 0xa32   : > { %v1336_v34 = vpop.trf.xlu1 }
 0xa33   : > { %v1352_v35 = vpack.c.bf16 %v1336_v34, %v1336_v34  ;;  %v1220_v34 = vld [vmem:[%s2766_s11 + $0x8] sm:$0xff] }
 0xa34   : > { %v1310_v36 = vpop.f32.mrf.mxu1 }
 0xa35   : > { %v1360_v38 = vsel %vm737_vm5, %v1352_v35, 0  ;;  %v1314_v39 = vpack.c.bf16 %v1310_v36, %v1310_v36  ;;  %v1409_v35 = vpack.c.bf16 %v1220_v34, %v1220_v34  ;;  %v1774_v34 = vld [vmem:[%s2771_s16 + $0x8] sm:$0xff] }
 0xa36   : > { %1369 = vmatpush.bf16.msra.mxu2 %v1360_v38 }
 0xa37   : > { %2037 = vmatmul.msk.bf16.vlgmr.msrb.gmra.mxu1 %vm733_vm6, %v1314_v39  ;;  %v1414_v36 = vsel %vm737_vm5, %v1409_v35, 0  ;;  %v1775_v35 = vld [vmem:[%s2771_s16 + $0x10] sm:$0xff] }
 0xa38   : > { %1423 = vmatpush.bf16.msra.mxu0 %v1414_v36  ;;  %v1776_v36 = vld [vmem:[%s2771_s16 + $0x18] sm:$0xff] }
 0xa39   : > { %2034 = vmatmul.msk.bf16.vlgmr.msra.gmra.mxu2 %vm733_vm6, %v1355_v33 }
 0xa3c   : > { %v1312_v41 = vpop.f32.mrf.mxu1 }
 0xa6a   : > { %v2115_v23 = vpop.trf.xlu0 }
 0xa6b   : > { %v2119_v0 = vunpack.i.h.bf16 %v2115_v23  ;;  %v2116_v45 = vunpack.i.l.bf16 %v2115_v23 }
 0xa6d   : > { %v1483_v46 = vpack.c.bf16 %v2116_v45, %v2116_v45  ;;  %v1595_v47 = vpack.c.bf16 %v2119_v0, %v2119_v0  ;;  %v1221_v0 = vld [vmem:[%s2766_s11 + $0x10] sm:$0xff] }
 0xa6e   : > { %v1539_v45 = vpack.c.bf16 %v1221_v0, %v1221_v0  ;;  %v1779_v0 = vld [vmem:[%s2771_s16 + $0x30] sm:$0xff] }
 0xa6f   : > { %v1490_v48 = vsel %vm737_vm5, %v1483_v46, 0  ;;  %v1602_v49 = vsel %vm737_vm5, %v1595_v47, 0 }
 0xa70   : > { %1499 = vmatpush.bf16.msrb.mxu2 %v1490_v48  ;;  %1611 = vmatpush.bf16.msra.mxu1 %v1602_v49  ;;  %v1544_v46 = vsel %vm737_vm5, %v1539_v45, 0  ;;  %v1780_v45 = vld [vmem:[%s2771_s16 + $0x38] sm:$0xff] }
 0xa71   : > { %1553 = vmatpush.bf16.msrb.mxu0 %v1544_v46 }
 0xa73   : > { %2038 = vmatmul.msk.bf16.vlgmr.msrb.gmra.mxu2 %vm733_vm6, %v1485_v42  ;;  %2041 = vmatmul.msk.bf16.vlgmr.msra.gmra.mxu1 %vm733_vm6, %v1597_v43  ;;  %v1222_v42 = vld [vmem:[%s2766_s11 + $0x18] sm:$0xff] }
 0xa74   : > { %v1651_v43 = vpack.c.bf16 %v1222_v42, %v1222_v42  ;;  %v1777_v42 = vld [vmem:[%s2771_s16 + $0x20] sm:$0xff] }
 0xa76   : > { %v1656_v23 = vsel %vm737_vm5, %v1651_v43, 0 }
 0xab4   : > { %v2588_v50 = vpop.f32.mrf.mxu1 }
 0xabc   : > { %v1371_v51 = vpop.f32.mrf.mxu2  ;;  %v1446_v52 = vpop.f32.mrf.mxu1 }
 0xabd   : > { %v1372_v53 = vadd.f32 %v1371_v51, %v2562_v10 }
 0xabf   : > { %v1375_v54 = vsel %vm733_vm6, %v1372_v53, -inf }
 0xac0   : > { %1376 = vmax.xlane.f32.xlu0 %v1375_v54 }
 0xac4   : > { %v1373_v55 = vpop.f32.mrf.mxu2 }
 0xad4   : > { %1629 = vrot.lane.b32.xlu0 %v2533_v44, %s2812_s1 }
 0xaf0   : > { %v1613_v56 = vpop.f32.mrf.mxu1 }
 0xaf1   : > { %v1614_v57 = vadd.f32 %v1613_v56, %v2562_v10 }
 0xaf3   : > { %v1617_v58 = vsel %vm733_vm6, %v1614_v57, -inf }
 0xaf4   : > { %1618 = vmax.xlane.f32.xlu1 %v1617_v58 }
 0xaf6   : > { %v1501_v59 = vpop.f32.mrf.mxu2 }
 0xaf7   : > { %v1502_v60 = vadd.f32 %v1501_v59, %v2562_v10 }
 0xaf8   : > { %v1615_v61 = vpop.f32.mrf.mxu1 }
 0xaf9   : > { %v1505_v62 = vsel %vm733_vm6, %v1502_v60, -inf }
 0xafa   : > { %1506 = vmax.xlane.f32.xlu2 %v1505_v62 }
 0xafe   : > { %v1503_v63 = vpop.f32.mrf.mxu2 }
 0xb33   : > { %v1377_v37 = vpop.xlane.xlu0 %1376 }
 0xb34   : > { %v1378_v1 = vsub.f32 %v1372_v53, %v1377_v37 }
 0xb36   : > { %v1379_v2 = vmul.f32 1.442695, %v1378_v1 }
 0xb38   : > { %2152 = vpow2.f32 %v1379_v2  ;;  %v1697_v2 = vld [vmem:[%s2768_s13 + $0x10] sm:$0xff] }
 0xb3e   : > { %v2153_v3 = vpop.eup %2152 }
 0xb3f   : > { %v1381_v4 = vsel %vm733_vm6, %v2153_v3, 0.0 }
 0xb40   : > { %1382 = vadd.xlane.f32.xlu2 %v1381_v4  ;;  %v1696_v4 = vld [vmem:[%s2768_s13 + $0x8] sm:$0xff] }
 0xb46   : > { %v1630_v5 = vpop.permute.xlu0 %1629 }
 0xb47   : > { %v1635_v6 = vsel %vm737_vm5, %v1630_v5, 0 }
 0xb48   : > { %1644 = vmatpush.bf16.msra.mxu2 %v1635_v6  ;;  %v1725_v6 = vld [vmem:[%s2769_s14 + $0x30] sm:$0xff] }
 0xb58   : > { %1387 = vrot.lane.b32.xlu2 %v2533_v44, %s2813_s21  ;;  %s602_s21 = sand.u32 1, %s2226_s28  }
 0xb59   : > { %s1867_s1 = scalar_lea.sflag [#allocation3], %s602_s21 }
 0xb67   : > { %v1619_v7 = vpop.xlane.xlu1 %1618 }
 0xb68   : > { %v1620_v10 = vsub.f32 %v1614_v57, %v1619_v7  ;;  %v1726_v7 = vld [vmem:[%s2769_s14 + $0x38] sm:$0xff] }
 0xb6a   : > { %v1621_v12 = vmul.f32 1.442695, %v1620_v10  ;;  %v1724_v10 = vld [vmem:[%s2769_s14 + $0x28] sm:$0xff] }
 0xb6d   : > { %v1507_v8 = vpop.xlane.xlu2 %1506 }
 0xb6e   : > { %v1508_v9 = vsub.f32 %v1502_v60, %v1507_v8  ;;  %v1723_v8 = vld [vmem:[%s2769_s14 + $0x20] sm:$0xff] }
 0xb70   : > { %v1509_v11 = vmul.f32 1.442695, %v1508_v9  ;;  %v1731_v9 = vpack.c.bf16 %v1726_v7, %v1725_v6 }
 0xb72   : > { %2154 = vpow2.f32 %v1509_v11  ;;  %1740 = vmatpush.bf16.msrb.mxu1 %v1731_v9  ;;  %v2248_v9 = vmov 0  }
 0xb73   : > { %2156 = vpow2.f32 %v1621_v12  ;;  %v1730_v12 = vpack.c.bf16 %v1724_v10, %v1723_v8  ;;  %2120 = vset.pattern.permute.xlu2 %v2248_v9  ;;  %2121 = vset.pattern.permute.xlu0 %v2248_v9 }
 0xb76   : > { %1741 = vmatpush.bf16.msrb.mxu1 %v1730_v12 }
 0xb78   : > { %v2155_v13 = vpop.eup %2154 }
 0xb79   : > { %v1511_v14 = vsel %vm733_vm6, %v2155_v13, 0.0  ;;  %v2157_v16 = vpop.eup %2156 }
 0xb7a   : > { %1512 = vadd.xlane.f32.xlu1 %v1511_v14  ;;  %v1623_v17 = vsel %vm733_vm6, %v2157_v16, 0.0  ;;  %v1721_v14 = vld [vmem:[%s2769_s14 + $0x10] sm:$0xff] }
 0xb81   : > { %1624 = vadd.xlane.f32.xlu2 %v1623_v17 }
 0xb93   : > { %1517 = vrot.lane.b32.xlu1 %v2533_v44, %s2814_s19  ;;  %s2009_s19 = sshll.u32 %s602_s21, 3 }
 0xb94   : > { %s604_s23 = scalar_lea.vmem [#allocation2], %s2009_s19  ;;  %s2186_s19 = sshra.s32 %s1886_s20, 4  ;;  %s2187_s19 = int_to_ptr.hbm [resolvable:$true] %s2186_s19 }
 0xb95   : > { %s1883_s24 = sshll.u32 %s604_s23, 4  ;;  %s2188_s26 = scalar_lea.hbm %s2187_s19, 8  ;;  %s1884_s24 = int_to_ptr.vmem [resolvable:$true] %s1883_s24 }
 0xb96   : > { %p2189_p11 = scmp.ne.s32.totalorder %s2187_s19, %s2188_s26  ;;  %p2193_p0 = scmp.lt.s32.totalorder %s2187_s19, %s2772_s17 }
 0xb98   : > { %p2190_p12 = pnand %p2189_p11, %p2383_p5 }
 0xb9a   : > { %p2191_p13 = pneg %p2190_p12 }
 0xbb3   : > { %v1383_v18 = vpop.xlane.xlu2 %1382 }
 0xbb4   : > { %2158 = vrcp.f32 %v1383_v18 }
 0xbba   : > { %v2159_v19 = vpop.eup %2158 }
 0xbbb   : > { %v1385_v20 = vmul.f32 %v2159_v19, %v2153_v3  ;;  %v1388_v21 = vpop.permute.xlu2 %1387 }
 0xbbc   : > { %v1393_v22 = vsel %vm737_vm5, %v1388_v21, 0 }
 0xbbd   : > { %v1386_v24 = vpack.c.bf16 %v1385_v20, %v1385_v20  ;;  %1402 = vmatpush.bf16.msra.mxu3 %v1393_v22 }
 0xbc0   : > { %2035 = vmatmul.msk.bf16.vlgmr.msra.gmra.mxu3 %vm733_vm6, %v1386_v24 }
 0xbed   : > { %v1513_v26 = vpop.xlane.xlu1 %1512 }
 0xbf4   : > { %v1625_v25 = vpop.xlane.xlu2 %1624 }
 0xbf5   : > { %2160 = vrcp.f32 %v1625_v25 }
 0xbf6   : > { %2162 = vrcp.f32 %v1513_v26  ;;  %v2124_v26 = vld [vmem:[%s2767_s12] ss:$0 sm:$0xff] }
 0xbfb   : > { %v2161_v27 = vpop.eup %2160 }
 0xbfc   : > { %v1627_v28 = vmul.f32 %v2161_v27, %v2157_v16  ;;  %v2163_v44 = vpop.eup %2162  ;;  %v1722_v16 = vld [vmem:[%s2769_s14 + $0x18] sm:$0xff] }
 0xbfd   : > { %v1515_v30 = vmul.f32 %v2163_v44, %v2155_v13  ;;  %v1729_v18 = vpack.c.bf16 %v1722_v16, %v1721_v14  ;;  %v636_v16 = vld [vmem:[%s625_s5] sm:$0xff]  ;;  %s2192_s5 = scalar_lea.hbm %s2772_s17, 16 }
 0xbfe   : > { %v1628_v29 = vpack.c.bf16 %v1627_v28, %v1627_v28  ;;  %p2194_p1 = scmp.lt.s32.totalorder %s2192_s5, %s2188_s26 }
 0xbff   : > { %v1516_v33 = vpack.c.bf16 %v1515_v30, %v1515_v30  ;;  %1742 = vmatpush.bf16.msrb.mxu1 %v1729_v18  ;;  %v1719_v30 = vld [vmem:[%s2769_s14] sm:$0xff] }
 0xc00   : > { %2042 = vmatmul.msk.bf16.vlgmr.msra.gmra.mxu2 %vm733_vm6, %v1628_v29  ;;  %p2195_p2 = por %p2194_p1, %p2193_p0 }
 0xc02   : > { %p2196_p3 = pnand %p2195_p2, %p2191_p13 }
 0xc05   : > { %v1518_v31 = vpop.permute.xlu1 %1517 }
 0xc06   : > { %v1523_v32 = vsel %vm737_vm5, %v1518_v31, 0  ;;  %v1720_v31 = vld [vmem:[%s2769_s14 + $0x8] sm:$0xff] }
 0xc07   : > { %1532 = vmatpush.bf16.msrb.mxu3 %v1523_v32  ;;  %v1728_v32 = vpack.c.bf16 %v1720_v31, %v1719_v30 }
 0xc09   : > { %1743 = vmatpush.bf16.msrb.mxu1 %v1728_v32 }
 0xc0a   : > { %2039 = vmatmul.msk.bf16.vlgmr.msrb.gmra.mxu3 %vm733_vm6, %v1516_v33  ;;  %v1773_v33 = vld [vmem:[%s2771_s16] sm:$0xff] }
 0xc0b   : > { %1665 = vmatpush.bf16.msra.mxu3 %v1656_v23  ;;  %1782 = vxpose.xlu1.b32.start [1/8] (short) (narrow) %v1773_v33, 32  ;;  %v1778_v23 = vld [vmem:[%s2771_s16 + $0x28] sm:$0xff] }
 0xc13   : > { %1783 = vxpose.xlu1.b32.cont [2/8] (short) (narrow) %v1774_v34, 32 }
 0xc1b   : > { %1784 = vxpose.xlu1.b32.cont [3/8] (short) (narrow) %v1775_v35, 32 }
 0xc23   : > { %1785 = vxpose.xlu1.b32.cont [4/8] (short) (narrow) %v1776_v36, 32 }
 0xc2b   : > { %1786 = vxpose.xlu1.b32.cont [5/8] (short) (narrow) %v1777_v42, 32 }
 0xc33   : > { %1787 = vxpose.xlu1.b32.cont [6/8] (short) (narrow) %v1778_v23, 32 }
 0xc3b   : > { %1788 = vxpose.xlu1.b32.cont [7/8] (short) (narrow) %v1779_v0, 32 }
 0xc43   : > { %v1404_v38 = vpop.f32.mrf.mxu3  ;;  %1789 = vxpose.xlu1.b32.end [8/8] (short) (narrow) %v1780_v45, 32 }
 0xc44   : > { %v1408_v39 = vpack.c.bf16 %v1404_v38, %v1404_v38 }
 0xc46   : > { %2036 = vmatmul.msk.bf16.vlgmr.msra.gmra.mxu0 %vm733_vm6, %v1408_v39 }
 0xc4b   : > { %v1406_v41 = vpop.f32.mrf.mxu3 }
 0xc83   : > { %v1646_v47 = vpop.f32.mrf.mxu2 }
 0xc84   : > { %v1650_v48 = vpack.c.bf16 %v1646_v47, %v1646_v47 }
 0xc86   : > { %2043 = vmatmul.msk.bf16.vlgmr.msra.gmra.mxu3 %vm733_vm6, %v1650_v48 }
 0xc8b   : > { %v1648_v49 = vpop.f32.mrf.mxu2 }
 0xc8d   : > { %v1534_v51 = vpop.f32.mrf.mxu3 }
 0xc8e   : > { %v1538_v52 = vpack.c.bf16 %v1534_v51, %v1534_v51 }
 0xc90   : > { %2040 = vmatmul.msk.bf16.vlgmr.msrb.gmra.mxu0 %vm733_vm6, %v1538_v52 }
 0xc95   : > { %v1536_v53 = vpop.f32.mrf.mxu3 }
 0xcaf   : > { %v1798_v52 = vpop.trf.xlu1 }
 0xcb7   : > { %v1799_v53 = vpop.trf.xlu1 }
 0xcc3   : > { %v1425_v54 = vpop.f32.mrf.mxu0 }
 0xcc4   : > { %v1445_v57 = vadd.f32 %v2588_v50, %v1425_v54  ;;  %v1698_v50 = vld [vmem:[%s2768_s13 + $0x18] sm:$0xff]  ;;  %v1800_v54 = vpop.trf.xlu1 }
 0xcc5   : > { %v1701_v3 = vpack.c.bf16 %v1698_v50, %v1697_v2  ;;  %v2125_v50 = vld [vmem:[%s2770_s15] ss:$0 sm:$0xff] }
 0xcc7   : > { %1711 = vmatpush.bf16.msra.mxu0 %v1701_v3 }
 0xccb   : > { %v1427_v55 = vpop.f32.mrf.mxu0 }
 0xccc   : > { %v1801_v55 = vpop.trf.xlu1 }
 0xd09   : > { %v1667_v56 = vpop.f32.mrf.mxu3 }
 0xd0d   : > { %v1555_v58 = vpop.f32.mrf.mxu0 }
 0xd0e   : > { %v1559_v59 = vadd.f32 %v1555_v58, %v1445_v57  ;;  %v1814_v57 = vpack.c.bf16 %v1799_v53, %v1798_v52 }
 0xd10   : > { %v1671_v60 = vadd.f32 %v1667_v56, %v1559_v59  ;;  %v1815_v56 = vpack.c.bf16 %v1801_v55, %v1800_v54 }
 0xd11   : > { %v1669_v61 = vpop.f32.mrf.mxu3 }
 0xd12   : > { %v2628_v62 = vadd.f32 %v1671_v60, %v2526_v40  ;;  %v1695_v40 = vld [vmem:[%s2768_s13] sm:$0xff]  ;;  %1825 = vmatpush.bf16.msrb.mxu2 %v1815_v56 }
 0xd13   : > { %v1700_v5 = vpack.c.bf16 %v1696_v4, %v1695_v40 }
 0xd14   : > { %v1674_v63 = vmul.f32 %v2628_v62, %v2628_v62 }
 0xd15   : > { %v1557_v37 = vpop.f32.mrf.mxu0  ;;  %1712 = vmatpush.bf16.msra.mxu0 %v1700_v5 }
 0xd16   : > { %v1675_v1 = vsel %vm639_vm0, %v1674_v63, 0.0  ;;  %1826 = vmatpush.bf16.msrb.mxu2 %v1814_v57 }
 0xd17   : > { %1676 = vadd.xlane.f32.xlu0 %v1675_v1 }
 0xd8a   : > { %v1677_v11 = vpop.xlane.xlu0 %1676 }
 0xd8b   : > { %v1678_v13 = vmul.f32 %v1677_v11, %v2421_v15 }
 0xd8d   : > { %v1679_v17 = vadd.f32 1e-06, %v1678_v13 }
 0xd8f   : > { %2164 = vrsqrt.f32 %v1679_v17  ;;  %vm1686_vm11 = vweird.f32 %v1679_v17 }
 0xd95   : > { %v2165_v19 = vpop.eup %2164 }
 0xd96   : > { %v1681_v20 = vmul.f32 %v2165_v19, %v1679_v17  ;;  %vm1687_vm10 = vweird.f32 %v2165_v19 }
 0xd97   : > { %vm1688_vm12 = vmor %vm1686_vm11, %vm1687_vm10 }
 0xd98   : > { %v1682_v21 = vmul.f32 %v2165_v19, %v1681_v20 }
 0xd9a   : > { %v1683_v22 = vmul.f32 0.5, %v1682_v21 }
 0xd9c   : > { %v1684_v24 = vsub.f32 1.5, %v1683_v22 }
 0xd9e   : > { %v1685_v25 = vmul.f32 %v2165_v19, %v1684_v24 }
 0xda0   : > { %v1689_v27 = vsel %vm1688_vm12, %v2165_v19, %v1685_v25  ;;  %v1844_v19 = vlaneseq }
 0xda1   : > { %v1690_v28 = vmul.f32 %v1689_v27, %v2628_v62 }
 0xda2   : > { %v1845_v20 = vand.u32 127, %v1844_v19 }
 0xda3   : > { %v1694_v29 = vmul.f32 %v2124_v26, %v1690_v28 }
 0xda5   : > { %v1699_v44 = vpack.c.bf16 %v1694_v29, %v1694_v29 }
 0xda7   : > { %2044 = vmatmul.msk.bf16.vlgmr.msra.gmra.mxu0 %vm639_vm0, %v1699_v44 }
 0xe24   : > { %v1714_v38 = vpop.f32.mrf.mxu0 }
 0xe25   : > { %v1718_v39 = vmax.f32 %v1714_v38, 0.0 }
 0xe27   : > { %v1727_v41 = vpack.c.bf16 %v1718_v39, %v1718_v39 }
 0xe29   : > { %2045 = vmatmul.msk.bf16.vlgmr.msrb.gmra.mxu1 %vm1732_vm13, %v1727_v41 }
 0xe2c   : > { %v1716_v43 = vpop.f32.mrf.mxu0 }
 0xea6   : > { %v1745_v46 = vpop.f32.mrf.mxu1 }
 0xea7   : > { %v1749_v47 = vadd.f32 %v1745_v46, %v2628_v62 }
 0xea9   : > { %v1751_v48 = vmul.f32 %v1749_v47, %v1749_v47 }
 0xeab   : > { %v1752_v49 = vsel %vm639_vm0, %v1751_v48, 0.0 }
 0xeac   : > { %1753 = vadd.xlane.f32.xlu2 %v1752_v49 }
 0xeae   : > { %v1747_v51 = vpop.f32.mrf.mxu1 }
 0xf1f   : > { %v1754_v58 = vpop.xlane.xlu2 %1753 }
 0xf20   : > { %v1755_v59 = vmul.f32 %v1754_v58, %v2421_v15 }
 0xf22   : > { %v1756_v60 = vadd.f32 1e-06, %v1755_v59 }
 0xf24   : > { %2166 = vrsqrt.f32 %v1756_v60  ;;  %vm1763_vm15 = vweird.f32 %v1756_v60 }
 0xf2a   : > { %v2167_v61 = vpop.eup %2166 }
 0xf2b   : > { %v1758_v62 = vmul.f32 %v2167_v61, %v1756_v60  ;;  %vm1764_vm14 = vweird.f32 %v2167_v61 }
 0xf2c   : > { %vm1765_vm1 = vmor %vm1763_vm15, %vm1764_vm14 }
 0xf2d   : > { %v1759_v63 = vmul.f32 %v2167_v61, %v1758_v62 }
 0xf2f   : > { %v1760_v37 = vmul.f32 0.5, %v1759_v63 }
 0xf31   : > { %v1761_v1 = vsub.f32 1.5, %v1760_v37 }
 0xf33   : > { %v1762_v2 = vmul.f32 %v2167_v61, %v1761_v1 }
 0xf35   : > { %v1766_v3 = vsel %vm1765_vm1, %v2167_v61, %v1762_v2 }
 0xf36   : > { %v1767_v40 = vmul.f32 %v1766_v3, %v1749_v47 }
 0xf38   : > { %v1771_v15 = vmul.f32 %v2125_v50, %v1767_v40 }
 0xf3a   : > { %v1772_v4 = vmul.f32 0.17677669, %v1771_v15 }
 0xf3c   : > { %v1781_v5 = vpack.c.bf16 %v1772_v4, %v1772_v4 }
 0xf3e   : > { %2046 = vmatmul.msk.bf16.vlgmr.msrb.gmra.mxu2 %vm639_vm0, %v1781_v5  ;;  %vm1846_vm0 = vcmp.eq.s32.totalorder %v636_v16, 4294967196 }
 0xf3f   : > { %v1847_v17 = vsel %vm1846_vm0, 0, %v636_v16 }
 0xfc1   : > { %v1828_v6 = vpop.f32.mrf.mxu2 }
 0xfc2   : > { %v1832_v7 = vsel %vm1732_vm13, %v1828_v6, -inf  ;;  %1861 = vst.msk [vmem:[%s604_s23] sm:$0xff] %vm1732_vm13, %v1828_v6 }
 0xfc3   : > { %1833 = vmax.xlane.f32.xlu2 %v1832_v7 }
 0xfc9   : > { %v1830_v8 = vpop.f32.mrf.mxu2 }
0x1036   : > { %v1834_v10 = vpop.xlane.xlu2 %1833 }
0x1037   : > { %v1835_v11 = vsub.f32 %v1828_v6, %v1834_v10 }
0x1039   : > { %v1836_v12 = vmul.f32 1.442695, %v1835_v11 }
0x103b   : > { %2168 = vpow2.f32 %v1836_v12 }
0x1041   : > { %v2169_v13 = vpop.eup %2168 }
0x1042   : > { %v1838_v14 = vsel %vm1732_vm13, %v2169_v13, 0.0 }
0x1043   : > { %1839 = vadd.xlane.f32.xlu2 %v1838_v14 }
0x105b   : > { %1849 = vperm.xlu2 %2120, %v1847_v17  }
0x10b6   : > { %v1840_v18 = vpop.xlane.xlu2 %1839 }
0x10b7   : > { %2199 = shalt.err (!%p2196_p3)
}
0x10b8   : > { %2053 = dma.vmem_to_hbm [thread:$0]  (%p2383_p5), %s1884_s24, 128, %s1886_s20, %s1867_s1   ;;  %v2249_v22 = vmov 0.0   ;;  %2170 = vlog2.f32 %v1840_v18  ;;  %vm1858_vm3 = vcmp.ne.s32.totalorder %v636_v16, 4294967196  ;;  %vm1864_vm4 = vcmask 7168  }
0x10b9   : > { %v2048_v44 = vsel %vm1858_vm3, 1.0, %v2249_v22  ;;  %s629_s23 = scalar_lea.vmem %s2773_s18, %s2398_s25 }
0x10be   : > { %v1850_v21 = vpop.permute.xlu2 %1849  ;;  %v2171_v27 = vpop.eup %2170 }
0x10bf   : > { %vm1851_vm2 = vcmp.eq.s32.totalorder %v1845_v20, %v1850_v21  ;;  %v1842_v28 = vmul.f32 0.6931472, %v2171_v27 }
0x10c0   : > { %v2047_v24 = vsel %vm1851_vm2, 1.0, %v2249_v22 }
0x10c1   : > { %v1854_v25 = vmul.f32 %v2047_v24, %v1828_v6  ;;  %v1843_v29 = vadd.f32 %v1842_v28, %v1834_v10 }
0x10c3   : > { %v1855_v26 = vsel %vm1732_vm13, %v1854_v25, 0.0 }
0x10c4   : > { %1856 = vadd.xlane.f32.xlu0 %v1855_v26 }
0x1137   : > { %v1857_v30 = vpop.xlane.xlu0 %1856 }
0x1138   : > { %v1862_v31 = vsub.f32 %v1843_v29, %v1857_v30 }
0x113a   : > { %v1863_v32 = vmul.f32 %v2048_v44, %v1862_v31 }
0x113c   : > { %1865 = vst.msk [vmem:[%s629_s23] sm:$0xff] %vm1864_vm4, %v1863_v32 }
0x113d PF: > { %p2059_p4 = scmp.ge.s32.totalorder %s2234_s30, 2  ;;  %s1900_s29 = sand.u32 1, %s2222_s27  }
0x113e   : > { %s1901_s24 = scalar_lea.sflag [#allocation3], %s1900_s29 }
0x113f   : > { %p2056_p5 = pnand %p2059_p4, %p2387_p6 }
0x1141   : > { %p2057_p7 = pneg %p2056_p5 }
0x1143   : > { %2217 = dma.done.wait (%p2057_p7), %s1901_s24, 128  }
0x1144   : > { %2219 = vsyncadd (%p2057_p7), %s1901_s24, 4294967168  ;;  %s2816_s30 = sld [smem:[#allocation6_spill]]  ;;  %s2819_s27 = smov %s2226_s28 }
0x1145   : > { %s2817_s20 = sld [smem:[#allocation5_spill]] }
0x1146   : > { %s2818_s29 = sld [smem:[#allocation7_spill]] }
0x114a   : > { %p29_p8 = scmp.ge.s32.totalorder %s2816_s30, 4  }
0x114b   : > { %s2820_s28 = smov %s2817_s20 }
0x114c   :  { %31 = sbr.rel (!%p29_p8) target bundleno = 11 (0xb), region = 147 }
0x1151   :  { %1914 = vsyncpa [#allocation3], 1 }
0x1152   :  { %1916 = vsyncpa [#allocation3 + $0x1], 1 }

</bundles_post_ra>
